<compile_context>
chip_gen: v6e
topology: v6e:2x2x1
jax: 0.10.0
libtpu: 0.0.40
codegen_flags: <defaults>
</compile_context>

<pallas_src>
import functools
from typing import NamedTuple

import numpy as np
import jax
import jax.numpy as jnp
from jax.experimental import pallas as pl
from jax.experimental.pallas import tpu as pltpu


def _round_up(v, m):
    return (v + m - 1) // m * m


# ------------------------------ static plan ---------------------------------
class _Stage(NamedTuple):
    name: str
    cin: int
    cout: int
    K: int
    scale: int
    relu: bool
    L: int        # input length
    Lo: int       # output length  (= L * scale)
    Lp: int       # zero-padded upsampled length (= Lo + 2*(K//2))
    w_off: int    # row offset into fused weight / bias buffers
    sel_off: int  # row offset into fused selection buffer


def _stage_defs(input_dim):
    defs = [("upconv_1", 16, 32, 3, 4, True),
            ("upconv_2", 32, 32, 3, 2, True),
            ("upconv_3", 32, 32, 3, 2, True)]
    if input_dim in (4096, 8192):
        defs.append(("upconv_3_2", 32, 32, 3, 2, True))
    if input_dim == 8192:
        defs.append(("upconv_3_3", 32, 32, 3, 2, True))
    defs += [("upconv_4", 32, 16, 5, 4, True),
             ("upconv_5", 16, 16, 5, 2, True),
             ("conv_6", 16, 1, 5, 2, False)]   # upsample_6 (x2) fused into conv_6
    return defs


def _build_plan(input_dim, lat_len):
    plan, L = [], lat_len
    w_rows = sel_rows = kc_max = lp_max = 0
    for name, cin, cout, K, scale, relu in _stage_defs(input_dim):
        Lo, pad = L * scale, K // 2
        Lp = Lo + 2 * pad
        plan.append(_Stage(name, cin, cout, K, scale, relu, L, Lo, Lp,
                           w_rows, sel_rows))
        w_rows += _round_up(cout, 8)        # keep sublane-aligned row offsets
        sel_rows += _round_up(L, 8)
        kc_max = max(kc_max, K * cin)
        lp_max = max(lp_max, Lp)
        L = Lo
    return tuple(plan), w_rows, sel_rows, kc_max, lp_max, L


# ------------------- host-side packing (done ONCE per model) ----------------
def pack_decoder_inputs(params, input_dim, lat_len, compute_dtype=jnp.bfloat16):
    """Fuse all weights/biases and precompute the upsample+pad selection
    matrices into three device buffers (bf16 for MXU operands)."""
    plan, w_rows, sel_rows, kc_max, lp_max, _ = _build_plan(input_dim, lat_len)
    selbuf = np.zeros((sel_rows, lp_max), np.float32)
    wbuf = np.zeros((w_rows, kc_max), np.float32)
    bbuf = np.zeros((w_rows, 1), np.float32)
    for st in plan:
        w, b = params[st.name]                        # (K, Cout, Cin), (Cout,)
        # w2[o, t*Cin + c] = w[t, o, c]
        w2 = np.transpose(np.asarray(w), (1, 0, 2)).reshape(st.cout, st.K * st.cin)
        wbuf[st.w_off:st.w_off + st.cout, :st.K * st.cin] = w2
        bbuf[st.w_off:st.w_off + st.cout, 0] = np.asarray(b)
        # sel[r, j] = 1  iff  0 <= j - pad - r*scale < scale
        pad = st.K // 2
        d = np.arange(st.Lp)[None, :] - pad - np.arange(st.L)[:, None] * st.scale
        selbuf[st.sel_off:st.sel_off + st.L, :st.Lp] = (d >= 0) & (d < st.scale)
    return (jnp.asarray(selbuf, compute_dtype),
            jnp.asarray(wbuf, compute_dtype),
            jnp.asarray(bbuf, jnp.float32))


# --------------------------- fused decoder kernel ---------------------------
def _decoder_kernel(x_ref, sel_ref, w_ref, b_ref, o_ref, *, plan, bs):
    cdt = sel_ref.dtype                                   # bf16 compute dtype
    # batch folded onto sublanes: rows are (sample-major, channel)
    a = x_ref[...].reshape(bs * plan[0].cin, plan[0].L).astype(cdt)
    out_f32 = None
    for st in plan:
        sel = sel_ref[st.sel_off:st.sel_off + st.L, :st.Lp]        # (L, Lp)
        w2 = w_ref[st.w_off:st.w_off + st.cout, :st.K * st.cin]    # (Cout, K*Cin)
        bias = b_ref[st.w_off:st.w_off + st.cout, :]               # (Cout, 1) f32
        # nearest-upsample(scale) + zero 'same'-padding as ONE bf16 MXU matmul
        # against the precomputed 0/1 selection matrix (batch on sublanes).
        zp = jnp.dot(a, sel, preferred_element_type=jnp.float32).astype(cdt)
        # All K taps folded into one matmul; batch folded along the lane axis:
        #   xw[t*Cin + c, s*Lo + j] = zp[s*Cin + c, j + t]
        xw = jnp.concatenate(
            [jnp.concatenate(
                [zp[s * st.cin:(s + 1) * st.cin, t:t + st.Lo] for t in range(st.K)],
                axis=0)
             for s in range(bs)], axis=1)                          # (K*Cin, bs*Lo)
        y = jnp.dot(w2, xw, preferred_element_type=jnp.float32) + bias
        if st.relu:
            y = jnp.maximum(y, 0.0)
        # back to batch-on-sublanes layout for the next stage
        out_f32 = jnp.concatenate(
            [y[:, s * st.Lo:(s + 1) * st.Lo] for s in range(bs)], axis=0)
        a = out_f32.astype(cdt)
    o_ref[...] = out_f32.reshape(*o_ref.shape).astype(o_ref.dtype)


def conv_decoder_forward(x, packed, input_dim, samples_per_step=None):
    N, cin0, L0 = x.shape
    plan, w_rows, sel_rows, kc_max, lp_max, L_out = _build_plan(input_dim, L0)
    selbuf, wbuf, bbuf = packed
    assert selbuf.shape == (sel_rows, lp_max), selbuf.shape
    assert wbuf.shape == (w_rows, kc_max) and bbuf.shape == (w_rows, 1)
    assert cin0 == plan[0].cin, cin0

    bs = samples_per_step
    if bs is None:
        # default: keep >= 2 grid steps when possible so both v7x TensorCores
        # get work, while still amortizing per-step cost on v5e/v6e.
        bs = N // 2 if (N >= 2 and N % 2 == 0) else 1
    assert N % bs == 0, (N, bs)
    grid = (N // bs,)

    kernel = functools.partial(_decoder_kernel, plan=plan, bs=bs)
    return pl.pallas_call(
        kernel,
        out_shape=jax.ShapeDtypeStruct((N, 1, L_out), x.dtype),
        grid_spec=pltpu.PrefetchScalarGridSpec(
            num_scalar_prefetch=0,
            grid=grid,
            in_specs=[
                pl.BlockSpec((bs, cin0, L0), lambda n: (n, 0, 0)),
                # constant index_map -> parameter buffers stay VMEM-resident
                pl.BlockSpec(selbuf.shape, lambda n: (0, 0)),
                pl.BlockSpec(wbuf.shape, lambda n: (0, 0)),
                pl.BlockSpec(bbuf.shape, lambda n: (0, 0)),
            ],
            out_specs=pl.BlockSpec((bs, 1, L_out), lambda n: (n, 0, 0)),
        ),
        compiler_params=pltpu.CompilerParams(
            dimension_semantics=("parallel",),
            vmem_limit_bytes=16 * 1024 * 1024),
    )(x, selbuf, wbuf, bbuf)


# ------------------------------ parameters ----------------------------------
def init_conv_params(key, cin, cout, k):
    """PyTorch-style Conv1d init (uniform +/- 1/sqrt(fan_in)), deterministic."""
    kw, kb = jax.random.split(key)
    bound = 1.0 / jnp.sqrt(jnp.float32(cin * k))
    w = jax.random.uniform(kw, (k, cout, cin), jnp.float32, -bound, bound)
    b = jax.random.uniform(kb, (cout,), jnp.float32, -bound, bound)
    return w, b


def make_decoder_params(input_dim, key):
    specs = {
        "upconv_1": (16, 32, 3),
        "upconv_2": (32, 32, 3),
        "upconv_3": (32, 32, 3),
        "upconv_4": (32, 16, 5),
        "upconv_5": (16, 16, 5),
        "conv_6":   (16, 1, 5),
    }
    if input_dim in (4096, 8192):
        specs["upconv_3_2"] = (32, 32, 3)
    if input_dim == 8192:
        specs["upconv_3_3"] = (32, 32, 3)
    params = {}
    for i, (name, (cin, cout, k)) in enumerate(sorted(specs.items())):
        params[name] = init_conv_params(jax.random.fold_in(key, i), cin, cout, k)
    return params


# ----------------- pure-JAX reference (for a sanity check) ------------------
def _conv1d_ref(x, w, b, relu):
    w_l = jnp.transpose(w, (1, 2, 0))       # (K,Cout,Cin) -> (Cout,Cin,K)
    y = jax.lax.conv_general_dilated(
        x, w_l, window_strides=(1,), padding=[(w.shape[0] // 2,) * 2],
        dimension_numbers=("NCH", "OIH", "NCH"))
    y = y + b.reshape(1, -1, 1)
    return jnp.maximum(y, 0.0) if relu else y


def conv_decoder_ref(x, params, input_dim):
    def up(x, name, scale):
        return _conv1d_ref(jnp.repeat(x, scale, axis=-1), *params[name], True)
    x = up(x, "upconv_1", 4)
    x = up(x, "upconv_2", 2)
    x = up(x, "upconv_3", 2)
    if input_dim in (4096, 8192):
        x = up(x, "upconv_3_2", 2)
    if input_dim == 8192:
        x = up(x, "upconv_3_3", 2)
    x = up(x, "upconv_4", 4)
    x = up(x, "upconv_5", 2)
    x = jnp.repeat(x, 2, axis=-1)           # self.upsample_6
    return _conv1d_ref(x, *params["conv_6"], False)


if __name__ == "__main__":
    input_dim = 1024              # total decoder upscale is 256x -> latent length 4
    batch, cin0 = 4, 16
    lat_len = input_dim // 256

    key = jax.random.PRNGKey(0)
    kx, kp = jax.random.split(key)
    x = jax.random.normal(kx, (batch, cin0, lat_len), jnp.float32)
    params = make_decoder_params(input_dim, kp)
    packed = pack_decoder_inputs(params, input_dim, lat_len)   # once, host-side

    fwd = jax.jit(conv_decoder_forward, static_argnums=(2, 3))
    out = jax.block_until_ready(fwd(x, packed, input_dim, None))
    assert out.shape == (batch, 1, input_dim), out.shape

    ref = jax.block_until_ready(conv_decoder_ref(x, params, input_dim))
    err = float(jnp.max(jnp.abs(out - ref)))
    assert err < 3e-2, err      # bf16 MXU operands, f32 accumulation

    print("KERNEL_OK")
</pallas_src>

<mosaic_0001>
module attributes {stable_mosaic.version = 11 : i64} {
  func.func @_decoder_kernel(%arg0: i32, %arg1: memref<2x16x4xf32, #tpu.memory_space<vmem>>, %arg2: memref<888x1028xbf16, #tpu.memory_space<vmem>>, %arg3: memref<136x160xbf16, #tpu.memory_space<vmem>>, %arg4: memref<136x1xf32, #tpu.memory_space<vmem>>, %arg5: memref<2x1x1024xf32, #tpu.memory_space<vmem>>) attributes {dimension_semantics = [#tpu.dimension_semantics<parallel>], iteration_bounds = array<i64: 2>, scalar_prefetch = 0 : i64, scratch_operands = 0 : i64, tpu.core_type = #tpu.core_type<tc>, window_params = [{transform_indices = @transform_0, window_bounds = array<i64: 2, 16, 4>}, {pipeline_mode = #tpu.pipeline_mode<synchronous>, transform_indices = @transform_1, window_bounds = array<i64: 888, 1028>}, {pipeline_mode = #tpu.pipeline_mode<synchronous>, transform_indices = @transform_2, window_bounds = array<i64: 136, 160>}, {pipeline_mode = #tpu.pipeline_mode<synchronous>, transform_indices = @transform_3, window_bounds = array<i64: 136, 1>}, {transform_indices = @transform_4, window_bounds = array<i64: 2, 1, 1024>}]} {
    %c0 = arith.constant 0 : index
    %c0_0 = arith.constant 0 : index
    %c0_1 = arith.constant 0 : index
    %0 = vector.load %arg1[%c0, %c0_0, %c0_1] : memref<2x16x4xf32, #tpu.memory_space<vmem>>, vector<2x16x4xf32>
    %1 = vector.shape_cast %0 : vector<2x16x4xf32> to vector<32x4xf32>
    %2 = arith.truncf %1 : vector<32x4xf32> to vector<32x4xbf16>
    %c0_2 = arith.constant 0 : index
    %c0_3 = arith.constant 0 : index
    %3 = vector.load %arg2[%c0_2, %c0_3] : memref<888x1028xbf16, #tpu.memory_space<vmem>>, vector<4x18xbf16>
    %c0_4 = arith.constant 0 : index
    %c0_5 = arith.constant 0 : index
    %4 = vector.load %arg3[%c0_4, %c0_5] : memref<136x160xbf16, #tpu.memory_space<vmem>>, vector<32x48xbf16>
    %c0_6 = arith.constant 0 : index
    %c0_7 = arith.constant 0 : index
    %5 = vector.load %arg4[%c0_6, %c0_7] : memref<136x1xf32, #tpu.memory_space<vmem>>, vector<32x1xf32>
    %cst = arith.constant dense<0.000000e+00> : vector<32x18xf32>
    %6 = tpu.matmul %2, %3, %cst {dimension_numbers = #tpu.dot_dimension_numbers<[1], [0], [0], [1], [0, 0, 1, 1], [], []>} : vector<32x4xbf16>, vector<4x18xbf16>, vector<32x18xf32> -> vector<32x18xf32>
    %7 = arith.truncf %6 : vector<32x18xf32> to vector<32x18xbf16>
    %8 = vector.extract_strided_slice %7 {offsets = [0, 0], sizes = [16, 16], strides = [1, 1]} : vector<32x18xbf16> to vector<16x16xbf16>
    %9 = vector.extract_strided_slice %7 {offsets = [0, 1], sizes = [16, 16], strides = [1, 1]} : vector<32x18xbf16> to vector<16x16xbf16>
    %10 = vector.extract_strided_slice %7 {offsets = [0, 2], sizes = [16, 16], strides = [1, 1]} : vector<32x18xbf16> to vector<16x16xbf16>
    %11 = tpu.concatenate %8, %9, %10 in 0 : vector<16x16xbf16>, vector<16x16xbf16>, vector<16x16xbf16> -> vector<48x16xbf16>
    %12 = vector.extract_strided_slice %7 {offsets = [16, 0], sizes = [16, 16], strides = [1, 1]} : vector<32x18xbf16> to vector<16x16xbf16>
    %13 = vector.extract_strided_slice %7 {offsets = [16, 1], sizes = [16, 16], strides = [1, 1]} : vector<32x18xbf16> to vector<16x16xbf16>
    %14 = vector.extract_strided_slice %7 {offsets = [16, 2], sizes = [16, 16], strides = [1, 1]} : vector<32x18xbf16> to vector<16x16xbf16>
    %15 = tpu.concatenate %12, %13, %14 in 0 : vector<16x16xbf16>, vector<16x16xbf16>, vector<16x16xbf16> -> vector<48x16xbf16>
    %16 = tpu.concatenate %11, %15 in 1 : vector<48x16xbf16>, vector<48x16xbf16> -> vector<48x32xbf16>
    %cst_8 = arith.constant dense<0.000000e+00> : vector<32x32xf32>
    %17 = tpu.matmul %4, %16, %cst_8 {dimension_numbers = #tpu.dot_dimension_numbers<[1], [0], [0], [1], [0, 0, 1, 1], [], []>} : vector<32x48xbf16>, vector<48x32xbf16>, vector<32x32xf32> -> vector<32x32xf32>
    %18 = vector.broadcast %5 : vector<32x1xf32> to vector<32x32xf32>
    %19 = arith.addf %17, %18 : vector<32x32xf32>
    %cst_9 = arith.constant 0.000000e+00 : f32
    %20 = vector.broadcast %cst_9 : f32 to vector<32x32xf32>
    %21 = arith.maximumf %19, %20 : vector<32x32xf32>
    %22 = vector.extract_strided_slice %21 {offsets = [0, 0], sizes = [32, 16], strides = [1, 1]} : vector<32x32xf32> to vector<32x16xf32>
    %23 = vector.extract_strided_slice %21 {offsets = [0, 16], sizes = [32, 16], strides = [1, 1]} : vector<32x32xf32> to vector<32x16xf32>
    %24 = tpu.concatenate %22, %23 in 0 : vector<32x16xf32>, vector<32x16xf32> -> vector<64x16xf32>
    %25 = arith.truncf %24 : vector<64x16xf32> to vector<64x16xbf16>
    %c8 = arith.constant 8 : index
    %c0_10 = arith.constant 0 : index
    %26 = vector.load %arg2[%c8, %c0_10] : memref<888x1028xbf16, #tpu.memory_space<vmem>>, vector<16x34xbf16>
    %c32 = arith.constant 32 : index
    %c0_11 = arith.constant 0 : index
    %27 = vector.load %arg3[%c32, %c0_11] : memref<136x160xbf16, #tpu.memory_space<vmem>>, vector<32x96xbf16>
    %c32_12 = arith.constant 32 : index
    %c0_13 = arith.constant 0 : index
    %28 = vector.load %arg4[%c32_12, %c0_13] : memref<136x1xf32, #tpu.memory_space<vmem>>, vector<32x1xf32>
    %cst_14 = arith.constant dense<0.000000e+00> : vector<64x34xf32>
    %29 = tpu.matmul %25, %26, %cst_14 {dimension_numbers = #tpu.dot_dimension_numbers<[1], [0], [0], [1], [0, 0, 1, 1], [], []>} : vector<64x16xbf16>, vector<16x34xbf16>, vector<64x34xf32> -> vector<64x34xf32>
    %30 = arith.truncf %29 : vector<64x34xf32> to vector<64x34xbf16>
    %31 = vector.extract_strided_slice %30 {offsets = [0, 0], sizes = [32, 32], strides = [1, 1]} : vector<64x34xbf16> to vector<32x32xbf16>
    %32 = vector.extract_strided_slice %30 {offsets = [0, 1], sizes = [32, 32], strides = [1, 1]} : vector<64x34xbf16> to vector<32x32xbf16>
    %33 = vector.extract_strided_slice %30 {offsets = [0, 2], sizes = [32, 32], strides = [1, 1]} : vector<64x34xbf16> to vector<32x32xbf16>
    %34 = tpu.concatenate %31, %32, %33 in 0 : vector<32x32xbf16>, vector<32x32xbf16>, vector<32x32xbf16> -> vector<96x32xbf16>
    %35 = vector.extract_strided_slice %30 {offsets = [32, 0], sizes = [32, 32], strides = [1, 1]} : vector<64x34xbf16> to vector<32x32xbf16>
    %36 = vector.extract_strided_slice %30 {offsets = [32, 1], sizes = [32, 32], strides = [1, 1]} : vector<64x34xbf16> to vector<32x32xbf16>
    %37 = vector.extract_strided_slice %30 {offsets = [32, 2], sizes = [32, 32], strides = [1, 1]} : vector<64x34xbf16> to vector<32x32xbf16>
    %38 = tpu.concatenate %35, %36, %37 in 0 : vector<32x32xbf16>, vector<32x32xbf16>, vector<32x32xbf16> -> vector<96x32xbf16>
    %39 = tpu.concatenate %34, %38 in 1 : vector<96x32xbf16>, vector<96x32xbf16> -> vector<96x64xbf16>
    %cst_15 = arith.constant dense<0.000000e+00> : vector<32x64xf32>
    %40 = tpu.matmul %27, %39, %cst_15 {dimension_numbers = #tpu.dot_dimension_numbers<[1], [0], [0], [1], [0, 0, 1, 1], [], []>} : vector<32x96xbf16>, vector<96x64xbf16>, vector<32x64xf32> -> vector<32x64xf32>
    %41 = vector.broadcast %28 : vector<32x1xf32> to vector<32x64xf32>
    %42 = arith.addf %40, %41 : vector<32x64xf32>
    %cst_16 = arith.constant 0.000000e+00 : f32
    %43 = vector.broadcast %cst_16 : f32 to vector<32x64xf32>
    %44 = arith.maximumf %42, %43 : vector<32x64xf32>
    %45 = vector.extract_strided_slice %44 {offsets = [0, 0], sizes = [32, 32], strides = [1, 1]} : vector<32x64xf32> to vector<32x32xf32>
    %46 = vector.extract_strided_slice %44 {offsets = [0, 32], sizes = [32, 32], strides = [1, 1]} : vector<32x64xf32> to vector<32x32xf32>
    %47 = tpu.concatenate %45, %46 in 0 : vector<32x32xf32>, vector<32x32xf32> -> vector<64x32xf32>
    %48 = arith.truncf %47 : vector<64x32xf32> to vector<64x32xbf16>
    %c24 = arith.constant 24 : index
    %c0_17 = arith.constant 0 : index
    %49 = vector.load %arg2[%c24, %c0_17] : memref<888x1028xbf16, #tpu.memory_space<vmem>>, vector<32x66xbf16>
    %c64 = arith.constant 64 : index
    %c0_18 = arith.constant 0 : index
    %50 = vector.load %arg3[%c64, %c0_18] : memref<136x160xbf16, #tpu.memory_space<vmem>>, vector<32x96xbf16>
    %c64_19 = arith.constant 64 : index
    %c0_20 = arith.constant 0 : index
    %51 = vector.load %arg4[%c64_19, %c0_20] : memref<136x1xf32, #tpu.memory_space<vmem>>, vector<32x1xf32>
    %cst_21 = arith.constant dense<0.000000e+00> : vector<64x66xf32>
    %52 = tpu.matmul %48, %49, %cst_21 {dimension_numbers = #tpu.dot_dimension_numbers<[1], [0], [0], [1], [0, 0, 1, 1], [], []>} : vector<64x32xbf16>, vector<32x66xbf16>, vector<64x66xf32> -> vector<64x66xf32>
    %53 = arith.truncf %52 : vector<64x66xf32> to vector<64x66xbf16>
    %54 = vector.extract_strided_slice %53 {offsets = [0, 0], sizes = [32, 64], strides = [1, 1]} : vector<64x66xbf16> to vector<32x64xbf16>
    %55 = vector.extract_strided_slice %53 {offsets = [0, 1], sizes = [32, 64], strides = [1, 1]} : vector<64x66xbf16> to vector<32x64xbf16>
    %56 = vector.extract_strided_slice %53 {offsets = [0, 2], sizes = [32, 64], strides = [1, 1]} : vector<64x66xbf16> to vector<32x64xbf16>
    %57 = tpu.concatenate %54, %55, %56 in 0 : vector<32x64xbf16>, vector<32x64xbf16>, vector<32x64xbf16> -> vector<96x64xbf16>
    %58 = vector.extract_strided_slice %53 {offsets = [32, 0], sizes = [32, 64], strides = [1, 1]} : vector<64x66xbf16> to vector<32x64xbf16>
    %59 = vector.extract_strided_slice %53 {offsets = [32, 1], sizes = [32, 64], strides = [1, 1]} : vector<64x66xbf16> to vector<32x64xbf16>
    %60 = vector.extract_strided_slice %53 {offsets = [32, 2], sizes = [32, 64], strides = [1, 1]} : vector<64x66xbf16> to vector<32x64xbf16>
    %61 = tpu.concatenate %58, %59, %60 in 0 : vector<32x64xbf16>, vector<32x64xbf16>, vector<32x64xbf16> -> vector<96x64xbf16>
    %62 = tpu.concatenate %57, %61 in 1 : vector<96x64xbf16>, vector<96x64xbf16> -> vector<96x128xbf16>
    %cst_22 = arith.constant dense<0.000000e+00> : vector<32x128xf32>
    %63 = tpu.matmul %50, %62, %cst_22 {dimension_numbers = #tpu.dot_dimension_numbers<[1], [0], [0], [1], [0, 0, 1, 1], [], []>} : vector<32x96xbf16>, vector<96x128xbf16>, vector<32x128xf32> -> vector<32x128xf32>
    %64 = vector.broadcast %51 : vector<32x1xf32> to vector<32x128xf32>
    %65 = arith.addf %63, %64 : vector<32x128xf32>
    %cst_23 = arith.constant 0.000000e+00 : f32
    %66 = vector.broadcast %cst_23 : f32 to vector<32x128xf32>
    %67 = arith.maximumf %65, %66 : vector<32x128xf32>
    %68 = vector.extract_strided_slice %67 {offsets = [0, 0], sizes = [32, 64], strides = [1, 1]} : vector<32x128xf32> to vector<32x64xf32>
    %69 = vector.extract_strided_slice %67 {offsets = [0, 64], sizes = [32, 64], strides = [1, 1]} : vector<32x128xf32> to vector<32x64xf32>
    %70 = tpu.concatenate %68, %69 in 0 : vector<32x64xf32>, vector<32x64xf32> -> vector<64x64xf32>
    %71 = arith.truncf %70 : vector<64x64xf32> to vector<64x64xbf16>
    %c56 = arith.constant 56 : index
    %c0_24 = arith.constant 0 : index
    %72 = vector.load %arg2[%c56, %c0_24] : memref<888x1028xbf16, #tpu.memory_space<vmem>>, vector<64x260xbf16>
    %c96 = arith.constant 96 : index
    %c0_25 = arith.constant 0 : index
    %73 = vector.load %arg3[%c96, %c0_25] : memref<136x160xbf16, #tpu.memory_space<vmem>>, vector<16x160xbf16>
    %c96_26 = arith.constant 96 : index
    %c0_27 = arith.constant 0 : index
    %74 = vector.load %arg4[%c96_26, %c0_27] : memref<136x1xf32, #tpu.memory_space<vmem>>, vector<16x1xf32>
    %cst_28 = arith.constant dense<0.000000e+00> : vector<64x260xf32>
    %75 = tpu.matmul %71, %72, %cst_28 {dimension_numbers = #tpu.dot_dimension_numbers<[1], [0], [0], [1], [0, 0, 1, 1], [], []>} : vector<64x64xbf16>, vector<64x260xbf16>, vector<64x260xf32> -> vector<64x260xf32>
    %76 = arith.truncf %75 : vector<64x260xf32> to vector<64x260xbf16>
    %77 = vector.extract_strided_slice %76 {offsets = [0, 0], sizes = [32, 256], strides = [1, 1]} : vector<64x260xbf16> to vector<32x256xbf16>
    %78 = vector.extract_strided_slice %76 {offsets = [0, 1], sizes = [32, 256], strides = [1, 1]} : vector<64x260xbf16> to vector<32x256xbf16>
    %79 = vector.extract_strided_slice %76 {offsets = [0, 2], sizes = [32, 256], strides = [1, 1]} : vector<64x260xbf16> to vector<32x256xbf16>
    %80 = vector.extract_strided_slice %76 {offsets = [0, 3], sizes = [32, 256], strides = [1, 1]} : vector<64x260xbf16> to vector<32x256xbf16>
    %81 = vector.extract_strided_slice %76 {offsets = [0, 4], sizes = [32, 256], strides = [1, 1]} : vector<64x260xbf16> to vector<32x256xbf16>
    %82 = tpu.concatenate %77, %78, %79, %80, %81 in 0 : vector<32x256xbf16>, vector<32x256xbf16>, vector<32x256xbf16>, vector<32x256xbf16>, vector<32x256xbf16> -> vector<160x256xbf16>
    %83 = vector.extract_strided_slice %76 {offsets = [32, 0], sizes = [32, 256], strides = [1, 1]} : vector<64x260xbf16> to vector<32x256xbf16>
    %84 = vector.extract_strided_slice %76 {offsets = [32, 1], sizes = [32, 256], strides = [1, 1]} : vector<64x260xbf16> to vector<32x256xbf16>
    %85 = vector.extract_strided_slice %76 {offsets = [32, 2], sizes = [32, 256], strides = [1, 1]} : vector<64x260xbf16> to vector<32x256xbf16>
    %86 = vector.extract_strided_slice %76 {offsets = [32, 3], sizes = [32, 256], strides = [1, 1]} : vector<64x260xbf16> to vector<32x256xbf16>
    %87 = vector.extract_strided_slice %76 {offsets = [32, 4], sizes = [32, 256], strides = [1, 1]} : vector<64x260xbf16> to vector<32x256xbf16>
    %88 = tpu.concatenate %83, %84, %85, %86, %87 in 0 : vector<32x256xbf16>, vector<32x256xbf16>, vector<32x256xbf16>, vector<32x256xbf16>, vector<32x256xbf16> -> vector<160x256xbf16>
    %89 = tpu.concatenate %82, %88 in 1 : vector<160x256xbf16>, vector<160x256xbf16> -> vector<160x512xbf16>
    %cst_29 = arith.constant dense<0.000000e+00> : vector<16x512xf32>
    %90 = tpu.matmul %73, %89, %cst_29 {dimension_numbers = #tpu.dot_dimension_numbers<[1], [0], [0], [1], [0, 0, 1, 1], [], []>} : vector<16x160xbf16>, vector<160x512xbf16>, vector<16x512xf32> -> vector<16x512xf32>
    %91 = vector.broadcast %74 : vector<16x1xf32> to vector<16x512xf32>
    %92 = arith.addf %90, %91 : vector<16x512xf32>
    %cst_30 = arith.constant 0.000000e+00 : f32
    %93 = vector.broadcast %cst_30 : f32 to vector<16x512xf32>
    %94 = arith.maximumf %92, %93 : vector<16x512xf32>
    %95 = vector.extract_strided_slice %94 {offsets = [0, 0], sizes = [16, 256], strides = [1, 1]} : vector<16x512xf32> to vector<16x256xf32>
    %96 = vector.extract_strided_slice %94 {offsets = [0, 256], sizes = [16, 256], strides = [1, 1]} : vector<16x512xf32> to vector<16x256xf32>
    %97 = tpu.concatenate %95, %96 in 0 : vector<16x256xf32>, vector<16x256xf32> -> vector<32x256xf32>
    %98 = arith.truncf %97 : vector<32x256xf32> to vector<32x256xbf16>
    %c120 = arith.constant 120 : index
    %c0_31 = arith.constant 0 : index
    %99 = vector.load %arg2[%c120, %c0_31] : memref<888x1028xbf16, #tpu.memory_space<vmem>>, vector<256x516xbf16>
    %c112 = arith.constant 112 : index
    %c0_32 = arith.constant 0 : index
    %100 = vector.load %arg3[%c112, %c0_32] : memref<136x160xbf16, #tpu.memory_space<vmem>>, vector<16x80xbf16>
    %c112_33 = arith.constant 112 : index
    %c0_34 = arith.constant 0 : index
    %101 = vector.load %arg4[%c112_33, %c0_34] : memref<136x1xf32, #tpu.memory_space<vmem>>, vector<16x1xf32>
    %cst_35 = arith.constant dense<0.000000e+00> : vector<32x516xf32>
    %102 = tpu.matmul %98, %99, %cst_35 {dimension_numbers = #tpu.dot_dimension_numbers<[1], [0], [0], [1], [0, 0, 1, 1], [], []>} : vector<32x256xbf16>, vector<256x516xbf16>, vector<32x516xf32> -> vector<32x516xf32>
    %103 = arith.truncf %102 : vector<32x516xf32> to vector<32x516xbf16>
    %104 = vector.extract_strided_slice %103 {offsets = [0, 0], sizes = [16, 512], strides = [1, 1]} : vector<32x516xbf16> to vector<16x512xbf16>
    %105 = vector.extract_strided_slice %103 {offsets = [0, 1], sizes = [16, 512], strides = [1, 1]} : vector<32x516xbf16> to vector<16x512xbf16>
    %106 = vector.extract_strided_slice %103 {offsets = [0, 2], sizes = [16, 512], strides = [1, 1]} : vector<32x516xbf16> to vector<16x512xbf16>
    %107 = vector.extract_strided_slice %103 {offsets = [0, 3], sizes = [16, 512], strides = [1, 1]} : vector<32x516xbf16> to vector<16x512xbf16>
    %108 = vector.extract_strided_slice %103 {offsets = [0, 4], sizes = [16, 512], strides = [1, 1]} : vector<32x516xbf16> to vector<16x512xbf16>
    %109 = tpu.concatenate %104, %105, %106, %107, %108 in 0 : vector<16x512xbf16>, vector<16x512xbf16>, vector<16x512xbf16>, vector<16x512xbf16>, vector<16x512xbf16> -> vector<80x512xbf16>
    %110 = vector.extract_strided_slice %103 {offsets = [16, 0], sizes = [16, 512], strides = [1, 1]} : vector<32x516xbf16> to vector<16x512xbf16>
    %111 = vector.extract_strided_slice %103 {offsets = [16, 1], sizes = [16, 512], strides = [1, 1]} : vector<32x516xbf16> to vector<16x512xbf16>
    %112 = vector.extract_strided_slice %103 {offsets = [16, 2], sizes = [16, 512], strides = [1, 1]} : vector<32x516xbf16> to vector<16x512xbf16>
    %113 = vector.extract_strided_slice %103 {offsets = [16, 3], sizes = [16, 512], strides = [1, 1]} : vector<32x516xbf16> to vector<16x512xbf16>
    %114 = vector.extract_strided_slice %103 {offsets = [16, 4], sizes = [16, 512], strides = [1, 1]} : vector<32x516xbf16> to vector<16x512xbf16>
    %115 = tpu.concatenate %110, %111, %112, %113, %114 in 0 : vector<16x512xbf16>, vector<16x512xbf16>, vector<16x512xbf16>, vector<16x512xbf16>, vector<16x512xbf16> -> vector<80x512xbf16>
    %116 = tpu.concatenate %109, %115 in 1 : vector<80x512xbf16>, vector<80x512xbf16> -> vector<80x1024xbf16>
    %cst_36 = arith.constant dense<0.000000e+00> : vector<16x1024xf32>
    %117 = tpu.matmul %100, %116, %cst_36 {dimension_numbers = #tpu.dot_dimension_numbers<[1], [0], [0], [1], [0, 0, 1, 1], [], []>} : vector<16x80xbf16>, vector<80x1024xbf16>, vector<16x1024xf32> -> vector<16x1024xf32>
    %118 = vector.broadcast %101 : vector<16x1xf32> to vector<16x1024xf32>
    %119 = arith.addf %117, %118 : vector<16x1024xf32>
    %cst_37 = arith.constant 0.000000e+00 : f32
    %120 = vector.broadcast %cst_37 : f32 to vector<16x1024xf32>
    %121 = arith.maximumf %119, %120 : vector<16x1024xf32>
    %122 = vector.extract_strided_slice %121 {offsets = [0, 0], sizes = [16, 512], strides = [1, 1]} : vector<16x1024xf32> to vector<16x512xf32>
    %123 = vector.extract_strided_slice %121 {offsets = [0, 512], sizes = [16, 512], strides = [1, 1]} : vector<16x1024xf32> to vector<16x512xf32>
    %124 = tpu.concatenate %122, %123 in 0 : vector<16x512xf32>, vector<16x512xf32> -> vector<32x512xf32>
    %125 = arith.truncf %124 : vector<32x512xf32> to vector<32x512xbf16>
    %c376 = arith.constant 376 : index
    %c0_38 = arith.constant 0 : index
    %126 = vector.load %arg2[%c376, %c0_38] : memref<888x1028xbf16, #tpu.memory_space<vmem>>, vector<512x1028xbf16>
    %c128 = arith.constant 128 : index
    %c0_39 = arith.constant 0 : index
    %127 = vector.load %arg3[%c128, %c0_39] : memref<136x160xbf16, #tpu.memory_space<vmem>>, vector<1x80xbf16>
    %c128_40 = arith.constant 128 : index
    %c0_41 = arith.constant 0 : index
    %128 = vector.load %arg4[%c128_40, %c0_41] : memref<136x1xf32, #tpu.memory_space<vmem>>, vector<1x1xf32>
    %cst_42 = arith.constant dense<0.000000e+00> : vector<32x1028xf32>
    %129 = tpu.matmul %125, %126, %cst_42 {dimension_numbers = #tpu.dot_dimension_numbers<[1], [0], [0], [1], [0, 0, 1, 1], [], []>} : vector<32x512xbf16>, vector<512x1028xbf16>, vector<32x1028xf32> -> vector<32x1028xf32>
    %130 = arith.truncf %129 : vector<32x1028xf32> to vector<32x1028xbf16>
    %131 = vector.extract_strided_slice %130 {offsets = [0, 0], sizes = [16, 1024], strides = [1, 1]} : vector<32x1028xbf16> to vector<16x1024xbf16>
    %132 = vector.extract_strided_slice %130 {offsets = [0, 1], sizes = [16, 1024], strides = [1, 1]} : vector<32x1028xbf16> to vector<16x1024xbf16>
    %133 = vector.extract_strided_slice %130 {offsets = [0, 2], sizes = [16, 1024], strides = [1, 1]} : vector<32x1028xbf16> to vector<16x1024xbf16>
    %134 = vector.extract_strided_slice %130 {offsets = [0, 3], sizes = [16, 1024], strides = [1, 1]} : vector<32x1028xbf16> to vector<16x1024xbf16>
    %135 = vector.extract_strided_slice %130 {offsets = [0, 4], sizes = [16, 1024], strides = [1, 1]} : vector<32x1028xbf16> to vector<16x1024xbf16>
    %136 = tpu.concatenate %131, %132, %133, %134, %135 in 0 : vector<16x1024xbf16>, vector<16x1024xbf16>, vector<16x1024xbf16>, vector<16x1024xbf16>, vector<16x1024xbf16> -> vector<80x1024xbf16>
    %137 = vector.extract_strided_slice %130 {offsets = [16, 0], sizes = [16, 1024], strides = [1, 1]} : vector<32x1028xbf16> to vector<16x1024xbf16>
    %138 = vector.extract_strided_slice %130 {offsets = [16, 1], sizes = [16, 1024], strides = [1, 1]} : vector<32x1028xbf16> to vector<16x1024xbf16>
    %139 = vector.extract_strided_slice %130 {offsets = [16, 2], sizes = [16, 1024], strides = [1, 1]} : vector<32x1028xbf16> to vector<16x1024xbf16>
    %140 = vector.extract_strided_slice %130 {offsets = [16, 3], sizes = [16, 1024], strides = [1, 1]} : vector<32x1028xbf16> to vector<16x1024xbf16>
    %141 = vector.extract_strided_slice %130 {offsets = [16, 4], sizes = [16, 1024], strides = [1, 1]} : vector<32x1028xbf16> to vector<16x1024xbf16>
    %142 = tpu.concatenate %137, %138, %139, %140, %141 in 0 : vector<16x1024xbf16>, vector<16x1024xbf16>, vector<16x1024xbf16>, vector<16x1024xbf16>, vector<16x1024xbf16> -> vector<80x1024xbf16>
    %143 = tpu.concatenate %136, %142 in 1 : vector<80x1024xbf16>, vector<80x1024xbf16> -> vector<80x2048xbf16>
    %cst_43 = arith.constant dense<0.000000e+00> : vector<1x2048xf32>
    %144 = tpu.matmul %127, %143, %cst_43 {dimension_numbers = #tpu.dot_dimension_numbers<[1], [0], [0], [1], [0, 0, 1, 1], [], []>} : vector<1x80xbf16>, vector<80x2048xbf16>, vector<1x2048xf32> -> vector<1x2048xf32>
    %145 = vector.broadcast %128 : vector<1x1xf32> to vector<1x2048xf32>
    %146 = arith.addf %144, %145 : vector<1x2048xf32>
    %147 = vector.extract_strided_slice %146 {offsets = [0, 0], sizes = [1, 1024], strides = [1, 1]} : vector<1x2048xf32> to vector<1x1024xf32>
    %148 = vector.extract_strided_slice %146 {offsets = [0, 1024], sizes = [1, 1024], strides = [1, 1]} : vector<1x2048xf32> to vector<1x1024xf32>
    %149 = tpu.concatenate %147, %148 in 0 : vector<1x1024xf32>, vector<1x1024xf32> -> vector<2x1024xf32>
    %150 = vector.shape_cast %149 : vector<2x1024xf32> to vector<2x1x1024xf32>
    %c0_44 = arith.constant 0 : index
    %c0_45 = arith.constant 0 : index
    %c0_46 = arith.constant 0 : index
    %151 = vector.load %arg5[%c0_44, %c0_45, %c0_46] : memref<2x1x1024xf32, #tpu.memory_space<vmem>>, vector<2x1x1024xf32>
    tpu.vector_store %arg5[%c0_44, %c0_45, %c0_46], %150 {strides = array<i32>} : memref<2x1x1024xf32, #tpu.memory_space<vmem>>, vector<2x1x1024xf32>,
    return
  }
  func.func @transform_0(%arg0: i32) -> (i32, i32, i32) {
    %c0_i32 = arith.constant 0 : i32
    %c0_i32_0 = arith.constant 0 : i32
    %c0_i32_1 = arith.constant 0 : i32
    return %arg0, %c0_i32, %c0_i32_0 : i32, i32, i32
  }
  func.func @transform_1(%arg0: i32) -> (i32, i32) {
    %c0_i32 = arith.constant 0 : i32
    %c0_i32_0 = arith.constant 0 : i32
    %c0_i32_1 = arith.constant 0 : i32
    return %c0_i32, %c0_i32_0 : i32, i32
  }
  func.func @transform_2(%arg0: i32) -> (i32, i32) {
    %c0_i32 = arith.constant 0 : i32
    %c0_i32_0 = arith.constant 0 : i32
    %c0_i32_1 = arith.constant 0 : i32
    return %c0_i32, %c0_i32_0 : i32, i32
  }
  func.func @transform_3(%arg0: i32) -> (i32, i32) {
    %c0_i32 = arith.constant 0 : i32
    %c0_i32_0 = arith.constant 0 : i32
    %c0_i32_1 = arith.constant 0 : i32
    return %c0_i32, %c0_i32_0 : i32, i32
  }
  func.func @transform_4(%arg0: i32) -> (i32, i32, i32) {
    %c0_i32 = arith.constant 0 : i32
    %c0_i32_0 = arith.constant 0 : i32
    %c0_i32_1 = arith.constant 0 : i32
    return %arg0, %c0_i32, %c0_i32_0 : i32, i32, i32
  }
}

</mosaic_0001>

<bundles_post_ra>
// kernel: conv_decoder_forward.1
= control target key start
LH: loop header
LB: loop body
LE: loop exit
PB: predicated region body
PF: predicated region fallthrough
CT: control target
= control target key end

     0   :  { %9 = vsyncpa [#allocation3], 0  ;;  %s9289_s0 = inlined_call_operand.vmem [shape: f32[4,16,4], index: 0, kind: input, shape index: {}]   ;;  %s9290_s1 = inlined_call_operand.vmem [shape: bf16[888,1028], index: 1, kind: input, shape index: {}]   ;;  %s9291_s2 = inlined_call_operand.vmem [shape: bf16[136,160], index: 2, kind: input, shape index: {}]   ;;  %s9292_s3 = inlined_call_operand.vmem [shape: f32[136,1], index: 3, kind: input, shape index: {}]   ;;  %s9293_s4 = inlined_call_operand.hbm [shape: f32[4,1,1024], index: 4, kind: output, shape index: {}]  }
   0x1   :  { %11 = vsyncpa [#allocation3 + $0x1], 0  ;;  %s7097_s15 = smov 0   ;;  %s7099_s16 = smov 0  }
   0x2   :  { %s7101_s17 = smov 0   ;;  %s7103_s18 = smov 0  }
   0x3 LB: > { %s7118_s19 = sadd.s32 4294967295, %s7056_s18   ;;  %s5694_s20 = sadd.s32 4294967294, %s7056_s18   ;;  %s7056_s18 = sphi %s7103_s18, %s9299_s18   ;;  %s7052_s17 = sphi %s7101_s17, %s9298_s17   ;;  %s7048_s16 = sphi %s7099_s16, %s9297_s16   ;;  %s7044_s15 = sphi %s7097_s15, %s9296_s15  }
   0x4   : > { %s7122_s21 = sadd.s32 1, %s7056_s18   ;;  %s113_s22 = sadd.s32 1, %s7052_s17 }
   0x5   : > { %s110_s23 = ssub.s32 %s7056_s18, %s7122_s21  ;;  %p123_p0 = scmp.ne.s32.totalorder %s7052_s17, %s7048_s16 }
   0x6   : > { %p111_p1 = scmp.eq.s32.totalorder %s110_s23, 0  ;;  %p124_p2 = scmp.eq.s32.totalorder %s7118_s19, 1 }
   0x7   : > { %p129_p3 = scmp.ne.s32.totalorder %s7048_s16, %s7044_s15  ;;  %p130_p4 = scmp.eq.s32.totalorder %s5694_s20, 1 }
   0x8   : > { %s7133_s24 = scalar_select %p111_p1, %s7052_s17, %s113_s22  }
   0x9   : > { %p7135_p5 = por %p124_p2, %p123_p0  ;;  %p7139_p6 = por %p130_p4, %p129_p3 }
   0xa   : > { %p5697_p7 = scmp.ge.s32.totalorder %s7056_s18, 1  ;;  %p167_p8 = scmp.lt.s32.totalorder %s7056_s18, 3 }
   0xc   : > { %p168_p9 = pnand %p5697_p7, %p167_p8 }
   0xd   : > { %s5699_s29 = sshll.u32 (!%p168_p9), %s7118_s19, 1  ;;  %s7058_s8 = smov (!%p168_p9), 126  }
   0xe   : > { %171 = sbr.rel (%p168_p9) target bundleno = 4312 (0x10d8), region = 36  ;;  %p195_p10 = scmp.lt.s32.totalorder (!%p168_p9), %s5699_s29, 3 }
   0xf   : > { %s7059_s9 = smov (!%p168_p9), 127   ;;  %s7060_s10 = smov (!%p168_p9), 16  }
  0x10   : > { %s7063_s11 = smov (!%p168_p9), 32   ;;  %s7064_s13 = smov (!%p168_p9), 96  }
  0x11   : > { %s7065_s14 = smov (!%p168_p9), 64   ;;  %s7067_s6 = smov (!%p168_p9), 124  }
  0x12   : > { %s7069_s20 = smov (!%p168_p9), [#allocation2]  }
  0x13   : > { %v209_v0 = vld [vmem:[%s9290_s1] sm:$0x3]  ;;  %vm225_vm0 = vcmask 1041408   ;;  %s9301_s29 = smov (!%p195_p10, %s5699_s29), 3  ;;  %vm218_vm1 = vcmask 31744   ;;  %vm339_vm2 = vcmask 392192  }
  0x14   : > { %6354 = vmatprep.subr.msk.bf16.mxu0 %vm225_vm0, %v209_v0  ;;  %v227_v1 = vsel %vm225_vm0, %v209_v0, 0  ;;  %s6138_s30 = sshll.u32 %s9301_s29, 4  ;;  %v6439_v14 = vld [vmem:[%s9291_s2] ss:$8 sps:$4 sm:$0xff]   ;;  %v7061_v16 = vmov 0   ;;  %v216_v20 = vld [vmem:[%s9292_s3 + $0x10] sm:$0xff] }
  0x15   : > { %6269 = vmatpush3.bf16.msra.mxu0 %v227_v1  ;;  %s199_s7 = scalar_lea.vmem %s9289_s0, %s6138_s30  ;;  %6280 = vmatprep.mubr.msk.bf16.mxu1 %vm339_vm2, %v6439_v14  ;;  %v215_v17 = vld [vmem:[%s9292_s3 + $0x8] sm:$0xff]  ;;  %v214_v19 = vld [vmem:[%s9292_s3] sm:$0xff]  ;;  %v217_v21 = vld [vmem:[%s9292_s3 + $0x18] sm:$0xff]  ;;  %vm296_vm3 = vcmask 130048   ;;  %vm603_vm4 = vcmask 785408   ;;  %vm548_vm5 = vcmask 261120  }
  0x16   : > { %v203_v2 = vld [vmem:[%s199_s7] sm:$0xff]  ;;  %v204_v3 = vld [vmem:[%s199_s7 + $0x8] sm:$0xff]  ;;  %v205_v4 = vld [vmem:[%s199_s7 + $0x10] sm:$0xff]  ;;  %6407 = vset.pattern.permute.xlu1 %v7061_v16  ;;  %6408 = vset.pattern.permute.xlu0 %v7061_v16  ;;  %vm820_vm6 = vcmask 523264   ;;  %vm1260_vm7 = vcmask 1022976   ;;  %vm1239_vm8 = vcmask 1031168  }
  0x17   : > { %v207_v5 = vpack.c.bf16 %v204_v3, %v203_v2  ;;  %v206_v6 = vld [vmem:[%s199_s7 + $0x18] sm:$0xff]  ;;  %v6441_v31 = vld [vmem:[%s9290_s1 + $0x24] ss:$36 sps:$4 sm:$0xff]   ;;  %vm1218_vm9 = vcmask 1039360   ;;  %vm1281_vm10 = vcmask 1014784   ;;  %vm2346_vm11 = vcmask 654336  }
  0x18   : > { %v208_v7 = vpack.c.bf16 %v206_v6, %v205_v4  ;;  %v6440_v30 = vld [vmem:[%s9291_s2 + $0x10] ss:$8 sps:$4 sm:$0xff]   ;;  %6284 = vmatprep.subr.bf16.mxu0 %v6441_v31  ;;  %vm5530_vm12 = vcmask 1040384   ;;  %s7000_s22 = sshll.u32 %s7069_s20, 4  ;;  %s7001_s22 = int_to_ptr.vmem [resolvable:$false] %s7000_s22 }
  0x19   : > { %6270 = vmatprep.mubr.msk.bf16.mxu0 %vm218_vm1, %v207_v5  ;;  %s7002_s23 = scalar_lea.vmem %s7001_s22, 512 }
  0x1a   : > { %6271 = vmatmul.mubr.msk.bf16.vlgmr.msra.gmra.mxu0 %vm218_vm1, %v208_v7 }
  0x1b   : > { %6285 = vmatpush3.bf16.msra.mxu0 %v6441_v31 }
  0xda   : > { %v6272_v8 = vpop.f32.mrf.mxu0 }
  0xdc   : > { %v263_v9 = vpop.f32.mrf.mxu0 }
  0xde   : > { %v6273_v10 = vpop.f32.mrf.mxu0 }
  0xdf   : > { %v279_v11 = vpack.c.bf16 %v6273_v10, %v6272_v8  ;;  %v425_v8 = vld [vmem:[%s9292_s3 + $0x20] sm:$0xff] }
  0xe0   : > { %v266_v12 = vpop.f32.mrf.mxu0 }
  0xe1   : > { %v278_v13 = vpack.c.bf16 %v266_v12, %v263_v9  ;;  %288 = vrot.lane.b32.xlu0 %v279_v11, %s7058_s8  ;;  %v427_v9 = vld [vmem:[%s9292_s3 + $0x30] sm:$0xff] }
  0xe3   : > { %283 = vrot.lane.b32.xlu1 %v278_v13, %s7058_s8 }
  0xe5   : > { %286 = vrot.lane.b32.xlu0 %v279_v11, %s7059_s9 }
  0xe9   : > { %281 = vrot.lane.b32.xlu0 %v278_v13, %s7059_s9 }
  0xed   : > { %290 = vrot.lane.b32.xlu0 %v279_v11, %s7060_s10 }
  0xf1   : > { %316 = vperm.xlu0 %6408, %v215_v17   ;;  %v428_v17 = vld [vmem:[%s9292_s3 + $0x38] sm:$0xff] }
 0x153   : > { %v289_v15 = vpop.permute.xlu0 %288 }
 0x154   : > { %294 = vrot.lane.b32.xlu1 %v289_v15, %s7060_s10  ;;  %v426_v15 = vld [vmem:[%s9292_s3 + $0x28] sm:$0xff] }
 0x155   : > { %v284_v22 = vpop.permute.xlu1 %283 }
 0x157   : > { %v287_v18 = vpop.permute.xlu0 %286 }
 0x158   : > { %292 = vrot.lane.b32.xlu1 %v287_v18, %s7060_s10  ;;  %s7062_s10 = smov 112  }
 0x15b   : > { %v282_v23 = vpop.permute.xlu0 %281 }
 0x15c   : > { %311 = vperm.xlu1 %6407, %v214_v19  }
 0x15f   : > { %v291_v26 = vpop.permute.xlu0 %290 }
 0x160   : > { %321 = vperm.xlu1 %6407, %v216_v20   ;;  %v299_v29 = vsel %vm296_vm3, %v278_v13, %v291_v26  ;;  %v6442_v13 = vld [vmem:[%s9291_s2 + $0x20] ss:$8 sps:$4 sm:$0xff]  }
 0x164   : > { %326 = vperm.xlu1 %6407, %v217_v21  }
 0x16c   : > { %v317_v39 = vpop.permute.xlu0 %316 }
 0x1c6   : > { %v295_v24 = vpop.permute.xlu1 %294 }
 0x1c7   : > { %v307_v25 = vsel %vm296_vm3, %v284_v22, %v295_v24 }
 0x1c8   : > { %6274 = vmatprep.subr.bf16.mxu1 %v307_v25 }
 0x1c9   : > { %6275 = vmatpush3.bf16.msra.mxu1 %v307_v25 }
 0x1ca   : > { %v293_v27 = vpop.permute.xlu1 %292 }
 0x1cb   : > { %v303_v28 = vsel %vm296_vm3, %v282_v23, %v293_v27 }
 0x1cc   : > { %6276 = vmatprep.subr.bf16.mxu1 %v303_v28 }
 0x1cd   : > { %6277 = vmatpush3.bf16.msra.mxu1 %v303_v28 }
 0x1ce   : > { %6278 = vmatprep.subr.bf16.mxu1 %v299_v29 }
 0x1d1   : > { %6279 = vmatpush3.bf16.msra.mxu1 %v299_v29 }
 0x1d4   : > { %6281 = vmatmul.mubr.msk.bf16.vlgmr.msra.gmra.mxu1 %vm339_vm2, %v6440_v30 }
 0x1d7   : > { %v312_v32 = vpop.permute.xlu1 %311 }
 0x1db   : > { %v322_v33 = vpop.permute.xlu1 %321 }
 0x1df   : > { %v327_v36 = vpop.permute.xlu1 %326 }
 0x294   : > { %v6282_v34 = vpop.f32.mrf.mxu1 }
 0x295   : > { %v389_v37 = vadd.f32 %v6282_v34, %v322_v33  ;;  %v6443_v34 = vld [vmem:[%s9291_s2 + $0x30] ss:$8 sps:$4 sm:$0xff]  }
 0x296   : > { %v380_v35 = vpop.f32.mrf.mxu1 }
 0x297   : > { %v381_v40 = vadd.f32 %v380_v35, %v312_v32  ;;  %v397_v43 = vmax.f32 %v389_v37, 0.0  ;;  %v6444_v35 = vld [vmem:[%s9290_s1 + $0xb4] ss:$36 sps:$4 sm:$0xff]  }
 0x298   : > { %v6283_v38 = vpop.f32.mrf.mxu1 }
 0x299   : > { %v392_v41 = vadd.f32 %v6283_v38, %v327_v36  ;;  %v395_v46 = vmax.f32 %v381_v40, 0.0  ;;  %v6445_v36 = vld [vmem:[%s9290_s1 + $0x6c] ss:$36 sps:$4 sm:$0xff]  }
 0x29a   : > { %v383_v42 = vpop.f32.mrf.mxu1 }
 0x29b   : > { %v398_v44 = vmax.f32 %v392_v41, 0.0  ;;  %v384_v45 = vadd.f32 %v383_v42, %v317_v39 }
 0x29d   : > { %v6414_v47 = vpack.i.bf16 %v398_v44, %v397_v43  ;;  %v396_v48 = vmax.f32 %v384_v45, 0.0  ;;  %v416_v51 = vpack.c.bf16 %v398_v44, %v397_v43 }
 0x29f   : > { %v6409_v49 = vpack.i.bf16 %v396_v48, %v395_v46  ;;  %v415_v50 = vpack.c.bf16 %v396_v48, %v395_v46  ;;  %6415 = vrot.lane.b32.xlu1 %v6414_v47, %s7062_s10 }
 0x2a1   : > { %6410 = vrot.lane.b32.xlu0 %v6409_v49, %s7062_s10  ;;  %6286 = vmatprep.mubr.msk.bf16.mxu0 %vm296_vm3, %v415_v50 }
 0x2a2   : > { %6287 = vmatmul.mubr.msk.bf16.vlgmr.msra.gmra.mxu0 %vm296_vm3, %v416_v51 }
 0x311   : > { %v6416_v52 = vpop.permute.xlu1 %6415 }
 0x312   : > { %v6418_v53 = vunpack.i.h.bf16 %v6416_v52  ;;  %v6417_v54 = vunpack.i.l.bf16 %v6416_v52 }
 0x313   : > { %v6411_v55 = vpop.permute.xlu0 %6410 }
 0x314   : > { %v6413_v56 = vunpack.i.h.bf16 %v6411_v55  ;;  %v6412_v57 = vunpack.i.l.bf16 %v6411_v55  ;;  %v418_v59 = vpack.c.bf16 %v6418_v53, %v6417_v54 }
 0x316   : > { %v417_v58 = vpack.c.bf16 %v6413_v56, %v6412_v57 }
 0x318   : > { %6290 = vmatprep.mubr.msk.bf16.mxu0 %vm296_vm3, %v417_v58 }
 0x319   : > { %6291 = vmatmul.mubr.msk.bf16.gmra.mxu0 %vm296_vm3, %v418_v59 }
 0x31a   : > { %6306 = vmatprep.mubr.msk.bf16.mxu0 %vm603_vm4, %v6442_v13  ;;  %v691_v13 = vld [vmem:[%s9292_s3 + $0x40] sm:$0xff] }
 0x362   : > { %v6288_v60 = vpop.f32.mrf.mxu0 }
 0x364   : > { %v481_v61 = vpop.f32.mrf.mxu0 }
 0x366   : > { %v6289_v62 = vpop.f32.mrf.mxu0 }
 0x367   : > { %v513_v6 = vpack.c.bf16 %v6289_v62, %v6288_v60 }
 0x368   : > { %v484_v63 = vpop.f32.mrf.mxu0 }
 0x369   : > { %v512_v7 = vpack.c.bf16 %v484_v63, %v481_v61 }
 0x3d9   : > { %v6292_v0 = vpop.f32.mrf.mxu0 }
 0x3db   : > { %v497_v1 = vpop.f32.mrf.mxu0 }
 0x3dd   : > { %v6293_v2 = vpop.f32.mrf.mxu0 }
 0x3de   : > { %v515_v3 = vpack.c.bf16 %v6293_v2, %v6292_v0 }
 0x3df   : > { %v500_v4 = vpop.f32.mrf.mxu0 }
 0x3e0   : > { %v514_v5 = vpack.c.bf16 %v500_v4, %v497_v1  ;;  %534 = vrot.lane.b32.xlu0 %v515_v3, %s7058_s8 }
 0x3e2   : > { %532 = vrot.lane.b32.xlu1 %v514_v5, %s7058_s8 }
 0x3e4   : > { %530 = vrot.lane.b32.xlu0 %v515_v3, %s7059_s9 }
 0x3e6   : > { %528 = vrot.lane.b32.xlu1 %v514_v5, %s7059_s9 }
 0x3e8   : > { %524 = vrot.lane.b32.xlu0 %v513_v6, %s7058_s8 }
 0x3ec   : > { %522 = vrot.lane.b32.xlu0 %v512_v7, %s7058_s8 }
 0x3f0   : > { %520 = vrot.lane.b32.xlu0 %v513_v6, %s7059_s9 }
 0x3f4   : > { %518 = vrot.lane.b32.xlu0 %v512_v7, %s7059_s9 }
 0x3f8   : > { %538 = vrot.lane.b32.xlu0 %v515_v3, %s7063_s11 }
 0x3fc   : > { %575 = vperm.xlu0 %6408, %v425_v8  }
 0x400   : > { %585 = vperm.xlu0 %6408, %v427_v9  }
 0x452   : > { %v535_v10 = vpop.permute.xlu0 %534 }
 0x453   : > { %546 = vrot.lane.b32.xlu1 %v535_v10, %s7063_s11 }
 0x454   : > { %v533_v11 = vpop.permute.xlu1 %532 }
 0x456   : > { %v531_v12 = vpop.permute.xlu0 %530 }
 0x457   : > { %544 = vrot.lane.b32.xlu1 %v533_v11, %s7063_s11 }
 0x458   : > { %v529_v14 = vpop.permute.xlu1 %528 }
 0x45a   : > { %v525_v18 = vpop.permute.xlu0 %524 }
 0x45b   : > { %542 = vrot.lane.b32.xlu1 %v531_v12, %s7063_s11 }
 0x45e   : > { %v523_v19 = vpop.permute.xlu0 %522 }
 0x45f   : > { %540 = vrot.lane.b32.xlu1 %v529_v14, %s7063_s11  ;;  %v693_v14 = vld [vmem:[%s9292_s3 + $0x50] sm:$0xff] }
 0x462   : > { %v521_v20 = vpop.permute.xlu0 %520 }
 0x463   : > { %536 = vrot.lane.b32.xlu1 %v514_v5, %s7063_s11 }
 0x466   : > { %v519_v25 = vpop.permute.xlu0 %518 }
 0x467   : > { %580 = vperm.xlu1 %6407, %v426_v15  }
 0x46a   : > { %v539_v28 = vpop.permute.xlu0 %538 }
 0x46b   : > { %590 = vperm.xlu1 %6407, %v428_v17   ;;  %v555_v31 = vsel %vm548_vm5, %v513_v6, %v539_v28 }
 0x477   : > { %v576_v37 = vpop.permute.xlu0 %575 }
 0x47b   : > { %v586_v40 = vpop.permute.xlu0 %585 }
 0x4c5   : > { %v547_v21 = vpop.permute.xlu1 %546 }
 0x4c6   : > { %v571_v22 = vsel %vm548_vm5, %v525_v18, %v547_v21  ;;  %v692_v21 = vld [vmem:[%s9292_s3 + $0x48] sm:$0xff] }
 0x4c7   : > { %6294 = vmatprep.subr.bf16.mxu0 %v571_v22 }
 0x4c8   : > { %6295 = vmatpush3.bf16.msra.mxu0 %v571_v22  ;;  %v6448_v22 = vld [vmem:[%s9290_s1 + $0x1d4] ss:$36 sps:$4 sm:$0xff]  }
 0x4c9   : > { %v545_v23 = vpop.permute.xlu1 %544 }
 0x4ca   : > { %v567_v24 = vsel %vm548_vm5, %v523_v19, %v545_v23  ;;  %v6446_v19 = vld [vmem:[%s9291_s2 + $0x40] ss:$8 sps:$4 sm:$0xff]   ;;  %v6450_v23 = vld [vmem:[%s9290_s1 + $0x1d8] ss:$36 sps:$4 sm:$0xff]  }
 0x4cb   : > { %6296 = vmatprep.subr.bf16.mxu0 %v567_v24  ;;  %6334 = vmatprep.mubr.msk.bf16.mxu1 %vm603_vm4, %v6446_v19 }
 0x4cc   : > { %6297 = vmatpush3.bf16.msra.mxu0 %v567_v24  ;;  %v694_v24 = vld [vmem:[%s9292_s3 + $0x58] sm:$0xff] }
 0x4cd   : > { %v543_v26 = vpop.permute.xlu1 %542 }
 0x4ce   : > { %v563_v27 = vsel %vm548_vm5, %v521_v20, %v543_v26 }
 0x4cf   : > { %6298 = vmatprep.subr.bf16.mxu0 %v563_v27 }
 0x4d0   : > { %6299 = vmatpush3.bf16.msra.mxu0 %v563_v27 }
 0x4d1   : > { %v541_v29 = vpop.permute.xlu1 %540 }
 0x4d2   : > { %v559_v30 = vsel %vm548_vm5, %v519_v25, %v541_v29 }
 0x4d3   : > { %6300 = vmatprep.subr.bf16.mxu0 %v559_v30 }
 0x4d4   : > { %6301 = vmatpush3.bf16.msra.mxu0 %v559_v30 }
 0x4d5   : > { %6302 = vmatprep.subr.bf16.mxu0 %v555_v31  ;;  %v537_v32 = vpop.permute.xlu1 %536 }
 0x4d6   : > { %v551_v33 = vsel %vm548_vm5, %v512_v7, %v537_v32 }
 0x4d8   : > { %6303 = vmatpush3.bf16.msra.mxu0 %v555_v31 }
 0x4d9   : > { %6304 = vmatprep.subr.bf16.mxu0 %v551_v33 }
 0x4dc   : > { %6305 = vmatpush3.bf16.msra.mxu0 %v551_v33 }
 0x4dd   : > { %6310 = vmatprep.subr.bf16.mxu0 %v6444_v35 }
 0x4df   : > { %6307 = vmatmul.mubr.msk.bf16.vlgmr.msra.gmra.mxu0 %vm603_vm4, %v6443_v34 }
 0x4e0   : > { %6311 = vmatpush3.bf16.msra.mxu0 %v6444_v35 }
 0x4e1   : > { %6312 = vmatprep.subr.bf16.mxu0 %v6445_v36 }
 0x4e2   : > { %v581_v38 = vpop.permute.xlu1 %580 }
 0x4e4   : > { %6313 = vmatpush3.bf16.msra.mxu0 %v6445_v36 }
 0x4e5   : > { %1058 = vmatprep.subr.bf16.mxu0 %v6450_v23 }
 0x4e6   : > { %v591_v43 = vpop.permute.xlu1 %590 }
 0x59f   : > { %v6308_v39 = vpop.f32.mrf.mxu0 }
 0x5a0   : > { %v653_v42 = vadd.f32 %v6308_v39, %v586_v40 }
 0x5a1   : > { %v644_v41 = vpop.f32.mrf.mxu0 }
 0x5a2   : > { %v645_v45 = vadd.f32 %v644_v41, %v576_v37  ;;  %v661_v48 = vmax.f32 %v653_v42, 0.0  ;;  %v6451_v41 = vld [vmem:[%s9290_s1 + $0x1dc] ss:$36 sps:$4 sm:$0xff]   ;;  %v6447_v42 = vld [vmem:[%s9291_s2 + $0x50] ss:$8 sps:$4 sm:$0xff]  }
 0x5a3   : > { %v6309_v44 = vpop.f32.mrf.mxu0 }
 0x5a4   : > { %v656_v46 = vadd.f32 %v6309_v44, %v591_v43  ;;  %v659_v51 = vmax.f32 %v645_v45, 0.0  ;;  %v6454_v43 = vld [vmem:[%s9290_s1 + $0x190] ss:$36 sps:$4 sm:$0xff]  }
 0x5a5   : > { %v647_v47 = vpop.f32.mrf.mxu0  ;;  %v6452_v44 = vld [vmem:[%s9290_s1 + $0x18c] ss:$36 sps:$4 sm:$0xff]   ;;  %v6455_v45 = vld [vmem:[%s9290_s1 + $0x194] ss:$36 sps:$4 sm:$0xff]  }
 0x5a6   : > { %v662_v49 = vmax.f32 %v656_v46, 0.0  ;;  %v648_v50 = vadd.f32 %v647_v47, %v581_v38  ;;  %v6458_v46 = vld [vmem:[%s9290_s1 + $0x148] ss:$36 sps:$4 sm:$0xff]  }
 0x5a7   : > { %v6456_v47 = vld [vmem:[%s9290_s1 + $0x144] ss:$36 sps:$4 sm:$0xff]  }
 0x5a8   : > { %v6424_v52 = vpack.i.bf16 %v662_v49, %v661_v48  ;;  %v660_v53 = vmax.f32 %v648_v50, 0.0  ;;  %v680_v56 = vpack.c.bf16 %v662_v49, %v661_v48  ;;  %v6459_v48 = vld [vmem:[%s9290_s1 + $0x14c] ss:$36 sps:$4 sm:$0xff]   ;;  %v6462_v49 = vld [vmem:[%s9290_s1 + $0x100] ss:$36 sps:$4 sm:$0xff]  }
 0x5a9   : > { %v6460_v50 = vld [vmem:[%s9290_s1 + $0xfc] ss:$36 sps:$4 sm:$0xff]  }
 0x5aa   : > { %v6419_v54 = vpack.i.bf16 %v660_v53, %v659_v51  ;;  %v679_v55 = vpack.c.bf16 %v660_v53, %v659_v51  ;;  %6425 = vrot.lane.b32.xlu1 %v6424_v52, %s7064_s13  ;;  %v6463_v51 = vld [vmem:[%s9290_s1 + $0x104] ss:$36 sps:$4 sm:$0xff]  }
 0x5ac   : > { %6420 = vrot.lane.b32.xlu0 %v6419_v54, %s7064_s13  ;;  %6314 = vmatprep.mubr.msk.bf16.mxu0 %vm548_vm5, %v679_v55 }
 0x5ad   : > { %6315 = vmatmul.mubr.msk.bf16.vlgmr.msra.gmra.mxu0 %vm548_vm5, %v680_v56 }
 0x5ae   : > { %1059 = vmatpush1.bf16.msra.mxu0 %v6448_v22 }
 0x5af   : > { %1060 = vmatprep.subr.bf16.mxu0 %v6454_v43 }
 0x5b2   : > { %1061 = vmatpush1.bf16.msra.mxu0 %v6452_v44 }
 0x5b3   : > { %1062 = vmatprep.subr.bf16.mxu0 %v6458_v46 }
 0x5b6   : > { %1063 = vmatpush1.bf16.msra.mxu0 %v6456_v47 }
 0x5b7   : > { %1064 = vmatprep.subr.bf16.mxu0 %v6462_v49 }
 0x5ba   : > { %1065 = vmatpush1.bf16.msra.mxu0 %v6460_v50 }
 0x61c   : > { %v6426_v57 = vpop.permute.xlu1 %6425 }
 0x61d   : > { %v6428_v58 = vunpack.i.h.bf16 %v6426_v57  ;;  %v6427_v59 = vunpack.i.l.bf16 %v6426_v57 }
 0x61e   : > { %v6421_v60 = vpop.permute.xlu0 %6420 }
 0x61f   : > { %v6423_v61 = vunpack.i.h.bf16 %v6421_v60  ;;  %v6422_v62 = vunpack.i.l.bf16 %v6421_v60  ;;  %v682_v0 = vpack.c.bf16 %v6428_v58, %v6427_v59 }
 0x621   : > { %v681_v63 = vpack.c.bf16 %v6423_v61, %v6422_v62 }
 0x623   : > { %6318 = vmatprep.mubr.msk.bf16.mxu0 %vm548_vm5, %v681_v63 }
 0x624   : > { %6319 = vmatmul.mubr.msk.bf16.gmra.mxu0 %vm548_vm5, %v682_v0 }
 0x625   : > { %1082 = vmatprep.mubr.bf16.mxu0 %v7061_v16 }
 0x66d   : > { %v6316_v1 = vpop.f32.mrf.mxu0 }
 0x66f   : > { %v753_v2 = vpop.f32.mrf.mxu0 }
 0x671   : > { %v6317_v3 = vpop.f32.mrf.mxu0 }
 0x672   : > { %v785_v11 = vpack.c.bf16 %v6317_v3, %v6316_v1 }
 0x673   : > { %v756_v4 = vpop.f32.mrf.mxu0 }
 0x674   : > { %v784_v12 = vpack.c.bf16 %v756_v4, %v753_v2 }
 0x6e4   : > { %v6320_v5 = vpop.f32.mrf.mxu0 }
 0x6e6   : > { %v769_v6 = vpop.f32.mrf.mxu0 }
 0x6e8   : > { %v6321_v7 = vpop.f32.mrf.mxu0 }
 0x6e9   : > { %v787_v8 = vpack.c.bf16 %v6321_v7, %v6320_v5 }
 0x6ea   : > { %v772_v9 = vpop.f32.mrf.mxu0 }
 0x6eb   : > { %v786_v10 = vpack.c.bf16 %v772_v9, %v769_v6  ;;  %806 = vrot.lane.b32.xlu0 %v787_v8, %s7058_s8 }
 0x6ed   : > { %804 = vrot.lane.b32.xlu1 %v786_v10, %s7058_s8 }
 0x6ef   : > { %802 = vrot.lane.b32.xlu0 %v787_v8, %s7059_s9 }
 0x6f1   : > { %800 = vrot.lane.b32.xlu1 %v786_v10, %s7059_s9 }
 0x6f3   : > { %796 = vrot.lane.b32.xlu0 %v785_v11, %s7058_s8 }
 0x6f7   : > { %794 = vrot.lane.b32.xlu0 %v784_v12, %s7058_s8 }
 0x6fb   : > { %792 = vrot.lane.b32.xlu0 %v785_v11, %s7059_s9 }
 0x6ff   : > { %790 = vrot.lane.b32.xlu0 %v784_v12, %s7059_s9 }
 0x703   : > { %810 = vrot.lane.b32.xlu0 %v787_v8, %s7065_s14 }
 0x707   : > { %847 = vperm.xlu0 %6408, %v691_v13  }
 0x70b   : > { %857 = vperm.xlu0 %6408, %v693_v14  }
 0x75d   : > { %v807_v15 = vpop.permute.xlu0 %806 }
 0x75e   : > { %818 = vrot.lane.b32.xlu1 %v807_v15, %s7065_s14 }
 0x75f   : > { %v805_v17 = vpop.permute.xlu1 %804 }
 0x761   : > { %v803_v18 = vpop.permute.xlu0 %802 }
 0x762   : > { %816 = vrot.lane.b32.xlu1 %v805_v17, %s7065_s14 }
 0x763   : > { %v801_v20 = vpop.permute.xlu1 %800 }
 0x765   : > { %v797_v25 = vpop.permute.xlu0 %796 }
 0x766   : > { %814 = vrot.lane.b32.xlu1 %v803_v18, %s7065_s14 }
 0x769   : > { %v795_v26 = vpop.permute.xlu0 %794 }
 0x76a   : > { %812 = vrot.lane.b32.xlu1 %v801_v20, %s7065_s14 }
 0x76d   : > { %v793_v27 = vpop.permute.xlu0 %792 }
 0x76e   : > { %808 = vrot.lane.b32.xlu1 %v786_v10, %s7065_s14 }
 0x771   : > { %v791_v32 = vpop.permute.xlu0 %790 }
 0x772   : > { %852 = vperm.xlu1 %6407, %v692_v21  }
 0x775   : > { %v811_v35 = vpop.permute.xlu0 %810 }
 0x776   : > { %862 = vperm.xlu1 %6407, %v694_v24   ;;  %v827_v38 = vsel %vm820_vm6, %v785_v11, %v811_v35 }
 0x782   : > { %v848_v52 = vpop.permute.xlu0 %847 }
 0x786   : > { %v858_v55 = vpop.permute.xlu0 %857 }
 0x7d0   : > { %v819_v28 = vpop.permute.xlu1 %818 }
 0x7d1   : > { %v843_v29 = vsel %vm820_vm6, %v797_v25, %v819_v28 }
 0x7d2   : > { %6322 = vmatprep.subr.bf16.mxu1 %v843_v29 }
 0x7d3   : > { %6323 = vmatpush3.bf16.msra.mxu1 %v843_v29 }
 0x7d4   : > { %v817_v30 = vpop.permute.xlu1 %816 }
 0x7d5   : > { %v839_v31 = vsel %vm820_vm6, %v795_v26, %v817_v30 }
 0x7d6   : > { %6324 = vmatprep.subr.bf16.mxu1 %v839_v31 }
 0x7d7   : > { %6325 = vmatpush3.bf16.msra.mxu1 %v839_v31 }
 0x7d8   : > { %v815_v33 = vpop.permute.xlu1 %814 }
 0x7d9   : > { %v835_v34 = vsel %vm820_vm6, %v793_v27, %v815_v33 }
 0x7da   : > { %6326 = vmatprep.subr.bf16.mxu1 %v835_v34 }
 0x7db   : > { %6327 = vmatpush3.bf16.msra.mxu1 %v835_v34 }
 0x7dc   : > { %v813_v36 = vpop.permute.xlu1 %812 }
 0x7dd   : > { %v831_v37 = vsel %vm820_vm6, %v791_v32, %v813_v36 }
 0x7de   : > { %6328 = vmatprep.subr.bf16.mxu1 %v831_v37 }
 0x7df   : > { %6329 = vmatpush3.bf16.msra.mxu1 %v831_v37 }
 0x7e0   : > { %6330 = vmatprep.subr.bf16.mxu1 %v827_v38  ;;  %v809_v39 = vpop.permute.xlu1 %808 }
 0x7e1   : > { %v823_v40 = vsel %vm820_vm6, %v784_v12, %v809_v39 }
 0x7e3   : > { %6331 = vmatpush3.bf16.msra.mxu1 %v827_v38 }
 0x7e4   : > { %6332 = vmatprep.subr.bf16.mxu1 %v823_v40 }
 0x7e7   : > { %6333 = vmatpush3.bf16.msra.mxu1 %v823_v40 }
 0x7e8   : > { %6338 = vmatprep.subr.bf16.mxu1 %v6451_v41 }
 0x7ea   : > { %6335 = vmatmul.mubr.msk.bf16.vlgmr.msra.gmra.mxu1 %vm603_vm4, %v6447_v42 }
 0x7eb   : > { %6339 = vmatpush3.bf16.msra.mxu1 %v6451_v41 }
 0x7ec   : > { %6340 = vmatprep.subr.bf16.mxu1 %v6455_v45 }
 0x7ed   : > { %v853_v53 = vpop.permute.xlu1 %852 }
 0x7ef   : > { %6341 = vmatpush3.bf16.msra.mxu1 %v6455_v45 }
 0x7f0   : > { %6342 = vmatprep.subr.bf16.mxu1 %v6459_v48 }
 0x7f1   : > { %v863_v58 = vpop.permute.xlu1 %862 }
 0x7f3   : > { %6343 = vmatpush3.bf16.msra.mxu1 %v6459_v48 }
 0x7f4   : > { %6344 = vmatprep.subr.bf16.mxu1 %v6463_v51 }
 0x7f7   : > { %6345 = vmatpush3.bf16.msra.mxu1 %v6463_v51 }
 0x8aa   : > { %v6336_v54 = vpop.f32.mrf.mxu1 }
 0x8ab   : > { %v924_v57 = vadd.f32 %v6336_v54, %v858_v55 }
 0x8ac   : > { %v915_v56 = vpop.f32.mrf.mxu1 }
 0x8ad   : > { %v916_v60 = vadd.f32 %v915_v56, %v848_v52  ;;  %v932_v63 = vmax.f32 %v924_v57, 0.0 }
 0x8ae   : > { %v6337_v59 = vpop.f32.mrf.mxu1 }
 0x8af   : > { %v927_v61 = vadd.f32 %v6337_v59, %v863_v58  ;;  %v930_v2 = vmax.f32 %v916_v60, 0.0  ;;  %v6466_v59 = vld [vmem:[%s9291_s2 + $0x64] ss:$8 sps:$4 sm:$0xff]  }
 0x8b0   : > { %v918_v62 = vpop.f32.mrf.mxu1 }
 0x8b1   : > { %v933_v0 = vmax.f32 %v927_v61, 0.0  ;;  %v919_v1 = vadd.f32 %v918_v62, %v853_v53 }
 0x8b3   : > { %v6434_v3 = vpack.i.bf16 %v933_v0, %v932_v63  ;;  %v931_v4 = vmax.f32 %v919_v1, 0.0  ;;  %v951_v7 = vpack.c.bf16 %v933_v0, %v932_v63 }
 0x8b5   : > { %v6429_v5 = vpack.i.bf16 %v931_v4, %v930_v2  ;;  %v950_v6 = vpack.c.bf16 %v931_v4, %v930_v2  ;;  %6435 = vrot.lane.b32.xlu1 %v6434_v3, %s7065_s14 }
 0x8b7   : > { %6430 = vrot.lane.b32.xlu0 %v6429_v5, %s7065_s14  ;;  %5739 = vmatmul.mubr.msk.bf16.vlgmr.msra.gmra.mxu0 %vm820_vm6, %v950_v6  ;;  %s7066_s14 = smov 125  }
 0x8b8   : > { %6346 = vmatprep.mubr.msk.bf16.mxu1 %vm820_vm6, %v950_v6  ;;  %1092 = vmatprep.mubr.bf16.mxu0 %v7061_v16 }
 0x8b9   : > { %6347 = vmatmul.mubr.msk.bf16.vlgmr.msra.gmra.mxu1 %vm820_vm6, %v951_v7 }
 0x8bf   : > { %5740 = vmatmul.mubr.msk.bf16.gmra.mxu0 %vm820_vm6, %v951_v7 }
 0x8c0   : > { %1102 = vmatprep.mubr.bf16.mxu0 %v7061_v16 }
 0x927   : > { %v6436_v8 = vpop.permute.xlu1 %6435 }
 0x928   : > { %v6438_v9 = vunpack.i.h.bf16 %v6436_v8  ;;  %v6437_v10 = vunpack.i.l.bf16 %v6436_v8 }
 0x929   : > { %v6431_v11 = vpop.permute.xlu0 %6430 }
 0x92a   : > { %v6433_v12 = vunpack.i.h.bf16 %v6431_v11  ;;  %v6432_v13 = vunpack.i.l.bf16 %v6431_v11  ;;  %v953_v15 = vpack.c.bf16 %v6438_v9, %v6437_v10 }
 0x92c   : > { %v952_v14 = vpack.c.bf16 %v6433_v12, %v6432_v13 }
 0x92e   : > { %5741 = vmatmul.mubr.msk.bf16.gmra.mxu0 %vm820_vm6, %v952_v14  ;;  %6350 = vmatprep.mubr.msk.bf16.mxu1 %vm820_vm6, %v952_v14 }
 0x92f   : > { %6351 = vmatmul.mubr.msk.bf16.gmra.mxu1 %vm820_vm6, %v953_v15  ;;  %1112 = vmatprep.mubr.bf16.mxu0 %v7061_v16 }
 0x930   : > { %5750 = vmatprep.mubr.msk.bf16.mxu1 %vm548_vm5, %v6466_v59 }
 0x936   : > { %5742 = vmatmul.mubr.msk.bf16.gmra.mxu0 %vm820_vm6, %v953_v15 }
 0x937   : > { %5749 = vmatprep.mubr.msk.bf16.mxu0 %vm548_vm5, %v6466_v59 }
 0x977   : > { %v1084_v17 = vpop.f32.mrf.mxu0 }
 0x979   : > { %v6348_v18 = vpop.f32.mrf.mxu1  ;;  %v1086_v19 = vpop.f32.mrf.mxu0 }
 0x97b   : > { %v1157_v20 = vpop.f32.mrf.mxu1  ;;  %v1088_v21 = vpop.f32.mrf.mxu0 }
 0x97c   : > { %v7322_v22 = vpack.c.bf16 %v1088_v21, %v1084_v17 }
 0x97d   : > { %v6349_v23 = vpop.f32.mrf.mxu1  ;;  %v1090_v24 = vpop.f32.mrf.mxu0 }
 0x97e   : > { %v7324_v25 = vpack.c.bf16 %v1090_v24, %v1086_v19  ;;  %1248 = vrot.lane.b32.xlu1 %v7322_v22, %s7066_s14  ;;  %v1193_v30 = vpack.c.bf16 %v6349_v23, %v6348_v18  ;;  %v973_v23 = vld [vmem:[%s9292_s3 + $0x68] sm:$0xff] }
 0x97f   : > { %v1160_v26 = vpop.f32.mrf.mxu1  ;;  %v1094_v28 = vpop.f32.mrf.mxu0 }
 0x980   : > { %1271 = vrot.lane.b32.xlu0 %v7324_v25, %s7067_s6  ;;  %v1190_v27 = vpack.c.bf16 %v1160_v26, %v1157_v20 }
 0x981   : > { %v1096_v29 = vpop.f32.mrf.mxu0 }
 0x982   : > { %1227 = vrot.lane.b32.xlu1 %v7322_v22, %s7058_s8 }
 0x983   : > { %v1098_v31 = vpop.f32.mrf.mxu0 }
 0x984   : > { %1252 = vrot.lane.b32.xlu0 %v1190_v27, %s7066_s14  ;;  %v7338_v32 = vpack.c.bf16 %v1098_v31, %v1094_v28 }
 0x985   : > { %v1100_v33 = vpop.f32.mrf.mxu0 }
 0x986   : > { %1206 = vrot.lane.b32.xlu1 %v7322_v22, %s7059_s9  ;;  %v7349_v34 = vpack.c.bf16 %v1100_v33, %v1096_v29 }
 0x988   : > { %1231 = vrot.lane.b32.xlu0 %v1190_v27, %s7058_s8 }
 0x98a   : > { %1258 = vrot.lane.b32.xlu1 %v1193_v30, %s7066_s14 }
 0x98c   : > { %1210 = vrot.lane.b32.xlu0 %v1190_v27, %s7059_s9 }
 0x98e   : > { %1237 = vrot.lane.b32.xlu1 %v1193_v30, %s7058_s8 }
 0x990   : > { %1254 = vrot.lane.b32.xlu0 %v7338_v32, %s7066_s14 }
 0x992   : > { %1216 = vrot.lane.b32.xlu1 %v1193_v30, %s7059_s9 }
 0x994   : > { %1233 = vrot.lane.b32.xlu0 %v7338_v32, %s7058_s8 }
 0x996   : > { %1279 = vrot.lane.b32.xlu1 %v1193_v30, %s7067_s6 }
 0x998   : > { %1212 = vrot.lane.b32.xlu0 %v7338_v32, %s7059_s9 }
 0x99a   : > { %1250 = vrot.lane.b32.xlu1 %v7324_v25, %s7066_s14 }
 0x99c   : > { %1256 = vrot.lane.b32.xlu0 %v7349_v34, %s7066_s14 }
 0x99e   : > { %1229 = vrot.lane.b32.xlu1 %v7324_v25, %s7058_s8 }
 0x9a0   : > { %1235 = vrot.lane.b32.xlu0 %v7349_v34, %s7058_s8 }
 0x9a2   : > { %1208 = vrot.lane.b32.xlu1 %v7324_v25, %s7059_s9 }
 0x9a4   : > { %1214 = vrot.lane.b32.xlu0 %v7349_v34, %s7059_s9 }
 0x9a6   : > { %1273 = vrot.lane.b32.xlu1 %v1190_v27, %s7067_s6  ;;  %v972_v27 = vld [vmem:[%s9292_s3 + $0x60] sm:$0xff] }
 0x9a8   : > { %1277 = vrot.lane.b32.xlu0 %v7349_v34, %s7067_s6 }
 0x9aa   : > { %1275 = vrot.lane.b32.xlu1 %v7338_v32, %s7067_s6 }
 0x9ee   : > { %v1104_v35 = vpop.f32.mrf.mxu0 }
 0x9ef   : > { %v6352_v36 = vpop.f32.mrf.mxu1 }
 0x9f0   : > { %v1249_v37 = vpop.permute.xlu1 %1248  ;;  %v1106_v38 = vpop.f32.mrf.mxu0 }
 0x9f1   : > { %v1173_v39 = vpop.f32.mrf.mxu1 }
 0x9f2   : > { %v7368_v40 = vpop.permute.xlu0 %1271  ;;  %v1108_v41 = vpop.f32.mrf.mxu0 }
 0x9f3   : > { %v7370_v42 = vpack.c.bf16 %v1108_v41, %v1104_v35  ;;  %v6353_v43 = vpop.f32.mrf.mxu1 }
 0x9f4   : > { %v7372_v44 = vpop.permute.xlu1 %1227  ;;  %v1110_v45 = vpop.f32.mrf.mxu0  ;;  %v1199_v50 = vpack.c.bf16 %v6353_v43, %v6352_v36 }
 0x9f5   : > { %v7374_v46 = vpack.c.bf16 %v1110_v45, %v1106_v38  ;;  %v1176_v47 = vpop.f32.mrf.mxu1  ;;  %1336 = vrot.lane.b32.xlu1 %v7370_v42, %s7066_s14  ;;  %v6469_v45 = vld [vmem:[%s9290_s1 + $0x418] ss:$36 sps:$4 sm:$0xff]  }
 0x9f6   : > { %v1253_v48 = vpop.permute.xlu0 %1252  ;;  %v1114_v49 = vpop.f32.mrf.mxu0  ;;  %v7382_v53 = vpack.c.bf16 %v1176_v47, %v1173_v39 }
 0x9f7   : > { %1318 = vrot.lane.b32.xlu0 %v7374_v46, %s7058_s8 }
 0x9f8   : > { %v7380_v51 = vpop.permute.xlu1 %1206  ;;  %v1116_v52 = vpop.f32.mrf.mxu0 }
 0x9f9   : > { %1346 = vrot.lane.b32.xlu1 %v1199_v50, %s7066_s14 }
 0x9fa   : > { %v1232_v54 = vpop.permute.xlu0 %1231  ;;  %v1118_v55 = vpop.f32.mrf.mxu0 }
 0x9fb   : > { %1340 = vrot.lane.b32.xlu0 %v7382_v53, %s7066_s14  ;;  %v7387_v57 = vpack.c.bf16 %v1118_v55, %v1114_v49 }
 0x9fc   : > { %v1259_v56 = vpop.permute.xlu1 %1258  ;;  %v1120_v61 = vpop.f32.mrf.mxu0 }
 0x9fd   : > { %1326 = vrot.lane.b32.xlu1 %v1199_v50, %s7058_s8  ;;  %v7401_v0 = vpack.c.bf16 %v1120_v61, %v1116_v52  ;;  %v6467_v52 = vld [vmem:[%s9290_s1 + $0x414] ss:$36 sps:$4 sm:$0xff]  }
 0x9fe   : > { %v1211_v58 = vpop.permute.xlu0 %1210 }
 0x9ff   : > { %1342 = vrot.lane.b32.xlu0 %v7387_v57, %s7066_s14 }
 0xa00   : > { %v1238_v60 = vpop.permute.xlu1 %1237 }
 0xa01   : > { %1338 = vrot.lane.b32.xlu1 %v7374_v46, %s7066_s14 }
 0xa02   : > { %v1255_v62 = vpop.permute.xlu0 %1254 }
 0xa03   : > { %1322 = vrot.lane.b32.xlu0 %v7387_v57, %s7058_s8 }
 0xa04   : > { %v1217_v63 = vpop.permute.xlu1 %1216 }
 0xa05   : > { %1320 = vrot.lane.b32.xlu1 %v7382_v53, %s7058_s8 }
 0xa06   : > { %v1234_v1 = vpop.permute.xlu0 %1233 }
 0xa07   : > { %1344 = vrot.lane.b32.xlu0 %v7401_v0, %s7066_s14 }
 0xa08   : > { %v7407_v2 = vpop.permute.xlu1 %1279 }
 0xa09   : > { %1269 = vrot.lane.b32.xlu1 %v7322_v22, %s7067_s6 }
 0xa0a   : > { %v1213_v3 = vpop.permute.xlu0 %1212 }
 0xa0b   : > { %1316 = vrot.lane.b32.xlu0 %v7370_v42, %s7058_s8 }
 0xa0c   : > { %v1251_v4 = vpop.permute.xlu1 %1250 }
 0xa0d   : > { %1306 = vrot.lane.b32.xlu1 %v1199_v50, %s7059_s9  ;;  %v1262_v8 = vsel %vm1260_vm7, %v1251_v4, %v1253_v48  ;;  %v1261_v10 = vsel %vm1260_vm7, %v1249_v37, %v1251_v4 }
 0xa0e   : > { %v1257_v5 = vpop.permute.xlu0 %1256 }
 0xa0f   : > { %1324 = vrot.lane.b32.xlu0 %v7401_v0, %s7058_s8  ;;  %v1264_v6 = vsel %vm1260_vm7, %v1257_v5, %v1259_v56  ;;  %v1263_v7 = vsel %vm1260_vm7, %v1255_v62, %v1257_v5  ;;  %v6473_v56 = vld [vmem:[%s9290_s1 + $0x3cc] ss:$36 sps:$4 sm:$0xff]   ;;  %v6485_v5 = vld [vmem:[%s9290_s1 + $0x33c] ss:$36 sps:$4 sm:$0xff]  }
 0xa10   : > { %1398 = vmatprep.subr.bf16.mxu0 %v1264_v6  ;;  %v1230_v12 = vpop.permute.xlu1 %1229 }
 0xa11   : > { %1399 = vmatpush1.bf16.msra.mxu0 %v1263_v7  ;;  %1298 = vrot.lane.b32.xlu1 %v7374_v46, %s7059_s9  ;;  %v1241_v14 = vsel %vm1239_vm8, %v1230_v12, %v1232_v54  ;;  %v1240_v17 = vsel %vm1239_vm8, %v7372_v44, %v1230_v12 }
 0xa12   : > { %1400 = vmatprep.subr.bf16.mxu0 %v1262_v8  ;;  %v1236_v9 = vpop.permute.xlu0 %1235 }
 0xa13   : > { %1302 = vrot.lane.b32.xlu0 %v7387_v57, %s7059_s9  ;;  %v1243_v11 = vsel %vm1239_vm8, %v1236_v9, %v1238_v60  ;;  %v1242_v13 = vsel %vm1239_vm8, %v1234_v1, %v1236_v9  ;;  %v6481_v60 = vld [vmem:[%s9290_s1 + $0x388] ss:$36 sps:$4 sm:$0xff]   ;;  %v6493_v9 = vld [vmem:[%s9290_s1 + $0x2f8] ss:$36 sps:$4 sm:$0xff]  }
 0xa14   : > { %v1209_v19 = vpop.permute.xlu1 %1208  ;;  %v6479_v1 = vld [vmem:[%s9290_s1 + $0x384] ss:$36 sps:$4 sm:$0xff]  }
 0xa15   : > { %1401 = vmatpush1.bf16.msra.mxu0 %v1261_v10  ;;  %1296 = vrot.lane.b32.xlu1 %v7370_v42, %s7059_s9  ;;  %v1220_v21 = vsel %vm1218_vm9, %v1209_v19, %v1211_v58  ;;  %v1219_v24 = vsel %vm1218_vm9, %v7380_v51, %v1209_v19  ;;  %v6505_v19 = vld [vmem:[%s9290_s1 + $0x268] ss:$36 sps:$4 sm:$0xff]  }
 0xa16   : > { %1402 = vmatprep.subr.bf16.mxu0 %v1243_v11  ;;  %v1215_v15 = vpop.permute.xlu0 %1214  ;;  %v6491_v11 = vld [vmem:[%s9290_s1 + $0x2f4] ss:$36 sps:$4 sm:$0xff]  }
 0xa17   : > { %1304 = vrot.lane.b32.xlu0 %v7401_v0, %s7059_s9  ;;  %v1222_v18 = vsel %vm1218_vm9, %v1215_v15, %v1217_v63  ;;  %v1221_v20 = vsel %vm1218_vm9, %v1213_v3, %v1215_v15 }
 0xa18   : > { %v1274_v26 = vpop.permute.xlu1 %1273 }
 0xa19   : > { %1403 = vmatpush1.bf16.msra.mxu0 %v1242_v13  ;;  %1366 = vrot.lane.b32.xlu1 %v1199_v50, %s7067_s6  ;;  %v1283_v33 = vsel %vm1281_vm10, %v7368_v40, %v1274_v26  ;;  %v7477_v50 = vld [vmem:[%s9291_s2 + $0x60] ss:$8 sps:$4 sm:$0xff]   ;;  %v6499_v13 = vld [vmem:[%s9290_s1 + $0x2b0] ss:$36 sps:$4 sm:$0xff]   ;;  %v6517_v26 = vld [vmem:[%s9290_s1 + $0x658] ss:$36 sps:$4 sm:$0xff]  }
 0xa1a   : > { %1404 = vmatprep.subr.bf16.mxu0 %v1241_v14  ;;  %v1278_v28 = vpop.permute.xlu0 %1277 }
 0xa1b   : > { %1300 = vrot.lane.b32.xlu0 %v7382_v53, %s7059_s9  ;;  %v1285_v30 = vsel %vm1281_vm10, %v1278_v28, %v7407_v2  ;;  %v6487_v2 = vld [vmem:[%s9290_s1 + $0x340] ss:$36 sps:$4 sm:$0xff]  }
 0xa1c   : > { %v1276_v29 = vpop.permute.xlu1 %1275 }
 0xa1d   : > { %1405 = vmatpush1.bf16.msra.mxu0 %v1240_v17  ;;  %1358 = vrot.lane.b32.xlu1 %v7374_v46, %s7067_s6  ;;  %v1284_v31 = vsel %vm1281_vm10, %v1276_v29, %v1278_v28  ;;  %v6472_v29 = vld [vmem:[%s9290_s1 + $0x420] ss:$36 sps:$4 sm:$0xff]  }
 0xa1e   : > { %1406 = vmatprep.subr.bf16.mxu0 %v1222_v18  ;;  %v6497_v18 = vld [vmem:[%s9290_s1 + $0x2ac] ss:$36 sps:$4 sm:$0xff]  }
 0xa1f   : > { %1362 = vrot.lane.b32.xlu0 %v7387_v57, %s7067_s6 }
 0xa21   : > { %1407 = vmatpush1.bf16.msra.mxu0 %v1221_v20  ;;  %1356 = vrot.lane.b32.xlu1 %v7370_v42, %s7067_s6 }
 0xa22   : > { %1408 = vmatprep.subr.bf16.mxu0 %v1220_v21 }
 0xa23   : > { %1364 = vrot.lane.b32.xlu0 %v7401_v0, %s7067_s6 }
 0xa25   : > { %1409 = vmatpush1.bf16.msra.mxu0 %v1219_v24  ;;  %1383 = vperm.xlu1 %6407, %v973_v23   ;;  %v6511_v23 = vld [vmem:[%s9290_s1 + $0x220] ss:$36 sps:$4 sm:$0xff]  }
 0xa26   : > { %1410 = vmatprep.subr.bf16.mxu0 %v7349_v34 }
 0xa27   : > { %1360 = vrot.lane.b32.xlu0 %v7382_v53, %s7067_s6 }
 0xa29   : > { %1411 = vmatpush1.bf16.msra.mxu0 %v7338_v32 }
 0xa2a   : > { %1412 = vmatprep.subr.bf16.mxu0 %v7324_v25 }
 0xa2b   : > { %1378 = vperm.xlu0 %6408, %v972_v27  }
 0xa2d   : > { %1413 = vmatpush1.bf16.msra.mxu0 %v7322_v22 }
 0xa2e   : > { %1426 = vmatprep.subr.bf16.mxu0 %v1285_v30  ;;  %v6515_v30 = vld [vmem:[%s9290_s1 + $0x654] ss:$36 sps:$4 sm:$0xff]  }
 0xa31   : > { %1427 = vmatpush2.bf16.msra.mxu0 %v1284_v31  ;;  %v6523_v31 = vld [vmem:[%s9290_s1 + $0x610] ss:$36 sps:$4 sm:$0xff]  }
 0xa32   : > { %1428 = vmatprep.subr.bf16.mxu0 %v1283_v33 }
 0xa67   : > { %v1337_v32 = vpop.permute.xlu1 %1336 }
 0xa69   : > { %v1319_v34 = vpop.permute.xlu0 %1318 }
 0xa6b   : > { %v1347_v35 = vpop.permute.xlu1 %1346 }
 0xa6d   : > { %v1341_v25 = vpop.permute.xlu0 %1340 }
 0xa6f   : > { %v1327_v36 = vpop.permute.xlu1 %1326 }
 0xa71   : > { %v1343_v37 = vpop.permute.xlu0 %1342 }
 0xa73   : > { %v1339_v38 = vpop.permute.xlu1 %1338 }
 0xa74   : > { %v1349_v49 = vsel %vm1260_vm7, %v1339_v38, %v1341_v25  ;;  %v1348_v54 = vsel %vm1260_vm7, %v1337_v32, %v1339_v38  ;;  %v6470_v32 = vld [vmem:[%s9290_s1 + $0x41c] ss:$36 sps:$4 sm:$0xff]   ;;  %v6529_v25 = vld [vmem:[%s9290_s1 + $0x5c8] ss:$36 sps:$4 sm:$0xff]  }
 0xa75   : > { %v1323_v39 = vpop.permute.xlu0 %1322  ;;  %v6527_v38 = vld [vmem:[%s9290_s1 + $0x5c4] ss:$36 sps:$4 sm:$0xff]  }
 0xa77   : > { %v1321_v22 = vpop.permute.xlu1 %1320 }
 0xa78   : > { %v1329_v62 = vsel %vm1239_vm8, %v1319_v34, %v1321_v22  ;;  %v6482_v22 = vld [vmem:[%s9290_s1 + $0x38c] ss:$36 sps:$4 sm:$0xff]  }
 0xa79   : > { %v1345_v41 = vpop.permute.xlu0 %1344 }
 0xa7a   : > { %v1351_v43 = vsel %vm1260_vm7, %v1345_v41, %v1347_v35  ;;  %v1350_v44 = vsel %vm1260_vm7, %v1343_v37, %v1345_v41  ;;  %v6521_v35 = vld [vmem:[%s9290_s1 + $0x60c] ss:$36 sps:$4 sm:$0xff]  }
 0xa7b   : > { %v1270_v47 = vpop.permute.xlu1 %1269  ;;  %1441 = vmatprep.subr.bf16.mxu1 %v1351_v43  ;;  %v6484_v37 = vld [vmem:[%s9290_s1 + $0x390] ss:$36 sps:$4 sm:$0xff]   ;;  %v6490_v41 = vld [vmem:[%s9290_s1 + $0x348] ss:$36 sps:$4 sm:$0xff]   ;;  %v6533_v43 = vld [vmem:[%s9290_s1 + $0x57c] ss:$36 sps:$4 sm:$0xff]  }
 0xa7c   : > { %v1282_v48 = vsel %vm1281_vm10, %v1270_v47, %v7368_v40  ;;  %1442 = vmatpush1.bf16.msra.mxu1 %v1350_v44  ;;  %v6475_v40 = vld [vmem:[%s9290_s1 + $0x3d0] ss:$36 sps:$4 sm:$0xff]   ;;  %v6541_v44 = vld [vmem:[%s9290_s1 + $0x538] ss:$36 sps:$4 sm:$0xff]   ;;  %v6496_v47 = vld [vmem:[%s9290_s1 + $0x300] ss:$36 sps:$4 sm:$0xff]  }
 0xa7d   : > { %1429 = vmatpush2.bf16.msra.mxu0 %v1282_v48  ;;  %1443 = vmatprep.subr.bf16.mxu1 %v1349_v49  ;;  %v1317_v51 = vpop.permute.xlu0 %1316  ;;  %v6539_v48 = vld [vmem:[%s9290_s1 + $0x534] ss:$36 sps:$4 sm:$0xff]   ;;  %v6494_v49 = vld [vmem:[%s9290_s1 + $0x2fc] ss:$36 sps:$4 sm:$0xff]  }
 0xa7e   : > { %2012 = vmatprep.subr.bf16.mxu0 %v6469_v45  ;;  %v1328_v3 = vsel %vm1239_vm8, %v1317_v51, %v1319_v34  ;;  %v6478_v34 = vld [vmem:[%s9290_s1 + $0x3d8] ss:$36 sps:$4 sm:$0xff]   ;;  %v6488_v45 = vld [vmem:[%s9290_s1 + $0x344] ss:$36 sps:$4 sm:$0xff]  }
 0xa7f   : > { %v1307_v53 = vpop.permute.xlu1 %1306  ;;  %v6500_v51 = vld [vmem:[%s9290_s1 + $0x2b4] ss:$36 sps:$4 sm:$0xff]  }
 0xa80   : > { %1431 = vmatmul.mubr.bf16.vlgmr.msra.gmra.mxu0 %v7477_v50  ;;  %1444 = vmatpush1.bf16.msra.mxu1 %v1348_v54  ;;  %v6512_v54 = vld [vmem:[%s9290_s1 + $0x224] ss:$36 sps:$4 sm:$0xff]  }
 0xa81   : > { %v1325_v55 = vpop.permute.xlu0 %1324  ;;  %2013 = vmatpush1.bf16.msra.mxu0 %v6467_v52  ;;  %v6508_v52 = vld [vmem:[%s9290_s1 + $0x270] ss:$36 sps:$4 sm:$0xff]  }
 0xa82   : > { %v1331_v58 = vsel %vm1239_vm8, %v1325_v55, %v1327_v36  ;;  %v1330_v59 = vsel %vm1239_vm8, %v1323_v39, %v1325_v55  ;;  %2014 = vmatprep.subr.bf16.mxu0 %v6475_v40  ;;  %v6476_v36 = vld [vmem:[%s9290_s1 + $0x3d4] ss:$36 sps:$4 sm:$0xff]   ;;  %v6535_v39 = vld [vmem:[%s9290_s1 + $0x580] ss:$36 sps:$4 sm:$0xff]   ;;  %v6506_v40 = vld [vmem:[%s9290_s1 + $0x26c] ss:$36 sps:$4 sm:$0xff]  }
 0xa83   : > { %1445 = vmatprep.subr.bf16.mxu1 %v1331_v58  ;;  %v1299_v61 = vpop.permute.xlu1 %1298  ;;  %v6520_v55 = vld [vmem:[%s9290_s1 + $0x660] ss:$36 sps:$4 sm:$0xff]   ;;  %v6526_v58 = vld [vmem:[%s9290_s1 + $0x618] ss:$36 sps:$4 sm:$0xff]  }
 0xa84   : > { %1446 = vmatpush1.bf16.msra.mxu1 %v1330_v59  ;;  %v6547_v59 = vld [vmem:[%s9290_s1 + $0x4f0] ss:$36 sps:$4 sm:$0xff]  }
 0xa85   : > { %1447 = vmatprep.subr.bf16.mxu1 %v1329_v62  ;;  %v1303_v63 = vpop.permute.xlu0 %1302  ;;  %2015 = vmatpush1.bf16.msra.mxu0 %v6473_v56  ;;  %v6518_v56 = vld [vmem:[%s9290_s1 + $0x65c] ss:$36 sps:$4 sm:$0xff]   ;;  %v6532_v62 = vld [vmem:[%s9290_s1 + $0x5d0] ss:$36 sps:$4 sm:$0xff]  }
 0xa86   : > { %2016 = vmatprep.subr.bf16.mxu0 %v6481_v60  ;;  %v6545_v60 = vld [vmem:[%s9290_s1 + $0x4ec] ss:$36 sps:$4 sm:$0xff]  }
 0xa87   : > { %v1297_v6 = vpop.permute.xlu1 %1296 }
 0xa88   : > { %1448 = vmatpush1.bf16.msra.mxu1 %v1328_v3  ;;  %v1308_v14 = vsel %vm1218_vm9, %v1297_v6, %v1299_v61  ;;  %v6538_v3 = vld [vmem:[%s9290_s1 + $0x588] ss:$36 sps:$4 sm:$0xff]  }
 0xa89   : > { %v1305_v4 = vpop.permute.xlu0 %1304  ;;  %2017 = vmatpush1.bf16.msra.mxu0 %v6479_v1  ;;  %v6551_v1 = vld [vmem:[%s9290_s1 + $0x4a4] ss:$36 sps:$4 sm:$0xff]  }
 0xa8a   : > { %v1311_v7 = vsel %vm1218_vm9, %v1305_v4, %v1307_v53  ;;  %v1310_v8 = vsel %vm1218_vm9, %v1303_v63, %v1305_v4  ;;  %2018 = vmatprep.subr.bf16.mxu0 %v6487_v2  ;;  %v6514_v53 = vld [vmem:[%s9290_s1 + $0x228] ss:$36 sps:$4 sm:$0xff]   ;;  %v6559_v4 = vld [vmem:[%s9290_s1 + $0x460] ss:$36 sps:$4 sm:$0xff]  }
 0xa8b   : > { %1449 = vmatprep.subr.bf16.mxu1 %v1311_v7  ;;  %v1367_v15 = vpop.permute.xlu1 %1366  ;;  %v6553_v63 = vld [vmem:[%s9290_s1 + $0x4a8] ss:$36 sps:$4 sm:$0xff]   ;;  %v6544_v7 = vld [vmem:[%s9290_s1 + $0x540] ss:$36 sps:$4 sm:$0xff]  }
 0xa8c   : > { %1450 = vmatpush1.bf16.msra.mxu1 %v1310_v8  ;;  %v6530_v2 = vld [vmem:[%s9290_s1 + $0x5cc] ss:$36 sps:$4 sm:$0xff]   ;;  %v6536_v6 = vld [vmem:[%s9290_s1 + $0x584] ss:$36 sps:$4 sm:$0xff]  }
 0xa8d   : > { %v1301_v10 = vpop.permute.xlu0 %1300  ;;  %2019 = vmatpush1.bf16.msra.mxu0 %v6485_v5  ;;  %v6557_v5 = vld [vmem:[%s9290_s1 + $0x45c] ss:$36 sps:$4 sm:$0xff]   ;;  %v6563_v8 = vld [vmem:[%s9290_s1 + $0x664] ss:$36 sps:$4 sm:$0xff]  }
 0xa8e   : > { %v1309_v12 = vsel %vm1218_vm9, %v1299_v61, %v1301_v10  ;;  %2020 = vmatprep.subr.bf16.mxu0 %v6493_v9  ;;  %v6524_v61 = vld [vmem:[%s9290_s1 + $0x614] ss:$36 sps:$4 sm:$0xff]   ;;  %v6542_v9 = vld [vmem:[%s9290_s1 + $0x53c] ss:$36 sps:$4 sm:$0xff]  }
 0xa8f   : > { %1451 = vmatprep.subr.bf16.mxu1 %v1309_v12  ;;  %v1359_v21 = vpop.permute.xlu1 %1358  ;;  %v6550_v10 = vld [vmem:[%s9290_s1 + $0x4f8] ss:$36 sps:$4 sm:$0xff]   ;;  %v6556_v12 = vld [vmem:[%s9290_s1 + $0x4b0] ss:$36 sps:$4 sm:$0xff]  }
 0xa90   : > { %1452 = vmatpush1.bf16.msra.mxu1 %v1308_v14  ;;  %v6562_v14 = vld [vmem:[%s9290_s1 + $0x468] ss:$36 sps:$4 sm:$0xff]  }
 0xa91   : > { %1453 = vmatprep.subr.bf16.mxu1 %v7401_v0  ;;  %v1363_v17 = vpop.permute.xlu0 %1362  ;;  %2021 = vmatpush1.bf16.msra.mxu0 %v6491_v11  ;;  %v6503_v0 = vld [vmem:[%s9290_s1 + $0x264] ss:$36 sps:$4 sm:$0xff]   ;;  %v6548_v11 = vld [vmem:[%s9290_s1 + $0x4f4] ss:$36 sps:$4 sm:$0xff]  }
 0xa92   : > { %2022 = vmatprep.subr.bf16.mxu0 %v6499_v13  ;;  %v6554_v13 = vld [vmem:[%s9290_s1 + $0x4ac] ss:$36 sps:$4 sm:$0xff]  }
 0xa93   : > { %v1357_v28 = vpop.permute.xlu1 %1356 }
 0xa94   : > { %1454 = vmatpush1.bf16.msra.mxu1 %v7387_v57  ;;  %v1368_v33 = vsel %vm1281_vm10, %v1357_v28, %v1359_v21 }
 0xa95   : > { %1455 = vmatprep.subr.bf16.mxu1 %v7374_v46  ;;  %v1365_v20 = vpop.permute.xlu0 %1364  ;;  %2023 = vmatpush1.bf16.msra.mxu0 %v6497_v18  ;;  %v6509_v46 = vld [vmem:[%s9290_s1 + $0x21c] ss:$36 sps:$4 sm:$0xff]  }
 0xa96   : > { %2024 = vmatprep.subr.bf16.mxu0 %v6505_v19  ;;  %v1371_v24 = vsel %vm1281_vm10, %v1365_v20, %v1367_v15  ;;  %v1370_v27 = vsel %vm1281_vm10, %v1363_v17, %v1365_v20  ;;  %v6560_v15 = vld [vmem:[%s9290_s1 + $0x464] ss:$36 sps:$4 sm:$0xff]  }
 0xa98   : > { %1456 = vmatpush1.bf16.msra.mxu1 %v7370_v42 }
 0xa99   : > { %1469 = vmatprep.subr.bf16.mxu1 %v1371_v24  ;;  %v1361_v57 = vpop.permute.xlu0 %1360  ;;  %2025 = vmatpush1.bf16.msra.mxu0 %v6503_v0 }
 0xa9a   : > { %2026 = vmatprep.subr.bf16.mxu0 %v6511_v23  ;;  %v1369_v42 = vsel %vm1281_vm10, %v1359_v21, %v1361_v57 }
 0xa9c   : > { %1470 = vmatpush2.bf16.msra.mxu1 %v1370_v27 }
 0xa9d   : > { %1471 = vmatprep.subr.bf16.mxu1 %v1369_v42  ;;  %2027 = vmatpush1.bf16.msra.mxu0 %v6509_v46 }
 0xa9e   : > { %2028 = vmatprep.subr.bf16.mxu0 %v6517_v26 }
 0xaa0   : > { %1472 = vmatpush2.bf16.msra.mxu1 %v1368_v33  ;;  %v1384_v19 = vpop.permute.xlu1 %1383  ;;  %v6565_v33 = vld [vmem:[%s9290_s1 + $0x61c] ss:$36 sps:$4 sm:$0xff]  }
 0xaa1   : > { %2065 = vmatprep.subr.bf16.mxu1 %v6472_v29  ;;  %2029 = vmatpush2.bf16.msra.mxu0 %v6515_v30  ;;  %v6564_v30 = vld [vmem:[%s9290_s1 + $0x424] ss:$36 sps:$4 sm:$0xff]  }
 0xaa2   : > { %2030 = vmatprep.subr.bf16.mxu0 %v6523_v31 }
 0xaa3   : > { %1474 = vmatmul.mubr.bf16.vlgmr.msra.gmra.mxu1 %v7477_v50  ;;  %v6502_v50 = vld [vmem:[%s9290_s1 + $0x2b8] ss:$36 sps:$4 sm:$0xff]  }
 0xaa4   : > { %2066 = vmatpush1.bf16.msra.mxu1 %v6470_v32  ;;  %v6566_v32 = vld [vmem:[%s9290_s1 + $0x3dc] ss:$36 sps:$4 sm:$0xff]  }
 0xaa5   : > { %2067 = vmatprep.subr.bf16.mxu1 %v6478_v34  ;;  %2031 = vmatpush2.bf16.msra.mxu0 %v6521_v35  ;;  %v6567_v34 = vld [vmem:[%s9290_s1 + $0x5d4] ss:$36 sps:$4 sm:$0xff]  }
 0xaa6   : > { %2032 = vmatprep.subr.bf16.mxu0 %v6529_v25  ;;  %v1379_v20 = vpop.permute.xlu0 %1378  ;;  %v6568_v35 = vld [vmem:[%s9290_s1 + $0x394] ss:$36 sps:$4 sm:$0xff]   ;;  %v6569_v25 = vld [vmem:[%s9290_s1 + $0x58c] ss:$36 sps:$4 sm:$0xff]  }
 0xaa8   : > { %2068 = vmatpush1.bf16.msra.mxu1 %v6476_v36  ;;  %v6570_v36 = vld [vmem:[%s9290_s1 + $0x34c] ss:$36 sps:$4 sm:$0xff]  }
 0xaa9   : > { %2069 = vmatprep.subr.bf16.mxu1 %v6484_v37  ;;  %2033 = vmatpush2.bf16.msra.mxu0 %v6527_v38  ;;  %v6571_v37 = vld [vmem:[%s9290_s1 + $0x544] ss:$36 sps:$4 sm:$0xff]  }
 0xaaa   : > { %2034 = vmatprep.subr.bf16.mxu0 %v6535_v39  ;;  %v6572_v38 = vld [vmem:[%s9290_s1 + $0x304] ss:$36 sps:$4 sm:$0xff]   ;;  %v6573_v39 = vld [vmem:[%s9290_s1 + $0x4fc] ss:$36 sps:$4 sm:$0xff]  }
 0xaac   : > { %2070 = vmatpush1.bf16.msra.mxu1 %v6482_v22  ;;  %v6574_v22 = vld [vmem:[%s9290_s1 + $0x2bc] ss:$36 sps:$4 sm:$0xff]  }
 0xaad   : > { %2071 = vmatprep.subr.bf16.mxu1 %v6490_v41  ;;  %2035 = vmatpush2.bf16.msra.mxu0 %v6533_v43  ;;  %v6575_v41 = vld [vmem:[%s9290_s1 + $0x4b4] ss:$36 sps:$4 sm:$0xff]  }
 0xaae   : > { %2036 = vmatprep.subr.bf16.mxu0 %v6541_v44  ;;  %v6576_v44 = vld [vmem:[%s9290_s1 + $0x274] ss:$36 sps:$4 sm:$0xff]  }
 0xab0   : > { %2072 = vmatpush1.bf16.msra.mxu1 %v6488_v45  ;;  %v6577_v45 = vld [vmem:[%s9290_s1 + $0x46c] ss:$36 sps:$4 sm:$0xff]  }
 0xab1   : > { %2073 = vmatprep.subr.bf16.mxu1 %v6496_v47  ;;  %2037 = vmatpush2.bf16.msra.mxu0 %v6539_v48 }
 0xab2   : > { %2038 = vmatprep.subr.bf16.mxu0 %v6547_v59 }
 0xab4   : > { %2074 = vmatpush1.bf16.msra.mxu1 %v6494_v49  ;;  %v6578_v49 = vld [vmem:[%s9290_s1 + $0x22c] ss:$36 sps:$4 sm:$0xff]  }
 0xab5   : > { %2075 = vmatprep.subr.bf16.mxu1 %v6502_v50  ;;  %2039 = vmatpush2.bf16.msra.mxu0 %v6545_v60 }
 0xab6   : > { %2040 = vmatprep.subr.bf16.mxu0 %v6553_v63 }
 0xab8   : > { %2076 = vmatpush1.bf16.msra.mxu1 %v6500_v51 }
 0xab9   : > { %2077 = vmatprep.subr.bf16.mxu1 %v6508_v52  ;;  %2041 = vmatpush2.bf16.msra.mxu0 %v6551_v1 }
 0xaba   : > { %2042 = vmatprep.subr.bf16.mxu0 %v6559_v4 }
 0xabc   : > { %2078 = vmatpush1.bf16.msra.mxu1 %v6506_v40 }
 0xabd   : > { %2079 = vmatprep.subr.bf16.mxu1 %v6514_v53  ;;  %2043 = vmatpush2.bf16.msra.mxu0 %v6557_v5 }
 0xabe   : > { %6184 = vmatprep.subr.bf16.mxu0 %v6563_v8 }
 0xac0   : > { %2080 = vmatpush1.bf16.msra.mxu1 %v6512_v54 }
 0xac1   : > { %2081 = vmatprep.subr.bf16.mxu1 %v6520_v55 }
 0xac4   : > { %2082 = vmatpush2.bf16.msra.mxu1 %v6518_v56 }
 0xac5   : > { %2083 = vmatprep.subr.bf16.mxu1 %v6526_v58 }
 0xac8   : > { %2084 = vmatpush2.bf16.msra.mxu1 %v6524_v61 }
 0xac9   : > { %2085 = vmatprep.subr.bf16.mxu1 %v6532_v62 }
 0xacc   : > { %2086 = vmatpush2.bf16.msra.mxu1 %v6530_v2 }
 0xacd   : > { %2087 = vmatprep.subr.bf16.mxu1 %v6538_v3 }
 0xad0   : > { %2088 = vmatpush2.bf16.msra.mxu1 %v6536_v6 }
 0xad1   : > { %2089 = vmatprep.subr.bf16.mxu1 %v6544_v7 }
 0xad4   : > { %2090 = vmatpush2.bf16.msra.mxu1 %v6542_v9 }
 0xad5   : > { %2091 = vmatprep.subr.bf16.mxu1 %v6550_v10 }
 0xad8   : > { %2092 = vmatpush2.bf16.msra.mxu1 %v6548_v11 }
 0xad9   : > { %2093 = vmatprep.subr.bf16.mxu1 %v6556_v12 }
 0xadc   : > { %2094 = vmatpush2.bf16.msra.mxu1 %v6554_v13 }
 0xadd   : > { %2095 = vmatprep.subr.bf16.mxu1 %v6562_v14 }
 0xae0   : > { %2096 = vmatpush2.bf16.msra.mxu1 %v6560_v15 }
 0xb40   : > { %v1432_v17 = vpop.f32.mrf.mxu0 }
 0xb41   : > { %v1433_v24 = vadd.f32 %v1432_v17, %v1379_v20 }
 0xb42   : > { %v1434_v18 = vpop.f32.mrf.mxu0 }
 0xb43   : > { %v1435_v21 = vadd.f32 %v1434_v18, %v1379_v20  ;;  %v1484_v42 = vmax.f32 %v1433_v24, 0.0 }
 0xb44   : > { %v1436_v0 = vpop.f32.mrf.mxu0 }
 0xb45   : > { %v1437_v23 = vadd.f32 %v1436_v0, %v1384_v19  ;;  %v1485_v27 = vmax.f32 %v1435_v21, 0.0 }
 0xb46   : > { %v1438_v57 = vpop.f32.mrf.mxu0 }
 0xb47   : > { %v1439_v46 = vadd.f32 %v1438_v57, %v1384_v19  ;;  %v1488_v26 = vmax.f32 %v1437_v23, 0.0 }
 0xb49   : > { %v1489_v28 = vmax.f32 %v1439_v46, 0.0  ;;  %v1492_v31 = vpack.c.bf16 %v1488_v26, %v1484_v42 }
 0xb4b   : > { %v1493_v29 = vpack.c.bf16 %v1489_v28, %v1485_v27 }
 0xb4d   : > { %2044 = vmatprep.mubr.bf16.mxu0 %v1493_v29  ;;  %2097 = vmatprep.mubr.bf16.mxu1 %v1493_v29 }
 0xb4e   : > { %2045 = vmatmul.mubr.bf16.vlgmr.msra.gmra.mxu0 %v1492_v31  ;;  %2098 = vmatmul.mubr.bf16.vlgmr.msra.gmra.mxu1 %v1492_v31 }
 0xb4f   : > { %6185 = vmatpush3.bf16.msra.mxu0 %v6564_v30 }
 0xb50   : > { %6186 = vmatprep.subr.bf16.mxu0 %v6565_v33 }
 0xb53   : > { %6187 = vmatpush3.bf16.msra.mxu0 %v6566_v32 }
 0xb54   : > { %6188 = vmatprep.subr.bf16.mxu0 %v6567_v34 }
 0xb57   : > { %6189 = vmatpush3.bf16.msra.mxu0 %v6568_v35  ;;  %v1594_v35 = vld [vmem:[%s9292_s3 + $0x70] sm:$0xff] }
 0xb58   : > { %6190 = vmatprep.subr.bf16.mxu0 %v6569_v25  ;;  %v1595_v25 = vld [vmem:[%s9292_s3 + $0x78] sm:$0xff] }
 0xb5b   : > { %6191 = vmatpush3.bf16.msra.mxu0 %v6570_v36 }
 0xb5c   : > { %6192 = vmatprep.subr.bf16.mxu0 %v6571_v37 }
 0xb5f   : > { %6193 = vmatpush3.bf16.msra.mxu0 %v6572_v38 }
 0xb60   : > { %6194 = vmatprep.subr.bf16.mxu0 %v6573_v39 }
 0xb63   : > { %v1475_v43 = vpop.f32.mrf.mxu1  ;;  %6195 = vmatpush3.bf16.msra.mxu0 %v6574_v22 }
 0xb64   : > { %6196 = vmatprep.subr.bf16.mxu0 %v6575_v41  ;;  %v1476_v52 = vadd.f32 %v1475_v43, %v1379_v20 }
 0xb65   : > { %v1477_v47 = vpop.f32.mrf.mxu1 }
 0xb66   : > { %v1478_v50 = vadd.f32 %v1477_v47, %v1379_v20  ;;  %v1486_v58 = vmax.f32 %v1476_v52, 0.0 }
 0xb67   : > { %v1479_v48 = vpop.f32.mrf.mxu1  ;;  %6197 = vmatpush3.bf16.msra.mxu0 %v6576_v44 }
 0xb68   : > { %v1480_v51 = vadd.f32 %v1479_v48, %v1384_v19  ;;  %6198 = vmatprep.subr.bf16.mxu0 %v6577_v45  ;;  %v1487_v55 = vmax.f32 %v1478_v50, 0.0 }
 0xb69   : > { %v1481_v40 = vpop.f32.mrf.mxu1 }
 0xb6a   : > { %v1482_v53 = vadd.f32 %v1481_v40, %v1384_v19  ;;  %v1490_v54 = vmax.f32 %v1480_v51, 0.0 }
 0xb6b   : > { %6199 = vmatpush3.bf16.msra.mxu0 %v6578_v49 }
 0xb6c   : > { %v1491_v56 = vmax.f32 %v1482_v53, 0.0  ;;  %v1494_v60 = vpack.c.bf16 %v1490_v54, %v1486_v58 }
 0xb6e   : > { %v1495_v59 = vpack.c.bf16 %v1491_v56, %v1487_v55 }
 0xb70   : > { %2054 = vmatprep.mubr.bf16.mxu0 %v1495_v59  ;;  %2107 = vmatprep.mubr.bf16.mxu1 %v1495_v59 }
 0xb71   : > { %2055 = vmatmul.mubr.bf16.gmra.mxu0 %v1494_v60  ;;  %2108 = vmatmul.mubr.bf16.gmra.mxu1 %v1494_v60 }
 0xb72   : > { %2150 = vmatprep.mubr.bf16.mxu0 %v1493_v29  ;;  %2382 = vmatprep.mubr.bf16.mxu1 %v7061_v16 }
 0xb79   : > { %2151 = vmatmul.mubr.bf16.vlgmr.msra.gmra.mxu0 %v1492_v31 }
 0xb7a   : > { %2158 = vmatprep.mubr.bf16.mxu0 %v1495_v59  ;;  %v7843_v59 = vld [vmem:[%s9291_s2 + $0x70] ss:$8 sps:$4 sm:$0xff]  }
 0xb81   : > { %2159 = vmatmul.mubr.bf16.gmra.mxu0 %v1494_v60 }
 0xb82   : > { %2468 = vmatprep.mubr.bf16.mxu0 %v7061_v16 }
 0xc0e   : > { %v2046_v61 = vpop.f32.mrf.mxu0  ;;  %v2099_v62 = vpop.f32.mrf.mxu1 }
 0xc10   : > { %v2048_v63 = vpop.f32.mrf.mxu0  ;;  %v2101_v1 = vpop.f32.mrf.mxu1 }
 0xc12   : > { %v2050_v2 = vpop.f32.mrf.mxu0  ;;  %v2103_v3 = vpop.f32.mrf.mxu1 }
 0xc13   : > { %v7737_v4 = vpack.c.bf16 %v2050_v2, %v2046_v61  ;;  %v7739_v5 = vpack.c.bf16 %v2103_v3, %v2099_v62 }
 0xc14   : > { %v2052_v6 = vpop.f32.mrf.mxu0  ;;  %v2105_v8 = vpop.f32.mrf.mxu1 }
 0xc15   : > { %2240 = vrot.lane.b32.xlu1 %v7739_v5, %s7067_s6  ;;  %2236 = vrot.lane.b32.xlu0 %v7737_v4, %s7067_s6  ;;  %v7749_v7 = vpack.c.bf16 %v2052_v6, %v2048_v63  ;;  %v7767_v9 = vpack.c.bf16 %v2105_v8, %v2101_v1 }
 0xc19   : > { %2218 = vrot.lane.b32.xlu1 %v7737_v4, %s7066_s14  ;;  %2222 = vrot.lane.b32.xlu0 %v7739_v5, %s7066_s14 }
 0xc1d   : > { %2220 = vrot.lane.b32.xlu1 %v7749_v7, %s7066_s14  ;;  %2238 = vrot.lane.b32.xlu0 %v7749_v7, %s7067_s6 }
 0xc21   : > { %2204 = vrot.lane.b32.xlu1 %v7739_v5, %s7058_s8  ;;  %2200 = vrot.lane.b32.xlu0 %v7737_v4, %s7058_s8 }
 0xc25   : > { %2184 = vrot.lane.b32.xlu1 %v7749_v7, %s7059_s9  ;;  %2202 = vrot.lane.b32.xlu0 %v7749_v7, %s7058_s8 }
 0xc29   : > { %2182 = vrot.lane.b32.xlu1 %v7737_v4, %s7059_s9  ;;  %2186 = vrot.lane.b32.xlu0 %v7739_v5, %s7059_s9 }
 0xc2d   : > { %2242 = vrot.lane.b32.xlu0 %v7767_v9, %s7067_s6 }
 0xc31   : > { %v2109_v10 = vpop.f32.mrf.mxu1  ;;  %2224 = vrot.lane.b32.xlu0 %v7767_v9, %s7066_s14  ;;  %v2056_v11 = vpop.f32.mrf.mxu0 }
 0xc33   : > { %v2058_v12 = vpop.f32.mrf.mxu0  ;;  %v2111_v13 = vpop.f32.mrf.mxu1 }
 0xc35   : > { %2206 = vrot.lane.b32.xlu0 %v7767_v9, %s7058_s8  ;;  %v2060_v14 = vpop.f32.mrf.mxu0  ;;  %v2113_v17 = vpop.f32.mrf.mxu1 }
 0xc36   : > { %v7785_v27 = vpack.c.bf16 %v2060_v14, %v2056_v11  ;;  %v7790_v42 = vpack.c.bf16 %v2113_v17, %v2109_v10 }
 0xc37   : > { %v2062_v15 = vpop.f32.mrf.mxu0  ;;  %v2115_v0 = vpop.f32.mrf.mxu1 }
 0xc38   : > { %v7777_v19 = vpack.c.bf16 %v2062_v15, %v2058_v12  ;;  %v7781_v23 = vpack.c.bf16 %v2115_v0, %v2111_v13 }
 0xc39   : > { %2188 = vrot.lane.b32.xlu0 %v7767_v9, %s7059_s9  ;;  %v6200_v18 = vpop.f32.mrf.mxu0 }
 0xc3b   : > { %v6201_v20 = vpop.f32.mrf.mxu0 }
 0xc3c   : > { %v6202_v57 = vadd.f32 %v6201_v20, %v6200_v18 }
 0xc3d   : > { %2315 = vrot.lane.b32.xlu0 %v7777_v19, %s7067_s6  ;;  %v6203_v21 = vpop.f32.mrf.mxu0 }
 0xc3f   : > { %v6204_v24 = vpop.f32.mrf.mxu0 }
 0xc40   : > { %v6205_v46 = vadd.f32 %v6204_v24, %v6203_v21 }
 0xc41   : > { %2319 = vrot.lane.b32.xlu0 %v7781_v23, %s7067_s6  ;;  %v6206_v28 = vpop.f32.mrf.mxu0 }
 0xc42   : > { %v2171_v26 = vpack.c.bf16 %v6205_v46, %v6202_v57 }
 0xc43   : > { %v6207_v29 = vpop.f32.mrf.mxu0 }
 0xc44   : > { %2244 = vrot.lane.b32.xlu1 %v2171_v26, %s7067_s6  ;;  %v6208_v32 = vadd.f32 %v6207_v29, %v6206_v28 }
 0xc45   : > { %2313 = vrot.lane.b32.xlu0 %v7785_v27, %s7067_s6  ;;  %v6209_v30 = vpop.f32.mrf.mxu0 }
 0xc47   : > { %v6210_v31 = vpop.f32.mrf.mxu0 }
 0xc48   : > { %2226 = vrot.lane.b32.xlu1 %v2171_v26, %s7066_s14  ;;  %v6211_v33 = vadd.f32 %v6210_v31, %v6209_v30 }
 0xc49   : > { %2299 = vrot.lane.b32.xlu0 %v7790_v42, %s7066_s14 }
 0xc4a   : > { %v2176_v34 = vpack.c.bf16 %v6211_v33, %v6208_v32 }
 0xc4c   : > { %2208 = vrot.lane.b32.xlu1 %v2171_v26, %s7058_s8 }
 0xc4d   : > { %2279 = vrot.lane.b32.xlu0 %v7777_v19, %s7058_s8 }
 0xc50   : > { %2190 = vrot.lane.b32.xlu1 %v2171_v26, %s7059_s9 }
 0xc51   : > { %2283 = vrot.lane.b32.xlu0 %v7781_v23, %s7058_s8 }
 0xc54   : > { %2317 = vrot.lane.b32.xlu1 %v7790_v42, %s7067_s6 }
 0xc55   : > { %2277 = vrot.lane.b32.xlu0 %v7785_v27, %s7058_s8 }
 0xc58   : > { %2297 = vrot.lane.b32.xlu1 %v7777_v19, %s7066_s14 }
 0xc59   : > { %2303 = vrot.lane.b32.xlu0 %v2176_v34, %s7066_s14 }
 0xc5c   : > { %2301 = vrot.lane.b32.xlu1 %v7781_v23, %s7066_s14 }
 0xc5d   : > { %2263 = vrot.lane.b32.xlu0 %v7790_v42, %s7059_s9 }
 0xc60   : > { %2295 = vrot.lane.b32.xlu1 %v7785_v27, %s7066_s14 }
 0xc61   : > { %2267 = vrot.lane.b32.xlu0 %v2176_v34, %s7059_s9 }
 0xc64   : > { %2281 = vrot.lane.b32.xlu1 %v7790_v42, %s7058_s8 }
 0xc65   : > { %2333 = vperm.xlu0 %6408, %v1594_v35  }
 0xc68   : > { %2321 = vrot.lane.b32.xlu1 %v2176_v34, %s7067_s6 }
 0xc6c   : > { %2261 = vrot.lane.b32.xlu1 %v7777_v19, %s7059_s9 }
 0xc70   : > { %2285 = vrot.lane.b32.xlu1 %v2176_v34, %s7058_s8 }
 0xc74   : > { %2265 = vrot.lane.b32.xlu1 %v7781_v23, %s7059_s9 }
 0xc78   : > { %2259 = vrot.lane.b32.xlu1 %v7785_v27, %s7059_s9 }
 0xc7c   : > { %2338 = vperm.xlu1 %6407, %v1595_v25  }
 0xc87   : > { %v2241_v36 = vpop.permute.xlu1 %2240  ;;  %v2237_v37 = vpop.permute.xlu0 %2236 }
 0xc8b   : > { %v2219_v38 = vpop.permute.xlu1 %2218  ;;  %v2223_v39 = vpop.permute.xlu0 %2222 }
 0xc8f   : > { %v2221_v22 = vpop.permute.xlu1 %2220  ;;  %v2239_v41 = vpop.permute.xlu0 %2238 }
 0xc90   : > { %v2247_v43 = vsel %vm1281_vm10, %v2239_v41, %v2241_v36  ;;  %v2246_v44 = vsel %vm1281_vm10, %v2237_v37, %v2239_v41  ;;  %v2229_v45 = vsel %vm1260_vm7, %v2221_v22, %v2223_v39  ;;  %v2228_v49 = vsel %vm1260_vm7, %v2219_v38, %v2221_v22 }
 0xc91   : > { %2356 = vmatprep.subr.bf16.mxu1 %v2247_v43 }
 0xc92   : > { %2357 = vmatpush1.bf16.msra.mxu1 %v2246_v44 }
 0xc93   : > { %v2205_v47 = vpop.permute.xlu1 %2204  ;;  %2358 = vmatprep.subr.bf16.mxu1 %v2229_v45  ;;  %v2201_v48 = vpop.permute.xlu0 %2200 }
 0xc96   : > { %2359 = vmatpush1.bf16.msra.mxu1 %v2228_v49 }
 0xc97   : > { %v2185_v50 = vpop.permute.xlu1 %2184  ;;  %v2203_v51 = vpop.permute.xlu0 %2202 }
 0xc98   : > { %v2211_v52 = vsel %vm1239_vm8, %v2203_v51, %v2205_v47  ;;  %v2210_v40 = vsel %vm1239_vm8, %v2201_v48, %v2203_v51  ;;  %v6612_v51 = vld [vmem:[%s9290_s1 + $0xd18] ss:$36 sps:$4 sm:$0xff]  }
 0xc99   : > { %2360 = vmatprep.subr.bf16.mxu1 %v2211_v52 }
 0xc9a   : > { %2361 = vmatpush1.bf16.msra.mxu1 %v2210_v40  ;;  %v6582_v40 = vld [vmem:[%s9290_s1 + $0x898] ss:$36 sps:$4 sm:$0xff]  }
 0xc9b   : > { %v2183_v53 = vpop.permute.xlu1 %2182  ;;  %v2187_v54 = vpop.permute.xlu0 %2186 }
 0xc9c   : > { %v2192_v55 = vsel %vm1218_vm9, %v2183_v53, %v2185_v50  ;;  %v2193_v56 = vsel %vm1218_vm9, %v2185_v50, %v2187_v54  ;;  %v6618_v53 = vld [vmem:[%s9290_s1 + $0xcd0] ss:$36 sps:$4 sm:$0xff]  }
 0xc9d   : > { %2362 = vmatprep.subr.bf16.mxu1 %v2193_v56  ;;  %v6588_v56 = vld [vmem:[%s9290_s1 + $0x808] ss:$36 sps:$4 sm:$0xff]  }
 0xc9e   : > { %2363 = vmatpush1.bf16.msra.mxu1 %v2192_v55  ;;  %v6583_v55 = vld [vmem:[%s9290_s1 + $0x84c] ss:$36 sps:$4 sm:$0xff]  }
 0xc9f   : > { %2364 = vmatprep.subr.bf16.mxu1 %v7749_v7  ;;  %v2243_v58 = vpop.permute.xlu0 %2242 }
 0xca0   : > { %v2248_v6 = vsel %vm1281_vm10, %v2241_v36, %v2243_v58 }
 0xca2   : > { %2365 = vmatpush1.bf16.msra.mxu1 %v7737_v4 }
 0xca3   : > { %v2225_v60 = vpop.permute.xlu0 %2224 }
 0xca4   : > { %v2230_v10 = vsel %vm1260_vm7, %v2223_v39, %v2225_v60 }
 0xca5   : > { %5832 = vmatmul.mubr.msk.bf16.vlgmr.msra.gmra.mxu1 %vm2346_vm11, %v7843_v59 }
 0xca6   : > { %2425 = vmatprep.mubr.bf16.mxu1 %v7061_v16 }
 0xca7   : > { %v2207_v61 = vpop.permute.xlu0 %2206 }
 0xca8   : > { %v2212_v14 = vsel %vm1239_vm8, %v2205_v47, %v2207_v61 }
 0xcab   : > { %v2189_v62 = vpop.permute.xlu0 %2188 }
 0xcac   : > { %v2194_v18 = vsel %vm1218_vm9, %v2187_v54, %v2189_v62  ;;  %v6616_v54 = vld [vmem:[%s9290_s1 + $0xccc] ss:$36 sps:$4 sm:$0xff]  }
 0xcaf   : > { %v2316_v63 = vpop.permute.xlu0 %2315 }
 0xcb3   : > { %v2320_v1 = vpop.permute.xlu0 %2319 }
 0xcb6   : > { %v2245_v2 = vpop.permute.xlu1 %2244 }
 0xcb7   : > { %v2249_v3 = vsel %vm1281_vm10, %v2243_v58, %v2245_v2  ;;  %v2314_v7 = vpop.permute.xlu0 %2313  ;;  %v6622_v58 = vld [vmem:[%s9290_s1 + $0xc84] ss:$36 sps:$4 sm:$0xff]   ;;  %v6594_v2 = vld [vmem:[%s9290_s1 + $0x778] ss:$36 sps:$4 sm:$0xff]  }
 0xcb8   : > { %2399 = vmatprep.subr.bf16.mxu1 %v2249_v3  ;;  %v2323_v24 = vsel %vm1281_vm10, %v2314_v7, %v2316_v63  ;;  %v6634_v3 = vld [vmem:[%s9290_s1 + $0xbf4] ss:$36 sps:$4 sm:$0xff]  }
 0xcb9   : > { %2400 = vmatpush1.bf16.msra.mxu1 %v2248_v6  ;;  %v6642_v6 = vld [vmem:[%s9290_s1 + $0xbb0] ss:$36 sps:$4 sm:$0xff]  }
 0xcba   : > { %v2227_v4 = vpop.permute.xlu1 %2226  ;;  %v6592_v7 = vld [vmem:[%s9290_s1 + $0x774] ss:$36 sps:$4 sm:$0xff]  }
 0xcbb   : > { %v2231_v8 = vsel %vm1260_vm7, %v2225_v60, %v2227_v4  ;;  %v2300_v13 = vpop.permute.xlu0 %2299  ;;  %v6586_v60 = vld [vmem:[%s9290_s1 + $0x804] ss:$36 sps:$4 sm:$0xff]   ;;  %v6597_v4 = vld [vmem:[%s9290_s1 + $0x730] ss:$36 sps:$4 sm:$0xff]  }
 0xcbc   : > { %2401 = vmatprep.subr.bf16.mxu1 %v2231_v8  ;;  %v6640_v8 = vld [vmem:[%s9290_s1 + $0xbac] ss:$36 sps:$4 sm:$0xff]  }
 0xcbd   : > { %2402 = vmatpush1.bf16.msra.mxu1 %v2230_v10  ;;  %v6648_v10 = vld [vmem:[%s9290_s1 + $0xb68] ss:$36 sps:$4 sm:$0xff]  }
 0xcbe   : > { %v2209_v11 = vpop.permute.xlu1 %2208 }
 0xcbf   : > { %v2213_v12 = vsel %vm1239_vm8, %v2207_v61, %v2209_v11  ;;  %v2280_v20 = vpop.permute.xlu0 %2279  ;;  %v6591_v61 = vld [vmem:[%s9290_s1 + $0x7c0] ss:$36 sps:$4 sm:$0xff]   ;;  %v6595_v11 = vld [vmem:[%s9290_s1 + $0x72c] ss:$36 sps:$4 sm:$0xff]  }
 0xcc0   : > { %2403 = vmatprep.subr.bf16.mxu1 %v2213_v12  ;;  %v6600_v12 = vld [vmem:[%s9290_s1 + $0x6e8] ss:$36 sps:$4 sm:$0xff]  }
 0xcc1   : > { %2404 = vmatpush1.bf16.msra.mxu1 %v2212_v14  ;;  %v6651_v14 = vld [vmem:[%s9290_s1 + $0xb20] ss:$36 sps:$4 sm:$0xff]  }
 0xcc2   : > { %v2191_v15 = vpop.permute.xlu1 %2190 }
 0xcc3   : > { %v2195_v17 = vsel %vm1218_vm9, %v2189_v62, %v2191_v15  ;;  %v2284_v26 = vpop.permute.xlu0 %2283  ;;  %v6628_v62 = vld [vmem:[%s9290_s1 + $0xc3c] ss:$36 sps:$4 sm:$0xff]   ;;  %v6598_v15 = vld [vmem:[%s9290_s1 + $0x6e4] ss:$36 sps:$4 sm:$0xff]  }
 0xcc4   : > { %2405 = vmatprep.subr.bf16.mxu1 %v2195_v17  ;;  %v6603_v17 = vld [vmem:[%s9290_s1 + $0x6a0] ss:$36 sps:$4 sm:$0xff]  }
 0xcc5   : > { %2406 = vmatpush1.bf16.msra.mxu1 %v2194_v18  ;;  %v6649_v18 = vld [vmem:[%s9290_s1 + $0xb1c] ss:$36 sps:$4 sm:$0xff]  }
 0xcc6   : > { %2407 = vmatprep.subr.bf16.mxu1 %v7767_v9  ;;  %v2318_v0 = vpop.permute.xlu1 %2317 }
 0xcc7   : > { %v2324_v21 = vsel %vm1281_vm10, %v2316_v63, %v2318_v0  ;;  %v2278_v28 = vpop.permute.xlu0 %2277  ;;  %v2325_v25 = vsel %vm1281_vm10, %v2318_v0, %v2320_v1  ;;  %v6636_v63 = vld [vmem:[%s9290_s1 + $0xbf8] ss:$36 sps:$4 sm:$0xff]  }
 0xcc8   : > { %2442 = vmatprep.subr.bf16.mxu0 %v2324_v21  ;;  %v2287_v33 = vsel %vm1239_vm8, %v2278_v28, %v2280_v20  ;;  %v6601_v0 = vld [vmem:[%s9290_s1 + $0x69c] ss:$36 sps:$4 sm:$0xff]   ;;  %v6660_v28 = vld [vmem:[%s9290_s1 + $0xec8] ss:$36 sps:$4 sm:$0xff]  }
 0xcc9   : > { %2408 = vmatpush1.bf16.msra.mxu1 %v7739_v5  ;;  %2443 = vmatpush1.bf16.msra.mxu0 %v2323_v24  ;;  %v6606_v21 = vld [vmem:[%s9290_s1 + $0xad8] ss:$36 sps:$4 sm:$0xff]  }
 0xcca   : > { %v2298_v57 = vpop.permute.xlu1 %2297  ;;  %v6652_v24 = vld [vmem:[%s9290_s1 + $0xf54] ss:$36 sps:$4 sm:$0xff]  }
 0xccb   : > { %v2306_v46 = vsel %vm1260_vm7, %v2298_v57, %v2300_v13  ;;  %v2304_v32 = vpop.permute.xlu0 %2303 }
 0xccc   : > { %5833 = vmatmul.mubr.msk.bf16.vlgmr.msra.gmra.mxu1 %vm2346_vm11, %v7843_v59  ;;  %2444 = vmatprep.subr.bf16.mxu0 %v2306_v46  ;;  %v6604_v46 = vld [vmem:[%s9290_s1 + $0xad4] ss:$36 sps:$4 sm:$0xff]  }
 0xccd   : > { %2511 = vmatprep.mubr.bf16.mxu1 %v7061_v16 }
 0xcce   : > { %v2302_v9 = vpop.permute.xlu1 %2301 }
 0xccf   : > { %v2308_v36 = vsel %vm1260_vm7, %v2302_v9, %v2304_v32  ;;  %v2264_v37 = vpop.permute.xlu0 %2263  ;;  %v2307_v22 = vsel %vm1260_vm7, %v2300_v13, %v2302_v9  ;;  %v6646_v13 = vld [vmem:[%s9290_s1 + $0xb64] ss:$36 sps:$4 sm:$0xff]   ;;  %v6655_v9 = vld [vmem:[%s9290_s1 + $0xf0c] ss:$36 sps:$4 sm:$0xff]  }
 0xcd0   : > { %v6621_v32 = vld [vmem:[%s9290_s1 + $0xa00] ss:$36 sps:$4 sm:$0xff]  }
 0xcd2   : > { %v2296_v29 = vpop.permute.xlu1 %2295 }
 0xcd3   : > { %v2305_v30 = vsel %vm1260_vm7, %v2296_v29, %v2298_v57  ;;  %v2268_v45 = vpop.permute.xlu0 %2267  ;;  %v6657_v57 = vld [vmem:[%s9290_s1 + $0xf10] ss:$36 sps:$4 sm:$0xff]  }
 0xcd4   : > { %2445 = vmatpush1.bf16.msra.mxu0 %v2305_v30  ;;  %v6607_v29 = vld [vmem:[%s9290_s1 + $0xa8c] ss:$36 sps:$4 sm:$0xff]  }
 0xcd5   : > { %v6615_v30 = vld [vmem:[%s9290_s1 + $0xa48] ss:$36 sps:$4 sm:$0xff]  }
 0xcd6   : > { %v2282_v31 = vpop.permute.xlu1 %2281 }
 0xcd7   : > { %v2288_v5 = vsel %vm1239_vm8, %v2280_v20, %v2282_v31  ;;  %v2289_v44 = vsel %vm1239_vm8, %v2282_v31, %v2284_v26  ;;  %v6654_v20 = vld [vmem:[%s9290_s1 + $0xf58] ss:$36 sps:$4 sm:$0xff]   ;;  %v6658_v31 = vld [vmem:[%s9290_s1 + $0xec4] ss:$36 sps:$4 sm:$0xff]  }
 0xcd8   : > { %2446 = vmatprep.subr.bf16.mxu0 %v2288_v5  ;;  %v6663_v5 = vld [vmem:[%s9290_s1 + $0xe80] ss:$36 sps:$4 sm:$0xff]  }
 0xcd9   : > { %2447 = vmatpush1.bf16.msra.mxu0 %v2287_v33  ;;  %v6613_v33 = vld [vmem:[%s9290_s1 + $0xa44] ss:$36 sps:$4 sm:$0xff]  }
 0xcda   : > { %v2322_v34 = vpop.permute.xlu1 %2321 }
 0xcdb   : > { %v2326_v35 = vsel %vm1281_vm10, %v2320_v1, %v2322_v34  ;;  %v6589_v1 = vld [vmem:[%s9290_s1 + $0x7bc] ss:$36 sps:$4 sm:$0xff]  }
 0xcdc   : > { %2485 = vmatprep.subr.bf16.mxu1 %v2326_v35  ;;  %v6661_v34 = vld [vmem:[%s9290_s1 + $0xe7c] ss:$36 sps:$4 sm:$0xff]  }
 0xcdd   : > { %2486 = vmatpush1.bf16.msra.mxu1 %v2325_v25  ;;  %v6669_v35 = vld [vmem:[%s9290_s1 + $0xe38] ss:$36 sps:$4 sm:$0xff]  }
 0xcde   : > { %2487 = vmatprep.subr.bf16.mxu1 %v2308_v36  ;;  %v2262_v38 = vpop.permute.xlu1 %2261  ;;  %v6619_v25 = vld [vmem:[%s9290_s1 + $0x9fc] ss:$36 sps:$4 sm:$0xff]  }
 0xcdf   : > { %v2270_v39 = vsel %vm1218_vm9, %v2262_v38, %v2264_v37  ;;  %v6627_v36 = vld [vmem:[%s9290_s1 + $0x9b8] ss:$36 sps:$4 sm:$0xff]  }
 0xce0   : > { %2448 = vmatprep.subr.bf16.mxu0 %v2270_v39  ;;  %v6625_v39 = vld [vmem:[%s9290_s1 + $0x9b4] ss:$36 sps:$4 sm:$0xff]  }
 0xce1   : > { %2488 = vmatpush1.bf16.msra.mxu1 %v2307_v22  ;;  %v6633_v22 = vld [vmem:[%s9290_s1 + $0x970] ss:$36 sps:$4 sm:$0xff]  }
 0xce2   : > { %v2286_v41 = vpop.permute.xlu1 %2285 }
 0xce3   : > { %v2290_v43 = vsel %vm1239_vm8, %v2284_v26, %v2286_v41  ;;  %v6609_v26 = vld [vmem:[%s9290_s1 + $0xa90] ss:$36 sps:$4 sm:$0xff]  }
 0xce4   : > { %2489 = vmatprep.subr.bf16.mxu1 %v2290_v43  ;;  %v6673_v41 = vld [vmem:[%s9290_s1 + $0xdec] ss:$36 sps:$4 sm:$0xff]  }
 0xce5   : > { %2490 = vmatpush1.bf16.msra.mxu1 %v2289_v44  ;;  %v6681_v43 = vld [vmem:[%s9290_s1 + $0xda8] ss:$36 sps:$4 sm:$0xff]  }
 0xce6   : > { %v2266_v47 = vpop.permute.xlu1 %2265  ;;  %v6631_v44 = vld [vmem:[%s9290_s1 + $0x96c] ss:$36 sps:$4 sm:$0xff]  }
 0xce7   : > { %v2271_v48 = vsel %vm1218_vm9, %v2264_v37, %v2266_v47  ;;  %v2272_v49 = vsel %vm1218_vm9, %v2266_v47, %v2268_v45  ;;  %v6667_v37 = vld [vmem:[%s9290_s1 + $0xe34] ss:$36 sps:$4 sm:$0xff]   ;;  %v6639_v45 = vld [vmem:[%s9290_s1 + $0x928] ss:$36 sps:$4 sm:$0xff]  }
 0xce8   : > { %2491 = vmatprep.subr.bf16.mxu1 %v2272_v49  ;;  %v6679_v47 = vld [vmem:[%s9290_s1 + $0xda4] ss:$36 sps:$4 sm:$0xff]  }
 0xce9   : > { %2492 = vmatpush1.bf16.msra.mxu1 %v2271_v48  ;;  %v6687_v48 = vld [vmem:[%s9290_s1 + $0xd60] ss:$36 sps:$4 sm:$0xff]  }
 0xcea   : > { %2493 = vmatprep.subr.bf16.mxu1 %v7781_v23  ;;  %v2260_v50 = vpop.permute.xlu1 %2259  ;;  %v6610_v23 = vld [vmem:[%s9290_s1 + $0xd14] ss:$36 sps:$4 sm:$0xff]   ;;  %v6637_v49 = vld [vmem:[%s9290_s1 + $0x924] ss:$36 sps:$4 sm:$0xff]  }
 0xceb   : > { %v2269_v52 = vsel %vm1218_vm9, %v2260_v50, %v2262_v38  ;;  %v6675_v38 = vld [vmem:[%s9290_s1 + $0xdf0] ss:$36 sps:$4 sm:$0xff]   ;;  %v6645_v50 = vld [vmem:[%s9290_s1 + $0x8e0] ss:$36 sps:$4 sm:$0xff]  }
 0xcec   : > { %2449 = vmatpush1.bf16.msra.mxu0 %v2269_v52  ;;  %v6693_v52 = vld [vmem:[%s9290_s1 + $0xd20] ss:$36 sps:$4 sm:$0xff]  }
 0xced   : > { %2450 = vmatprep.subr.bf16.mxu0 %v7777_v19  ;;  %2494 = vmatpush1.bf16.msra.mxu1 %v7790_v42  ;;  %v6580_v19 = vld [vmem:[%s9290_s1 + $0x894] ss:$36 sps:$4 sm:$0xff]  }
 0xcee   : > { %4393 = vmatprep.subr.bf16.mxu1 %v6612_v51  ;;  %v6585_v42 = vld [vmem:[%s9290_s1 + $0x850] ss:$36 sps:$4 sm:$0xff]   ;;  %v6685_v51 = vld [vmem:[%s9290_s1 + $0xd5c] ss:$36 sps:$4 sm:$0xff]  }
 0xcf0   : > { %2451 = vmatpush1.bf16.msra.mxu0 %v7785_v27  ;;  %5835 = vmatmul.mubr.msk.bf16.vlgmr.msra.gmra.mxu1 %vm2346_vm11, %v7843_v59  ;;  %v6624_v27 = vld [vmem:[%s9290_s1 + $0xc88] ss:$36 sps:$4 sm:$0xff]  }
 0xcf1   : > { %4340 = vmatprep.subr.bf16.mxu0 %v6582_v40  ;;  %4394 = vmatpush1.bf16.msra.mxu1 %v6610_v23  ;;  %v6643_v40 = vld [vmem:[%s9290_s1 + $0x8dc] ss:$36 sps:$4 sm:$0xff]  }
 0xcf2   : > { %4395 = vmatprep.subr.bf16.mxu1 %v6618_v53  ;;  %v6666_v23 = vld [vmem:[%s9290_s1 + $0x8a0] ss:$36 sps:$4 sm:$0xff]  }
 0xcf3   : > { %5834 = vmatmul.mubr.msk.bf16.vlgmr.msra.gmra.mxu0 %vm2346_vm11, %v7843_v59  ;;  %v6630_v59 = vld [vmem:[%s9290_s1 + $0xc40] ss:$36 sps:$4 sm:$0xff]  }
 0xcf4   : > { %4341 = vmatpush1.bf16.msra.mxu0 %v6580_v19 }
 0xcf5   : > { %4342 = vmatprep.subr.bf16.mxu0 %v6585_v42  ;;  %4396 = vmatpush1.bf16.msra.mxu1 %v6616_v54  ;;  %v8084_v42 = vpop.permute.xlu0 %2333 }
 0xcf6   : > { %4397 = vmatprep.subr.bf16.mxu1 %v6624_v27 }
 0xcf7   : > { %v8086_v54 = vpop.permute.xlu1 %2338 }
 0xcf8   : > { %4343 = vmatpush1.bf16.msra.mxu0 %v6583_v55 }
 0xcf9   : > { %4344 = vmatprep.subr.bf16.mxu0 %v6588_v56  ;;  %4398 = vmatpush1.bf16.msra.mxu1 %v6622_v58 }
 0xcfa   : > { %4399 = vmatprep.subr.bf16.mxu1 %v6630_v59 }
 0xcfc   : > { %4345 = vmatpush1.bf16.msra.mxu0 %v6586_v60 }
 0xcfd   : > { %4346 = vmatprep.subr.bf16.mxu0 %v6591_v61  ;;  %4400 = vmatpush1.bf16.msra.mxu1 %v6628_v62 }
 0xcfe   : > { %4401 = vmatprep.subr.bf16.mxu1 %v6636_v63 }
 0xd00   : > { %4347 = vmatpush1.bf16.msra.mxu0 %v6589_v1 }
 0xd01   : > { %4348 = vmatprep.subr.bf16.mxu0 %v6594_v2  ;;  %4402 = vmatpush1.bf16.msra.mxu1 %v6634_v3  ;;  %v6664_v3 = vld [vmem:[%s9290_s1 + $0x89c] ss:$36 sps:$4 sm:$0xff]  }
 0xd02   : > { %4403 = vmatprep.subr.bf16.mxu1 %v6642_v6 }
 0xd04   : > { %4349 = vmatpush1.bf16.msra.mxu0 %v6592_v7  ;;  %v6672_v7 = vld [vmem:[%s9290_s1 + $0x858] ss:$36 sps:$4 sm:$0xff]  }
 0xd05   : > { %4350 = vmatprep.subr.bf16.mxu0 %v6597_v4  ;;  %4404 = vmatpush1.bf16.msra.mxu1 %v6640_v8  ;;  %v6670_v4 = vld [vmem:[%s9290_s1 + $0x854] ss:$36 sps:$4 sm:$0xff]  }
 0xd06   : > { %4405 = vmatprep.subr.bf16.mxu1 %v6648_v10  ;;  %v6678_v8 = vld [vmem:[%s9290_s1 + $0x810] ss:$36 sps:$4 sm:$0xff]  }
 0xd07   : > { %v6676_v10 = vld [vmem:[%s9290_s1 + $0x80c] ss:$36 sps:$4 sm:$0xff]  }
 0xd08   : > { %4351 = vmatpush1.bf16.msra.mxu0 %v6595_v11  ;;  %v6684_v11 = vld [vmem:[%s9290_s1 + $0x7c8] ss:$36 sps:$4 sm:$0xff]  }
 0xd09   : > { %4352 = vmatprep.subr.bf16.mxu0 %v6600_v12  ;;  %4406 = vmatpush1.bf16.msra.mxu1 %v6646_v13  ;;  %v6682_v12 = vld [vmem:[%s9290_s1 + $0x7c4] ss:$36 sps:$4 sm:$0xff]  }
 0xd0a   : > { %4407 = vmatprep.subr.bf16.mxu1 %v6651_v14  ;;  %v6690_v13 = vld [vmem:[%s9290_s1 + $0x780] ss:$36 sps:$4 sm:$0xff]  }
 0xd0b   : > { %v6688_v14 = vld [vmem:[%s9290_s1 + $0x77c] ss:$36 sps:$4 sm:$0xff]  }
 0xd0c   : > { %4353 = vmatpush1.bf16.msra.mxu0 %v6598_v15  ;;  %v6696_v15 = vld [vmem:[%s9290_s1 + $0x738] ss:$36 sps:$4 sm:$0xff]  }
 0xd0d   : > { %4354 = vmatprep.subr.bf16.mxu0 %v6603_v17  ;;  %4408 = vmatpush1.bf16.msra.mxu1 %v6649_v18  ;;  %v6694_v17 = vld [vmem:[%s9290_s1 + $0x734] ss:$36 sps:$4 sm:$0xff]  }
 0xd0e   : > { %4409 = vmatprep.subr.bf16.mxu1 %v6654_v20  ;;  %v6702_v18 = vld [vmem:[%s9290_s1 + $0x6f0] ss:$36 sps:$4 sm:$0xff]  }
 0xd0f   : > { %v6700_v20 = vld [vmem:[%s9290_s1 + $0x6ec] ss:$36 sps:$4 sm:$0xff]  }
 0xd10   : > { %4355 = vmatpush1.bf16.msra.mxu0 %v6601_v0  ;;  %v6708_v0 = vld [vmem:[%s9290_s1 + $0x6a8] ss:$36 sps:$4 sm:$0xff]  }
 0xd11   : > { %4356 = vmatprep.subr.bf16.mxu0 %v6606_v21  ;;  %4410 = vmatpush2.bf16.msra.mxu1 %v6652_v24  ;;  %v6706_v24 = vld [vmem:[%s9290_s1 + $0x6a4] ss:$36 sps:$4 sm:$0xff]  }
 0xd12   : > { %4411 = vmatprep.subr.bf16.mxu1 %v6657_v57  ;;  %v6714_v57 = vld [vmem:[%s9290_s1 + $0xae0] ss:$36 sps:$4 sm:$0xff]  }
 0xd14   : > { %4357 = vmatpush2.bf16.msra.mxu0 %v6604_v46 }
 0xd15   : > { %4358 = vmatprep.subr.bf16.mxu0 %v6609_v26  ;;  %4412 = vmatpush2.bf16.msra.mxu1 %v6655_v9  ;;  %v6712_v9 = vld [vmem:[%s9290_s1 + $0xadc] ss:$36 sps:$4 sm:$0xff]  }
 0xd16   : > { %4413 = vmatprep.subr.bf16.mxu1 %v6660_v28 }
 0xd18   : > { %4359 = vmatpush2.bf16.msra.mxu0 %v6607_v29 }
 0xd19   : > { %4360 = vmatprep.subr.bf16.mxu0 %v6615_v30  ;;  %4414 = vmatpush2.bf16.msra.mxu1 %v6658_v31  ;;  %v6720_v30 = vld [vmem:[%s9290_s1 + $0xa98] ss:$36 sps:$4 sm:$0xff]  }
 0xd1a   : > { %4415 = vmatprep.subr.bf16.mxu1 %v6663_v5 }
 0xd1c   : > { %4361 = vmatpush2.bf16.msra.mxu0 %v6613_v33 }
 0xd1d   : > { %4362 = vmatprep.subr.bf16.mxu0 %v6621_v32  ;;  %4416 = vmatpush2.bf16.msra.mxu1 %v6661_v34  ;;  %v6718_v34 = vld [vmem:[%s9290_s1 + $0xa94] ss:$36 sps:$4 sm:$0xff]  }
 0xd1e   : > { %4417 = vmatprep.subr.bf16.mxu1 %v6669_v35 }
 0xd20   : > { %4363 = vmatpush2.bf16.msra.mxu0 %v6619_v25 }
 0xd21   : > { %4364 = vmatprep.subr.bf16.mxu0 %v6627_v36  ;;  %4418 = vmatpush2.bf16.msra.mxu1 %v6667_v37  ;;  %v6726_v36 = vld [vmem:[%s9290_s1 + $0xa50] ss:$36 sps:$4 sm:$0xff]  }
 0xd22   : > { %4419 = vmatprep.subr.bf16.mxu1 %v6675_v38 }
 0xd24   : > { %4365 = vmatpush2.bf16.msra.mxu0 %v6625_v39  ;;  %v6691_v39 = vld [vmem:[%s9290_s1 + $0xd1c] ss:$36 sps:$4 sm:$0xff]  }
 0xd25   : > { %4366 = vmatprep.subr.bf16.mxu0 %v6633_v22  ;;  %4420 = vmatpush2.bf16.msra.mxu1 %v6673_v41  ;;  %v6699_v41 = vld [vmem:[%s9290_s1 + $0xcd8] ss:$36 sps:$4 sm:$0xff]  }
 0xd26   : > { %4421 = vmatprep.subr.bf16.mxu1 %v6681_v43  ;;  %v6724_v43 = vld [vmem:[%s9290_s1 + $0xa4c] ss:$36 sps:$4 sm:$0xff]  }
 0xd28   : > { %4367 = vmatpush2.bf16.msra.mxu0 %v6631_v44  ;;  %v6732_v44 = vld [vmem:[%s9290_s1 + $0xa08] ss:$36 sps:$4 sm:$0xff]  }
 0xd29   : > { %4368 = vmatprep.subr.bf16.mxu0 %v6639_v45  ;;  %4422 = vmatpush2.bf16.msra.mxu1 %v6679_v47  ;;  %v6697_v45 = vld [vmem:[%s9290_s1 + $0xcd4] ss:$36 sps:$4 sm:$0xff]  }
 0xd2a   : > { %4423 = vmatprep.subr.bf16.mxu1 %v6687_v48  ;;  %v6705_v47 = vld [vmem:[%s9290_s1 + $0xc90] ss:$36 sps:$4 sm:$0xff]   ;;  %v6730_v48 = vld [vmem:[%s9290_s1 + $0xa04] ss:$36 sps:$4 sm:$0xff]  }
 0xd2c   : > { %4369 = vmatpush2.bf16.msra.mxu0 %v6637_v49  ;;  %v6738_v49 = vld [vmem:[%s9290_s1 + $0x9c0] ss:$36 sps:$4 sm:$0xff]  }
 0xd2d   : > { %4370 = vmatprep.subr.bf16.mxu0 %v6645_v50  ;;  %4424 = vmatpush2.bf16.msra.mxu1 %v6685_v51  ;;  %v6703_v50 = vld [vmem:[%s9290_s1 + $0xc8c] ss:$36 sps:$4 sm:$0xff]  }
 0xd2e   : > { %4499 = vmatprep.subr.bf16.mxu1 %v6693_v52  ;;  %v6711_v51 = vld [vmem:[%s9290_s1 + $0xc48] ss:$36 sps:$4 sm:$0xff]   ;;  %v6736_v52 = vld [vmem:[%s9290_s1 + $0x9bc] ss:$36 sps:$4 sm:$0xff]  }
 0xd30   : > { %4371 = vmatpush2.bf16.msra.mxu0 %v6643_v40  ;;  %v6744_v40 = vld [vmem:[%s9290_s1 + $0x978] ss:$36 sps:$4 sm:$0xff]  }
 0xd31   : > { %4446 = vmatprep.subr.bf16.mxu0 %v6666_v23  ;;  %v6709_v23 = vld [vmem:[%s9290_s1 + $0xc44] ss:$36 sps:$4 sm:$0xff]  }
 0xd65   : > { %v2384_v53 = vpop.f32.mrf.mxu1 }
 0xd66   : > { %v2385_v58 = vadd.f32 %v2384_v53, %v8084_v42  ;;  %v6717_v53 = vld [vmem:[%s9290_s1 + $0xc00] ss:$36 sps:$4 sm:$0xff]  }
 0xd67   : > { %v2386_v19 = vpop.f32.mrf.mxu1 }
 0xd68   : > { %v2387_v55 = vadd.f32 %v2386_v19, %v8084_v42  ;;  %v2522_v1 = vmax.f32 %v2385_v58, 0.0  ;;  %v6742_v19 = vld [vmem:[%s9290_s1 + $0x974] ss:$36 sps:$4 sm:$0xff]   ;;  %v6748_v58 = vld [vmem:[%s9290_s1 + $0x92c] ss:$36 sps:$4 sm:$0xff]  }
 0xd69   : > { %v2388_v27 = vpop.f32.mrf.mxu1 }
 0xd6a   : > { %v2389_v56 = vadd.f32 %v2388_v27, %v8086_v54  ;;  %v2523_v62 = vmax.f32 %v2387_v55, 0.0  ;;  %v6750_v27 = vld [vmem:[%s9290_s1 + $0x930] ss:$36 sps:$4 sm:$0xff]   ;;  %v6715_v55 = vld [vmem:[%s9290_s1 + $0xbfc] ss:$36 sps:$4 sm:$0xff]  }
 0xd6b   : > { %v2390_v59 = vpop.f32.mrf.mxu1 }
 0xd6c   : > { %v2391_v60 = vadd.f32 %v2390_v59, %v8086_v54  ;;  %v2530_v61 = vmax.f32 %v2389_v56, 0.0  ;;  %v6723_v56 = vld [vmem:[%s9290_s1 + $0xbb8] ss:$36 sps:$4 sm:$0xff]   ;;  %v6756_v59 = vld [vmem:[%s9290_s1 + $0x8e8] ss:$36 sps:$4 sm:$0xff]  }
 0xd6e   : > { %v2531_v63 = vmax.f32 %v2391_v60, 0.0  ;;  %v8097_v6 = vpack.c.bf16 %v2530_v61, %v2522_v1  ;;  %v6721_v60 = vld [vmem:[%s9290_s1 + $0xbb4] ss:$36 sps:$4 sm:$0xff]   ;;  %v6727_v1 = vld [vmem:[%s9290_s1 + $0xb6c] ss:$36 sps:$4 sm:$0xff]  }
 0xd6f   : > { %v6729_v61 = vld [vmem:[%s9290_s1 + $0xb70] ss:$36 sps:$4 sm:$0xff]  }
 0xd70   : > { %v8092_v2 = vpack.c.bf16 %v2531_v63, %v2523_v62  ;;  %v6754_v62 = vld [vmem:[%s9290_s1 + $0x8e4] ss:$36 sps:$4 sm:$0xff]  }
 0xd71   : > { %v6762_v63 = vld [vmem:[%s9290_s1 + $0x8a8] ss:$36 sps:$4 sm:$0xff]  }
 0xd72   : > { %4372 = vmatprep.mubr.bf16.mxu0 %v8092_v2 }
 0xd73   : > { %4373 = vmatmul.mubr.bf16.vlgmr.msra.gmra.mxu0 %v8097_v6 }
 0xd74   : > { %4447 = vmatpush1.bf16.msra.mxu0 %v6664_v3 }
 0xd75   : > { %4448 = vmatprep.subr.bf16.mxu0 %v6672_v7  ;;  %v6735_v7 = vld [vmem:[%s9290_s1 + $0xb28] ss:$36 sps:$4 sm:$0xff]  }
 0xd78   : > { %4449 = vmatpush1.bf16.msra.mxu0 %v6670_v4 }
 0xd79   : > { %4450 = vmatprep.subr.bf16.mxu0 %v6678_v8 }
 0xd7c   : > { %4451 = vmatpush1.bf16.msra.mxu0 %v6676_v10  ;;  %v6733_v10 = vld [vmem:[%s9290_s1 + $0xb24] ss:$36 sps:$4 sm:$0xff]  }
 0xd7d   : > { %4452 = vmatprep.subr.bf16.mxu0 %v6684_v11 }
 0xd80   : > { %4453 = vmatpush1.bf16.msra.mxu0 %v6682_v12  ;;  %v6741_v12 = vld [vmem:[%s9290_s1 + $0xf60] ss:$36 sps:$4 sm:$0xff]  }
 0xd81   : > { %4454 = vmatprep.subr.bf16.mxu0 %v6690_v13 }
 0xd84   : > { %4455 = vmatpush1.bf16.msra.mxu0 %v6688_v14 }
 0xd85   : > { %4456 = vmatprep.subr.bf16.mxu0 %v6696_v15 }
 0xd88   : > { %4457 = vmatpush1.bf16.msra.mxu0 %v6694_v17 }
 0xd89   : > { %4458 = vmatprep.subr.bf16.mxu0 %v6702_v18 }
 0xd8c   : > { %v2427_v21 = vpop.f32.mrf.mxu1  ;;  %4459 = vmatpush1.bf16.msra.mxu0 %v6700_v20 }
 0xd8d   : > { %4460 = vmatprep.subr.bf16.mxu0 %v6708_v0  ;;  %v2428_v31 = vadd.f32 %v2427_v21, %v8084_v42  ;;  %v6739_v21 = vld [vmem:[%s9290_s1 + $0xf5c] ss:$36 sps:$4 sm:$0xff]  }
 0xd8e   : > { %v2429_v46 = vpop.f32.mrf.mxu1 }
 0xd8f   : > { %v2430_v28 = vadd.f32 %v2429_v46, %v8084_v42  ;;  %v2524_v37 = vmax.f32 %v2428_v31, 0.0 }
 0xd90   : > { %v2431_v26 = vpop.f32.mrf.mxu1  ;;  %4461 = vmatpush1.bf16.msra.mxu0 %v6706_v24 }
 0xd91   : > { %v2432_v29 = vadd.f32 %v2431_v26, %v8086_v54  ;;  %4462 = vmatprep.subr.bf16.mxu0 %v6714_v57  ;;  %v2525_v35 = vmax.f32 %v2430_v28, 0.0  ;;  %v6747_v26 = vld [vmem:[%s9290_s1 + $0xf18] ss:$36 sps:$4 sm:$0xff]  }
 0xd92   : > { %v2433_v5 = vpop.f32.mrf.mxu1 }
 0xd93   : > { %v2434_v33 = vadd.f32 %v2433_v5, %v8086_v54  ;;  %v2532_v32 = vmax.f32 %v2432_v29, 0.0 }
 0xd94   : > { %4463 = vmatpush2.bf16.msra.mxu0 %v6712_v9 }
 0xd95   : > { %v2533_v25 = vmax.f32 %v2434_v33, 0.0  ;;  %4464 = vmatprep.subr.bf16.mxu0 %v6720_v30  ;;  %v8167_v22 = vpack.c.bf16 %v2532_v32, %v2524_v37 }
 0xd97   : > { %v8162_v38 = vpack.c.bf16 %v2533_v25, %v2525_v35 }
 0xd98   : > { %4465 = vmatpush2.bf16.msra.mxu0 %v6718_v34  ;;  %v6745_v34 = vld [vmem:[%s9290_s1 + $0xf14] ss:$36 sps:$4 sm:$0xff]  }
 0xd99   : > { %4425 = vmatprep.mubr.bf16.mxu1 %v8162_v38  ;;  %4466 = vmatprep.subr.bf16.mxu0 %v6726_v36 }
 0xd9a   : > { %4426 = vmatmul.mubr.bf16.vlgmr.msra.gmra.mxu1 %v8167_v22 }
 0xd9b   : > { %4500 = vmatpush1.bf16.msra.mxu1 %v6691_v39 }
 0xd9c   : > { %4501 = vmatprep.subr.bf16.mxu1 %v6699_v41  ;;  %4467 = vmatpush2.bf16.msra.mxu0 %v6724_v43  ;;  %v6751_v41 = vld [vmem:[%s9290_s1 + $0xecc] ss:$36 sps:$4 sm:$0xff]  }
 0xd9d   : > { %4468 = vmatprep.subr.bf16.mxu0 %v6732_v44  ;;  %v6759_v43 = vld [vmem:[%s9290_s1 + $0xe88] ss:$36 sps:$4 sm:$0xff]  }
 0xd9e   : > { %v6757_v44 = vld [vmem:[%s9290_s1 + $0xe84] ss:$36 sps:$4 sm:$0xff]  }
 0xd9f   : > { %4502 = vmatpush1.bf16.msra.mxu1 %v6697_v45  ;;  %v6765_v45 = vld [vmem:[%s9290_s1 + $0xe40] ss:$36 sps:$4 sm:$0xff]  }
 0xda0   : > { %4503 = vmatprep.subr.bf16.mxu1 %v6705_v47  ;;  %4469 = vmatpush2.bf16.msra.mxu0 %v6730_v48  ;;  %v6760_v47 = vld [vmem:[%s9290_s1 + $0x8a4] ss:$36 sps:$4 sm:$0xff]   ;;  %v6763_v48 = vld [vmem:[%s9290_s1 + $0xe3c] ss:$36 sps:$4 sm:$0xff]  }
 0xda1   : > { %4470 = vmatprep.subr.bf16.mxu0 %v6738_v49  ;;  %v6768_v49 = vld [vmem:[%s9290_s1 + $0x860] ss:$36 sps:$4 sm:$0xff]  }
 0xda3   : > { %4504 = vmatpush1.bf16.msra.mxu1 %v6703_v50  ;;  %v6771_v50 = vld [vmem:[%s9290_s1 + $0xdf8] ss:$36 sps:$4 sm:$0xff]  }
 0xda4   : > { %4505 = vmatprep.subr.bf16.mxu1 %v6711_v51  ;;  %4471 = vmatpush2.bf16.msra.mxu0 %v6736_v52  ;;  %v6766_v51 = vld [vmem:[%s9290_s1 + $0x85c] ss:$36 sps:$4 sm:$0xff]   ;;  %v6769_v52 = vld [vmem:[%s9290_s1 + $0xdf4] ss:$36 sps:$4 sm:$0xff]  }
 0xda5   : > { %4472 = vmatprep.subr.bf16.mxu0 %v6744_v40  ;;  %v6774_v40 = vld [vmem:[%s9290_s1 + $0x818] ss:$36 sps:$4 sm:$0xff]  }
 0xda7   : > { %4506 = vmatpush1.bf16.msra.mxu1 %v6709_v23  ;;  %v6777_v23 = vld [vmem:[%s9290_s1 + $0xdb0] ss:$36 sps:$4 sm:$0xff]  }
 0xda8   : > { %4507 = vmatprep.subr.bf16.mxu1 %v6717_v53  ;;  %4473 = vmatpush2.bf16.msra.mxu0 %v6742_v19  ;;  %v6772_v53 = vld [vmem:[%s9290_s1 + $0x814] ss:$36 sps:$4 sm:$0xff]   ;;  %v6775_v19 = vld [vmem:[%s9290_s1 + $0xdac] ss:$36 sps:$4 sm:$0xff]  }
 0xda9   : > { %4474 = vmatprep.subr.bf16.mxu0 %v6750_v27  ;;  %v6780_v27 = vld [vmem:[%s9290_s1 + $0x7d0] ss:$36 sps:$4 sm:$0xff]  }
 0xdab   : > { %4508 = vmatpush1.bf16.msra.mxu1 %v6715_v55  ;;  %v6783_v55 = vld [vmem:[%s9290_s1 + $0xd68] ss:$36 sps:$4 sm:$0xff]  }
 0xdac   : > { %4509 = vmatprep.subr.bf16.mxu1 %v6723_v56  ;;  %4475 = vmatpush2.bf16.msra.mxu0 %v6748_v58  ;;  %v6778_v56 = vld [vmem:[%s9290_s1 + $0x7cc] ss:$36 sps:$4 sm:$0xff]   ;;  %v6781_v58 = vld [vmem:[%s9290_s1 + $0xd64] ss:$36 sps:$4 sm:$0xff]  }
 0xdad   : > { %4476 = vmatprep.subr.bf16.mxu0 %v6756_v59  ;;  %v6786_v59 = vld [vmem:[%s9290_s1 + $0x788] ss:$36 sps:$4 sm:$0xff]  }
 0xdaf   : > { %4510 = vmatpush1.bf16.msra.mxu1 %v6721_v60  ;;  %v6789_v60 = vld [vmem:[%s9290_s1 + $0xd28] ss:$36 sps:$4 sm:$0xff]  }
 0xdb0   : > { %v2513_v3 = vpop.f32.mrf.mxu1  ;;  %4511 = vmatprep.subr.bf16.mxu1 %v6729_v61  ;;  %4477 = vmatpush2.bf16.msra.mxu0 %v6754_v62  ;;  %v6784_v61 = vld [vmem:[%s9290_s1 + $0x784] ss:$36 sps:$4 sm:$0xff]  }
 0xdb1   : > { %4552 = vmatprep.subr.bf16.mxu0 %v6762_v63  ;;  %v2514_v17 = vadd.f32 %v2513_v3, %v8084_v42  ;;  %v6787_v62 = vld [vmem:[%s9290_s1 + $0xd24] ss:$36 sps:$4 sm:$0xff]   ;;  %v6790_v3 = vld [vmem:[%s9290_s1 + $0x73c] ss:$36 sps:$4 sm:$0xff]  }
 0xdb2   : > { %v2515_v4 = vpop.f32.mrf.mxu1  ;;  %v6792_v63 = vld [vmem:[%s9290_s1 + $0x740] ss:$36 sps:$4 sm:$0xff]  }
 0xdb3   : > { %4512 = vmatpush1.bf16.msra.mxu1 %v6727_v1  ;;  %v2470_v8 = vpop.f32.mrf.mxu0  ;;  %v2516_v13 = vadd.f32 %v2515_v4, %v8084_v42  ;;  %v2528_v31 = vmax.f32 %v2514_v17, 0.0  ;;  %v6795_v1 = vld [vmem:[%s9290_s1 + $0xce0] ss:$36 sps:$4 sm:$0xff]   ;;  %v6798_v4 = vld [vmem:[%s9290_s1 + $0x6f8] ss:$36 sps:$4 sm:$0xff]  }
 0xdb4   : > { %v2517_v11 = vpop.f32.mrf.mxu1  ;;  %4513 = vmatprep.subr.bf16.mxu1 %v6735_v7  ;;  %v2471_v28 = vadd.f32 %v2470_v8, %v8084_v42  ;;  %v6793_v7 = vld [vmem:[%s9290_s1 + $0xcdc] ss:$36 sps:$4 sm:$0xff]   ;;  %v6810_v17 = vld [vmem:[%s9290_s1 + $0xae8] ss:$36 sps:$4 sm:$0xff]  }
 0xdb5   : > { %v2518_v14 = vadd.f32 %v2517_v11, %v8086_v54  ;;  %v2472_v15 = vpop.f32.mrf.mxu0  ;;  %v2529_v9 = vmax.f32 %v2516_v13, 0.0  ;;  %v6801_v8 = vld [vmem:[%s9290_s1 + $0xc98] ss:$36 sps:$4 sm:$0xff]   ;;  %v6807_v13 = vld [vmem:[%s9290_s1 + $0xc50] ss:$36 sps:$4 sm:$0xff]  }
 0xdb6   : > { %v2519_v18 = vpop.f32.mrf.mxu1  ;;  %v2473_v57 = vadd.f32 %v2472_v15, %v8084_v42  ;;  %v6753_v42 = vld [vmem:[%s9290_s1 + $0xed0] ss:$36 sps:$4 sm:$0xff]   ;;  %v2526_v37 = vmax.f32 %v2471_v28, 0.0 }
 0xdb7   : > { %v2520_v20 = vadd.f32 %v2519_v18, %v8086_v54  ;;  %4514 = vmatpush1.bf16.msra.mxu1 %v6733_v10  ;;  %v2474_v0 = vpop.f32.mrf.mxu0  ;;  %v2536_v24 = vmax.f32 %v2518_v14, 0.0  ;;  %v6796_v10 = vld [vmem:[%s9290_s1 + $0x6f4] ss:$36 sps:$4 sm:$0xff]   ;;  %v6802_v14 = vld [vmem:[%s9290_s1 + $0x6ac] ss:$36 sps:$4 sm:$0xff]  }
 0xdb8   : > { %v2475_v46 = vadd.f32 %v2474_v0, %v8086_v54  ;;  %4515 = vmatprep.subr.bf16.mxu1 %v6741_v12  ;;  %v2527_v25 = vmax.f32 %v2473_v57, 0.0  ;;  %v6799_v11 = vld [vmem:[%s9290_s1 + $0xc94] ss:$36 sps:$4 sm:$0xff]   ;;  %v6805_v15 = vld [vmem:[%s9290_s1 + $0xc4c] ss:$36 sps:$4 sm:$0xff]  }
 0xdb9   : > { %v2537_v29 = vmax.f32 %v2520_v20, 0.0  ;;  %v2476_v30 = vpop.f32.mrf.mxu0  ;;  %v8271_v35 = vpack.c.bf16 %v2536_v24, %v2528_v31  ;;  %v6804_v12 = vld [vmem:[%s9290_s1 + $0x6b0] ss:$36 sps:$4 sm:$0xff]   ;;  %v6813_v18 = vld [vmem:[%s9290_s1 + $0xc08] ss:$36 sps:$4 sm:$0xff]  }
 0xdba   : > { %v2477_v5 = vadd.f32 %v2476_v30, %v8086_v54  ;;  %v2534_v32 = vmax.f32 %v2475_v46, 0.0  ;;  %v6808_v20 = vld [vmem:[%s9290_s1 + $0xae4] ss:$36 sps:$4 sm:$0xff]   ;;  %v6814_v57 = vld [vmem:[%s9290_s1 + $0xa9c] ss:$36 sps:$4 sm:$0xff]  }
 0xdbb   : > { %v8266_v33 = vpack.c.bf16 %v2537_v29, %v2529_v9  ;;  %4516 = vmatpush2.bf16.msra.mxu1 %v6739_v21  ;;  %v6811_v0 = vld [vmem:[%s9290_s1 + $0xc04] ss:$36 sps:$4 sm:$0xff]   ;;  %v6817_v46 = vld [vmem:[%s9290_s1 + $0xbbc] ss:$36 sps:$4 sm:$0xff]   ;;  %v6820_v28 = vld [vmem:[%s9290_s1 + $0xa54] ss:$36 sps:$4 sm:$0xff]  }
 0xdbc   : > { %v2535_v36 = vmax.f32 %v2477_v5, 0.0  ;;  %4517 = vmatprep.subr.bf16.mxu1 %v6747_v26  ;;  %v8280_v39 = vpack.c.bf16 %v2534_v32, %v2526_v37  ;;  %v6816_v21 = vld [vmem:[%s9290_s1 + $0xaa0] ss:$36 sps:$4 sm:$0xff]   ;;  %v6822_v26 = vld [vmem:[%s9290_s1 + $0xa58] ss:$36 sps:$4 sm:$0xff]  }
 0xdbd   : > { %4435 = vmatprep.mubr.bf16.mxu1 %v8266_v33  ;;  %v6819_v24 = vld [vmem:[%s9290_s1 + $0xbc0] ss:$36 sps:$4 sm:$0xff]   ;;  %v6825_v9 = vld [vmem:[%s9290_s1 + $0xb78] ss:$36 sps:$4 sm:$0xff]   ;;  %v6828_v30 = vld [vmem:[%s9290_s1 + $0xa10] ss:$36 sps:$4 sm:$0xff]  }
 0xdbe   : > { %v8277_v54 = vpack.c.bf16 %v2535_v36, %v2527_v25  ;;  %4436 = vmatmul.mubr.bf16.gmra.mxu1 %v8271_v35  ;;  %v6823_v29 = vld [vmem:[%s9290_s1 + $0xb74] ss:$36 sps:$4 sm:$0xff]   ;;  %v6826_v5 = vld [vmem:[%s9290_s1 + $0xa0c] ss:$36 sps:$4 sm:$0xff]   ;;  %v6832_v36 = vld [vmem:[%s9290_s1 + $0x9c4] ss:$36 sps:$4 sm:$0xff]  }
 0xdbf   : > { %4518 = vmatpush2.bf16.msra.mxu1 %v6745_v34  ;;  %4531 = vmatprep.mubr.bf16.mxu1 %v8162_v38  ;;  %v6831_v31 = vld [vmem:[%s9290_s1 + $0xb30] ss:$36 sps:$4 sm:$0xff]   ;;  %v6834_v34 = vld [vmem:[%s9290_s1 + $0x9c8] ss:$36 sps:$4 sm:$0xff]   ;;  %v6840_v37 = vld [vmem:[%s9290_s1 + $0x980] ss:$36 sps:$4 sm:$0xff]  }
 0xdc0   : > { %4382 = vmatprep.mubr.bf16.mxu0 %v8277_v54  ;;  %4519 = vmatprep.subr.bf16.mxu1 %v6753_v42  ;;  %v6829_v32 = vld [vmem:[%s9290_s1 + $0xb2c] ss:$36 sps:$4 sm:$0xff]   ;;  %v6835_v42 = vld [vmem:[%s9290_s1 + $0xf64] ss:$36 sps:$4 sm:$0xff]  }
 0xdc1   : > { %4383 = vmatmul.mubr.bf16.gmra.mxu0 %v8280_v39  ;;  %v6837_v25 = vld [vmem:[%s9290_s1 + $0xf68] ss:$36 sps:$4 sm:$0xff]  }
 0xdc2   : > { %4478 = vmatprep.mubr.bf16.mxu0 %v8092_v2 }
 0xdc3   : > { %4520 = vmatpush2.bf16.msra.mxu1 %v6751_v41  ;;  %v6843_v41 = vld [vmem:[%s9290_s1 + $0xf20] ss:$36 sps:$4 sm:$0xff]  }
 0xdc4   : > { %4521 = vmatprep.subr.bf16.mxu1 %v6759_v43  ;;  %v6838_v43 = vld [vmem:[%s9290_s1 + $0x97c] ss:$36 sps:$4 sm:$0xff]  }
 0xdc7   : > { %4522 = vmatpush2.bf16.msra.mxu1 %v6757_v44  ;;  %v6841_v44 = vld [vmem:[%s9290_s1 + $0xf1c] ss:$36 sps:$4 sm:$0xff]  }
 0xdc8   : > { %4523 = vmatprep.subr.bf16.mxu1 %v6765_v45  ;;  %v6846_v45 = vld [vmem:[%s9290_s1 + $0x938] ss:$36 sps:$4 sm:$0xff]  }
 0xdc9   : > { %4479 = vmatmul.mubr.bf16.vlgmr.msra.gmra.mxu0 %v8097_v6 }
 0xdca   : > { %4553 = vmatpush1.bf16.msra.mxu0 %v6760_v47  ;;  %4488 = vmatprep.mubr.bf16.mxu0 %v8277_v54  ;;  %v6849_v47 = vld [vmem:[%s9290_s1 + $0xed8] ss:$36 sps:$4 sm:$0xff]  }
 0xdcb   : > { %4524 = vmatpush2.bf16.msra.mxu1 %v6763_v48  ;;  %4554 = vmatprep.subr.bf16.mxu0 %v6768_v49  ;;  %v6844_v48 = vld [vmem:[%s9290_s1 + $0x934] ss:$36 sps:$4 sm:$0xff]  }
 0xdcc   : > { %4525 = vmatprep.subr.bf16.mxu1 %v6771_v50  ;;  %v6847_v49 = vld [vmem:[%s9290_s1 + $0xed4] ss:$36 sps:$4 sm:$0xff]  }
 0xdcd   : > { %v6852_v50 = vld [vmem:[%s9290_s1 + $0x8f0] ss:$36 sps:$4 sm:$0xff]  }
 0xdce   : > { %4555 = vmatpush1.bf16.msra.mxu0 %v6766_v51  ;;  %v6855_v51 = vld [vmem:[%s9290_s1 + $0xe90] ss:$36 sps:$4 sm:$0xff]  }
 0xdcf   : > { %4526 = vmatpush2.bf16.msra.mxu1 %v6769_v52  ;;  %4556 = vmatprep.subr.bf16.mxu0 %v6774_v40  ;;  %v6850_v52 = vld [vmem:[%s9290_s1 + $0x8ec] ss:$36 sps:$4 sm:$0xff]  }
 0xdd0   : > { %4527 = vmatprep.subr.bf16.mxu1 %v6777_v23  ;;  %v6853_v40 = vld [vmem:[%s9290_s1 + $0xe8c] ss:$36 sps:$4 sm:$0xff]  }
 0xdd1   : > { %4489 = vmatmul.mubr.bf16.gmra.mxu0 %v8280_v39  ;;  %v6858_v23 = vld [vmem:[%s9290_s1 + $0x8b0] ss:$36 sps:$4 sm:$0xff]  }
 0xdd2   : > { %4557 = vmatpush1.bf16.msra.mxu0 %v6772_v53  ;;  %4584 = vmatprep.mubr.bf16.mxu0 %v8092_v2  ;;  %v6861_v53 = vld [vmem:[%s9290_s1 + $0xe48] ss:$36 sps:$4 sm:$0xff]  }
 0xdd3   : > { %4528 = vmatpush2.bf16.msra.mxu1 %v6775_v19  ;;  %4558 = vmatprep.subr.bf16.mxu0 %v6780_v27  ;;  %v6856_v19 = vld [vmem:[%s9290_s1 + $0x8ac] ss:$36 sps:$4 sm:$0xff]   ;;  %v6859_v27 = vld [vmem:[%s9290_s1 + $0xe44] ss:$36 sps:$4 sm:$0xff]  }
 0xdd4   : > { %4529 = vmatprep.subr.bf16.mxu1 %v6783_v55  ;;  %v6864_v55 = vld [vmem:[%s9290_s1 + $0x868] ss:$36 sps:$4 sm:$0xff]  }
 0xdd6   : > { %4559 = vmatpush1.bf16.msra.mxu0 %v6778_v56  ;;  %v6867_v56 = vld [vmem:[%s9290_s1 + $0xe00] ss:$36 sps:$4 sm:$0xff]  }
 0xdd7   : > { %4530 = vmatpush2.bf16.msra.mxu1 %v6781_v58  ;;  %4560 = vmatprep.subr.bf16.mxu0 %v6786_v59  ;;  %v6862_v58 = vld [vmem:[%s9290_s1 + $0x864] ss:$36 sps:$4 sm:$0xff]   ;;  %v6865_v59 = vld [vmem:[%s9290_s1 + $0xdfc] ss:$36 sps:$4 sm:$0xff]  }
 0xdd8   : > { %4605 = vmatprep.subr.bf16.mxu1 %v6789_v60  ;;  %v6870_v60 = vld [vmem:[%s9290_s1 + $0x820] ss:$36 sps:$4 sm:$0xff]  }
 0xdda   : > { %4532 = vmatmul.mubr.bf16.vlgmr.msra.gmra.mxu1 %v8167_v22  ;;  %4561 = vmatpush1.bf16.msra.mxu0 %v6784_v61  ;;  %v6873_v61 = vld [vmem:[%s9290_s1 + $0xdb8] ss:$36 sps:$4 sm:$0xff]  }
 0xddb   : > { %4541 = vmatprep.mubr.bf16.mxu1 %v8266_v33  ;;  %4606 = vmatpush1.bf16.msra.mxu1 %v6787_v62  ;;  %v6868_v62 = vld [vmem:[%s9290_s1 + $0x81c] ss:$36 sps:$4 sm:$0xff]  }
 0xddc   : > { %4562 = vmatprep.subr.bf16.mxu0 %v6792_v63  ;;  %4607 = vmatprep.subr.bf16.mxu1 %v6795_v1  ;;  %v6871_v63 = vld [vmem:[%s9290_s1 + $0xdb4] ss:$36 sps:$4 sm:$0xff]  }
 0xddd   : > { %v6876_v1 = vld [vmem:[%s9290_s1 + $0x7d8] ss:$36 sps:$4 sm:$0xff]  }
 0xdde   : > { %4563 = vmatpush1.bf16.msra.mxu0 %v6790_v3  ;;  %v6879_v3 = vld [vmem:[%s9290_s1 + $0xd70] ss:$36 sps:$4 sm:$0xff]  }
 0xddf   : > { %4608 = vmatpush1.bf16.msra.mxu1 %v6793_v7  ;;  %4564 = vmatprep.subr.bf16.mxu0 %v6798_v4  ;;  %v6874_v7 = vld [vmem:[%s9290_s1 + $0x7d4] ss:$36 sps:$4 sm:$0xff]   ;;  %v6877_v4 = vld [vmem:[%s9290_s1 + $0xd6c] ss:$36 sps:$4 sm:$0xff]  }
 0xde0   : > { %4609 = vmatprep.subr.bf16.mxu1 %v6801_v8  ;;  %v6882_v8 = vld [vmem:[%s9290_s1 + $0x790] ss:$36 sps:$4 sm:$0xff]  }
 0xde2   : > { %4542 = vmatmul.mubr.bf16.gmra.mxu1 %v8271_v35  ;;  %4565 = vmatpush1.bf16.msra.mxu0 %v6796_v10  ;;  %v6885_v10 = vld [vmem:[%s9290_s1 + $0xd30] ss:$36 sps:$4 sm:$0xff]  }
 0xde3   : > { %4610 = vmatpush1.bf16.msra.mxu1 %v6799_v11  ;;  %4637 = vmatprep.mubr.bf16.mxu1 %v8162_v38  ;;  %v6880_v11 = vld [vmem:[%s9290_s1 + $0x78c] ss:$36 sps:$4 sm:$0xff]  }
 0xde4   : > { %4566 = vmatprep.subr.bf16.mxu0 %v6804_v12  ;;  %4611 = vmatprep.subr.bf16.mxu1 %v6807_v13  ;;  %v6883_v12 = vld [vmem:[%s9290_s1 + $0xd2c] ss:$36 sps:$4 sm:$0xff]  }
 0xde5   : > { %v6888_v13 = vld [vmem:[%s9290_s1 + $0x748] ss:$36 sps:$4 sm:$0xff]  }
 0xde6   : > { %4567 = vmatpush1.bf16.msra.mxu0 %v6802_v14  ;;  %v6891_v14 = vld [vmem:[%s9290_s1 + $0xce8] ss:$36 sps:$4 sm:$0xff]  }
 0xde7   : > { %4612 = vmatpush1.bf16.msra.mxu1 %v6805_v15  ;;  %4568 = vmatprep.subr.bf16.mxu0 %v6810_v17  ;;  %v6886_v15 = vld [vmem:[%s9290_s1 + $0x744] ss:$36 sps:$4 sm:$0xff]  }
 0xde8   : > { %4613 = vmatprep.subr.bf16.mxu1 %v6813_v18  ;;  %v6889_v17 = vld [vmem:[%s9290_s1 + $0xce4] ss:$36 sps:$4 sm:$0xff]  }
 0xde9   : > { %v6894_v18 = vld [vmem:[%s9290_s1 + $0x700] ss:$36 sps:$4 sm:$0xff]  }
 0xdea   : > { %4569 = vmatpush2.bf16.msra.mxu0 %v6808_v20  ;;  %v6897_v20 = vld [vmem:[%s9290_s1 + $0xca0] ss:$36 sps:$4 sm:$0xff]  }
 0xdeb   : > { %4614 = vmatpush1.bf16.msra.mxu1 %v6811_v0  ;;  %4570 = vmatprep.subr.bf16.mxu0 %v6816_v21  ;;  %v6892_v0 = vld [vmem:[%s9290_s1 + $0x6fc] ss:$36 sps:$4 sm:$0xff]  }
 0xdec   : > { %4615 = vmatprep.subr.bf16.mxu1 %v6819_v24  ;;  %v6895_v21 = vld [vmem:[%s9290_s1 + $0xc9c] ss:$36 sps:$4 sm:$0xff]  }
 0xded   : > { %v6900_v24 = vld [vmem:[%s9290_s1 + $0x6b8] ss:$36 sps:$4 sm:$0xff]  }
 0xdee   : > { %4571 = vmatpush2.bf16.msra.mxu0 %v6814_v57  ;;  %v6903_v57 = vld [vmem:[%s9290_s1 + $0xc58] ss:$36 sps:$4 sm:$0xff]  }
 0xdef   : > { %4616 = vmatpush1.bf16.msra.mxu1 %v6817_v46  ;;  %4572 = vmatprep.subr.bf16.mxu0 %v6822_v26  ;;  %v6898_v46 = vld [vmem:[%s9290_s1 + $0x6b4] ss:$36 sps:$4 sm:$0xff]  }
 0xdf0   : > { %4617 = vmatprep.subr.bf16.mxu1 %v6825_v9  ;;  %v6901_v26 = vld [vmem:[%s9290_s1 + $0xc54] ss:$36 sps:$4 sm:$0xff]  }
 0xdf1   : > { %v6906_v9 = vld [vmem:[%s9290_s1 + $0xaf0] ss:$36 sps:$4 sm:$0xff]  }
 0xdf2   : > { %4573 = vmatpush2.bf16.msra.mxu0 %v6820_v28  ;;  %v6909_v28 = vld [vmem:[%s9290_s1 + $0xc10] ss:$36 sps:$4 sm:$0xff]  }
 0xdf3   : > { %4618 = vmatpush1.bf16.msra.mxu1 %v6823_v29  ;;  %4574 = vmatprep.subr.bf16.mxu0 %v6828_v30  ;;  %v6904_v29 = vld [vmem:[%s9290_s1 + $0xaec] ss:$36 sps:$4 sm:$0xff]  }
 0xdf4   : > { %4619 = vmatprep.subr.bf16.mxu1 %v6831_v31  ;;  %v6907_v30 = vld [vmem:[%s9290_s1 + $0xc0c] ss:$36 sps:$4 sm:$0xff]  }
 0xdf5   : > { %v6912_v31 = vld [vmem:[%s9290_s1 + $0xaa8] ss:$36 sps:$4 sm:$0xff]  }
 0xdf6   : > { %4575 = vmatpush2.bf16.msra.mxu0 %v6826_v5  ;;  %v6915_v5 = vld [vmem:[%s9290_s1 + $0xbc8] ss:$36 sps:$4 sm:$0xff]  }
 0xdf7   : > { %4620 = vmatpush1.bf16.msra.mxu1 %v6829_v32  ;;  %4576 = vmatprep.subr.bf16.mxu0 %v6834_v34  ;;  %v6910_v32 = vld [vmem:[%s9290_s1 + $0xaa4] ss:$36 sps:$4 sm:$0xff]  }
 0xdf8   : > { %4621 = vmatprep.subr.bf16.mxu1 %v6837_v25  ;;  %v6913_v34 = vld [vmem:[%s9290_s1 + $0xbc4] ss:$36 sps:$4 sm:$0xff]  }
 0xdf9   : > { %v6918_v25 = vld [vmem:[%s9290_s1 + $0xa60] ss:$36 sps:$4 sm:$0xff]  }
 0xdfa   : > { %4577 = vmatpush2.bf16.msra.mxu0 %v6832_v36  ;;  %v6921_v36 = vld [vmem:[%s9290_s1 + $0xb80] ss:$36 sps:$4 sm:$0xff]  }
 0xdfb   : > { %4622 = vmatpush2.bf16.msra.mxu1 %v6835_v42  ;;  %4578 = vmatprep.subr.bf16.mxu0 %v6840_v37  ;;  %v6916_v42 = vld [vmem:[%s9290_s1 + $0xa5c] ss:$36 sps:$4 sm:$0xff]  }
 0xdfc   : > { %4623 = vmatprep.subr.bf16.mxu1 %v6843_v41  ;;  %v6919_v37 = vld [vmem:[%s9290_s1 + $0xb7c] ss:$36 sps:$4 sm:$0xff]  }
 0xdfd   : > { %v6924_v41 = vld [vmem:[%s9290_s1 + $0xa18] ss:$36 sps:$4 sm:$0xff]  }
 0xdfe   : > { %4579 = vmatpush2.bf16.msra.mxu0 %v6838_v43  ;;  %v6927_v43 = vld [vmem:[%s9290_s1 + $0xb38] ss:$36 sps:$4 sm:$0xff]  }
 0xdff   : > { %4624 = vmatpush2.bf16.msra.mxu1 %v6841_v44  ;;  %4580 = vmatprep.subr.bf16.mxu0 %v6846_v45  ;;  %v6922_v44 = vld [vmem:[%s9290_s1 + $0xa14] ss:$36 sps:$4 sm:$0xff]  }
 0xe00   : > { %4625 = vmatprep.subr.bf16.mxu1 %v6849_v47  ;;  %v6925_v45 = vld [vmem:[%s9290_s1 + $0xb34] ss:$36 sps:$4 sm:$0xff]  }
 0xe01   : > { %v6930_v47 = vld [vmem:[%s9290_s1 + $0x9d0] ss:$36 sps:$4 sm:$0xff]  }
 0xe02   : > { %4581 = vmatpush2.bf16.msra.mxu0 %v6844_v48  ;;  %v6933_v48 = vld [vmem:[%s9290_s1 + $0xf70] ss:$36 sps:$4 sm:$0xff]  }
 0xe03   : > { %4626 = vmatpush2.bf16.msra.mxu1 %v6847_v49  ;;  %4582 = vmatprep.subr.bf16.mxu0 %v6852_v50  ;;  %v6928_v49 = vld [vmem:[%s9290_s1 + $0x9cc] ss:$36 sps:$4 sm:$0xff]  }
 0xe04   : > { %4627 = vmatprep.subr.bf16.mxu1 %v6855_v51  ;;  %v6931_v50 = vld [vmem:[%s9290_s1 + $0xf6c] ss:$36 sps:$4 sm:$0xff]  }
 0xe05   : > { %v6936_v51 = vld [vmem:[%s9290_s1 + $0x988] ss:$36 sps:$4 sm:$0xff]  }
 0xe06   : > { %4583 = vmatpush2.bf16.msra.mxu0 %v6850_v52  ;;  %v6939_v52 = vld [vmem:[%s9290_s1 + $0xf28] ss:$36 sps:$4 sm:$0xff]  }
 0xe07   : > { %4628 = vmatpush2.bf16.msra.mxu1 %v6853_v40  ;;  %4658 = vmatprep.subr.bf16.mxu0 %v6858_v23  ;;  %v6934_v40 = vld [vmem:[%s9290_s1 + $0x984] ss:$36 sps:$4 sm:$0xff]  }
 0xe08   : > { %4629 = vmatprep.subr.bf16.mxu1 %v6861_v53  ;;  %v6937_v23 = vld [vmem:[%s9290_s1 + $0xf24] ss:$36 sps:$4 sm:$0xff]  }
 0xe09   : > { %4585 = vmatmul.mubr.bf16.vlgmr.msra.gmra.mxu0 %v8097_v6  ;;  %v6942_v53 = vld [vmem:[%s9290_s1 + $0x940] ss:$36 sps:$4 sm:$0xff]  }
 0xe0a   : > { %4594 = vmatprep.mubr.bf16.mxu0 %v8277_v54  ;;  %4659 = vmatpush1.bf16.msra.mxu0 %v6856_v19  ;;  %v6945_v19 = vld [vmem:[%s9290_s1 + $0xee0] ss:$36 sps:$4 sm:$0xff]  }
 0xe0b   : > { %4630 = vmatpush2.bf16.msra.mxu1 %v6859_v27  ;;  %4660 = vmatprep.subr.bf16.mxu0 %v6864_v55  ;;  %v6940_v27 = vld [vmem:[%s9290_s1 + $0x93c] ss:$36 sps:$4 sm:$0xff]  }
 0xe0c   : > { %4631 = vmatprep.subr.bf16.mxu1 %v6867_v56  ;;  %v6943_v55 = vld [vmem:[%s9290_s1 + $0xedc] ss:$36 sps:$4 sm:$0xff]  }
 0xe0d   : > { %v6948_v56 = vld [vmem:[%s9290_s1 + $0x8f8] ss:$36 sps:$4 sm:$0xff]  }
 0xe0e   : > { %4661 = vmatpush1.bf16.msra.mxu0 %v6862_v58  ;;  %v6951_v58 = vld [vmem:[%s9290_s1 + $0xe98] ss:$36 sps:$4 sm:$0xff]  }
 0xe0f   : > { %4632 = vmatpush2.bf16.msra.mxu1 %v6865_v59  ;;  %4662 = vmatprep.subr.bf16.mxu0 %v6870_v60  ;;  %v6946_v59 = vld [vmem:[%s9290_s1 + $0x8f4] ss:$36 sps:$4 sm:$0xff]  }
 0xe10   : > { %4633 = vmatprep.subr.bf16.mxu1 %v6873_v61  ;;  %v6949_v60 = vld [vmem:[%s9290_s1 + $0xe94] ss:$36 sps:$4 sm:$0xff]  }
 0xe11   : > { %4595 = vmatmul.mubr.bf16.gmra.mxu0 %v8280_v39  ;;  %v6952_v61 = vld [vmem:[%s9290_s1 + $0xaf4] ss:$36 sps:$4 sm:$0xff]  }
 0xe12   : > { %4663 = vmatpush1.bf16.msra.mxu0 %v6868_v62  ;;  %4690 = vmatprep.mubr.bf16.mxu0 %v8092_v2  ;;  %v6955_v62 = vld [vmem:[%s9290_s1 + $0xe50] ss:$36 sps:$4 sm:$0xff]  }
 0xe13   : > { %4634 = vmatpush2.bf16.msra.mxu1 %v6871_v63  ;;  %4664 = vmatprep.subr.bf16.mxu0 %v6876_v1  ;;  %v6956_v63 = vld [vmem:[%s9290_s1 + $0x8b4] ss:$36 sps:$4 sm:$0xff]   ;;  %v6953_v1 = vld [vmem:[%s9290_s1 + $0xe4c] ss:$36 sps:$4 sm:$0xff]  }
 0xe14   : > { %4635 = vmatprep.subr.bf16.mxu1 %v6879_v3  ;;  %v6957_v3 = vld [vmem:[%s9290_s1 + $0xaac] ss:$36 sps:$4 sm:$0xff]  }
 0xe16   : > { %4665 = vmatpush1.bf16.msra.mxu0 %v6874_v7  ;;  %v6960_v7 = vld [vmem:[%s9290_s1 + $0xe08] ss:$36 sps:$4 sm:$0xff]  }
 0xe17   : > { %4636 = vmatpush2.bf16.msra.mxu1 %v6877_v4  ;;  %4666 = vmatprep.subr.bf16.mxu0 %v6882_v8  ;;  %v6961_v4 = vld [vmem:[%s9290_s1 + $0x86c] ss:$36 sps:$4 sm:$0xff]   ;;  %v6958_v8 = vld [vmem:[%s9290_s1 + $0xe04] ss:$36 sps:$4 sm:$0xff]  }
 0xe18   : > { %4711 = vmatprep.subr.bf16.mxu1 %v6885_v10  ;;  %v6962_v10 = vld [vmem:[%s9290_s1 + $0xa64] ss:$36 sps:$4 sm:$0xff]  }
 0xe1a   : > { %4638 = vmatmul.mubr.bf16.vlgmr.msra.gmra.mxu1 %v8167_v22  ;;  %4667 = vmatpush1.bf16.msra.mxu0 %v6880_v11  ;;  %v6965_v11 = vld [vmem:[%s9290_s1 + $0xdc0] ss:$36 sps:$4 sm:$0xff]  }
 0xe1b   : > { %4647 = vmatprep.mubr.bf16.mxu1 %v8266_v33  ;;  %4712 = vmatpush1.bf16.msra.mxu1 %v6883_v12  ;;  %v6966_v12 = vld [vmem:[%s9290_s1 + $0x824] ss:$36 sps:$4 sm:$0xff]  }
 0xe1c   : > { %4668 = vmatprep.subr.bf16.mxu0 %v6888_v13  ;;  %4713 = vmatprep.subr.bf16.mxu1 %v6891_v14  ;;  %v6963_v13 = vld [vmem:[%s9290_s1 + $0xdbc] ss:$36 sps:$4 sm:$0xff]  }
 0xe1d   : > { %v6967_v14 = vld [vmem:[%s9290_s1 + $0xa1c] ss:$36 sps:$4 sm:$0xff]  }
 0xe1e   : > { %4669 = vmatpush1.bf16.msra.mxu0 %v6886_v15  ;;  %v6970_v15 = vld [vmem:[%s9290_s1 + $0xd78] ss:$36 sps:$4 sm:$0xff]  }
 0xe1f   : > { %4714 = vmatpush1.bf16.msra.mxu1 %v6889_v17  ;;  %4670 = vmatprep.subr.bf16.mxu0 %v6894_v18  ;;  %v6971_v17 = vld [vmem:[%s9290_s1 + $0x7dc] ss:$36 sps:$4 sm:$0xff]   ;;  %v6968_v18 = vld [vmem:[%s9290_s1 + $0xd74] ss:$36 sps:$4 sm:$0xff]  }
 0xe20   : > { %4715 = vmatprep.subr.bf16.mxu1 %v6897_v20  ;;  %v6972_v20 = vld [vmem:[%s9290_s1 + $0x9d4] ss:$36 sps:$4 sm:$0xff]  }
 0xe22   : > { %4648 = vmatmul.mubr.bf16.gmra.mxu1 %v8271_v35  ;;  %4671 = vmatpush1.bf16.msra.mxu0 %v6892_v0  ;;  %v6974_v0 = vld [vmem:[%s9290_s1 + $0xf74] ss:$36 sps:$4 sm:$0xff]  }
 0xe23   : > { %4716 = vmatpush1.bf16.msra.mxu1 %v6895_v21  ;;  %4743 = vmatprep.mubr.bf16.mxu1 %v8162_v38  ;;  %v6973_v21 = vld [vmem:[%s9290_s1 + $0x794] ss:$36 sps:$4 sm:$0xff]  }
 0xe24   : > { %4672 = vmatprep.subr.bf16.mxu0 %v6900_v24  ;;  %4717 = vmatprep.subr.bf16.mxu1 %v6903_v57  ;;  %v6975_v24 = vld [vmem:[%s9290_s1 + $0xd34] ss:$36 sps:$4 sm:$0xff]   ;;  %v6976_v57 = vld [vmem:[%s9290_s1 + $0x98c] ss:$36 sps:$4 sm:$0xff]  }
 0xe26   : > { %4673 = vmatpush1.bf16.msra.mxu0 %v6898_v46  ;;  %v6978_v46 = vld [vmem:[%s9290_s1 + $0xf2c] ss:$36 sps:$4 sm:$0xff]  }
 0xe27   : > { %4718 = vmatpush1.bf16.msra.mxu1 %v6901_v26  ;;  %4674 = vmatprep.subr.bf16.mxu0 %v6906_v9 }
 0xe28   : > { %4719 = vmatprep.subr.bf16.mxu1 %v6909_v28  ;;  %v6977_v28 = vld [vmem:[%s9290_s1 + $0x74c] ss:$36 sps:$4 sm:$0xff]  }
 0xe2a   : > { %4675 = vmatpush2.bf16.msra.mxu0 %v6904_v29  ;;  %v6979_v29 = vld [vmem:[%s9290_s1 + $0xcec] ss:$36 sps:$4 sm:$0xff]  }
 0xe2b   : > { %4720 = vmatpush1.bf16.msra.mxu1 %v6907_v30  ;;  %4676 = vmatprep.subr.bf16.mxu0 %v6912_v31  ;;  %v6980_v30 = vld [vmem:[%s9290_s1 + $0x944] ss:$36 sps:$4 sm:$0xff]  }
 0xe2c   : > { %4721 = vmatprep.subr.bf16.mxu1 %v6915_v5  ;;  %v6982_v5 = vld [vmem:[%s9290_s1 + $0xee4] ss:$36 sps:$4 sm:$0xff]  }
 0xe2e   : > { %4677 = vmatpush2.bf16.msra.mxu0 %v6910_v32 }
 0xe2f   : > { %4722 = vmatpush1.bf16.msra.mxu1 %v6913_v34  ;;  %4678 = vmatprep.subr.bf16.mxu0 %v6918_v25  ;;  %v6981_v25 = vld [vmem:[%s9290_s1 + $0x704] ss:$36 sps:$4 sm:$0xff]  }
 0xe30   : > { %4723 = vmatprep.subr.bf16.mxu1 %v6921_v36 }
 0xe32   : > { %4679 = vmatpush2.bf16.msra.mxu0 %v6916_v42 }
 0xe33   : > { %4724 = vmatpush1.bf16.msra.mxu1 %v6919_v37  ;;  %4680 = vmatprep.subr.bf16.mxu0 %v6924_v41  ;;  %v6983_v37 = vld [vmem:[%s9290_s1 + $0xca4] ss:$36 sps:$4 sm:$0xff]  }
 0xe34   : > { %4725 = vmatprep.subr.bf16.mxu1 %v6927_v43  ;;  %v6984_v43 = vld [vmem:[%s9290_s1 + $0x8fc] ss:$36 sps:$4 sm:$0xff]  }
 0xe36   : > { %4681 = vmatpush2.bf16.msra.mxu0 %v6922_v44  ;;  %v6986_v44 = vld [vmem:[%s9290_s1 + $0xe9c] ss:$36 sps:$4 sm:$0xff]  }
 0xe37   : > { %4726 = vmatpush1.bf16.msra.mxu1 %v6925_v45  ;;  %4682 = vmatprep.subr.bf16.mxu0 %v6930_v47  ;;  %v6985_v45 = vld [vmem:[%s9290_s1 + $0x6bc] ss:$36 sps:$4 sm:$0xff]  }
 0xe38   : > { %4727 = vmatprep.subr.bf16.mxu1 %v6933_v48  ;;  %v6987_v48 = vld [vmem:[%s9290_s1 + $0xc5c] ss:$36 sps:$4 sm:$0xff]  }
 0xe3a   : > { %4683 = vmatpush2.bf16.msra.mxu0 %v6928_v49 }
 0xe3b   : > { %4728 = vmatpush2.bf16.msra.mxu1 %v6931_v50  ;;  %4684 = vmatprep.subr.bf16.mxu0 %v6936_v51  ;;  %v6988_v50 = vld [vmem:[%s9290_s1 + $0xe54] ss:$36 sps:$4 sm:$0xff]  }
 0xe3c   : > { %4729 = vmatprep.subr.bf16.mxu1 %v6939_v52 }
 0xe3e   : > { %4685 = vmatpush2.bf16.msra.mxu0 %v6934_v40  ;;  %v6990_v40 = vld [vmem:[%s9290_s1 + $0xe0c] ss:$36 sps:$4 sm:$0xff]  }
 0xe3f   : > { %4730 = vmatpush2.bf16.msra.mxu1 %v6937_v23  ;;  %4686 = vmatprep.subr.bf16.mxu0 %v6942_v53  ;;  %v6991_v53 = vld [vmem:[%s9290_s1 + $0xbcc] ss:$36 sps:$4 sm:$0xff]  }
 0xe40   : > { %4731 = vmatprep.subr.bf16.mxu1 %v6945_v19  ;;  %v6994_v19 = vld [vmem:[%s9290_s1 + $0xd7c] ss:$36 sps:$4 sm:$0xff]  }
 0xe42   : > { %4687 = vmatpush2.bf16.msra.mxu0 %v6940_v27  ;;  %v6995_v27 = vld [vmem:[%s9290_s1 + $0xb3c] ss:$36 sps:$4 sm:$0xff]  }
 0xe43   : > { %4732 = vmatpush2.bf16.msra.mxu1 %v6943_v55  ;;  %4688 = vmatprep.subr.bf16.mxu0 %v6948_v56 }
 0xe44   : > { %4733 = vmatprep.subr.bf16.mxu1 %v6951_v58 }
 0xe46   : > { %4689 = vmatpush2.bf16.msra.mxu0 %v6946_v59 }
 0xe47   : > { %4734 = vmatpush2.bf16.msra.mxu1 %v6949_v60  ;;  %6212 = vmatprep.subr.bf16.mxu0 %v6952_v61 }
 0xe48   : > { %4735 = vmatprep.subr.bf16.mxu1 %v6955_v62 }
 0xe49   : > { %4691 = vmatmul.mubr.bf16.vlgmr.msra.gmra.mxu0 %v8097_v6 }
 0xe4a   : > { %4700 = vmatprep.mubr.bf16.mxu0 %v8277_v54  ;;  %6213 = vmatpush3.bf16.msra.mxu0 %v6956_v63 }
 0xe4b   : > { %4736 = vmatpush2.bf16.msra.mxu1 %v6953_v1  ;;  %6214 = vmatprep.subr.bf16.mxu0 %v6957_v3 }
 0xe4c   : > { %4737 = vmatprep.subr.bf16.mxu1 %v6960_v7 }
 0xe4e   : > { %6215 = vmatpush3.bf16.msra.mxu0 %v6961_v4 }
 0xe4f   : > { %4738 = vmatpush2.bf16.msra.mxu1 %v6958_v8  ;;  %6216 = vmatprep.subr.bf16.mxu0 %v6962_v10 }
 0xe50   : > { %4739 = vmatprep.subr.bf16.mxu1 %v6965_v11 }
 0xe51   : > { %4701 = vmatmul.mubr.bf16.gmra.mxu0 %v8280_v39 }
 0xe52   : > { %6217 = vmatpush3.bf16.msra.mxu0 %v6966_v12  ;;  %4796 = vmatprep.mubr.bf16.mxu0 %v8092_v2  ;;  %v4374_v2 = vpop.f32.mrf.mxu0 }
 0xe53   : > { %4740 = vmatpush2.bf16.msra.mxu1 %v6963_v13  ;;  %6218 = vmatprep.subr.bf16.mxu0 %v6967_v14 }
 0xe54   : > { %4741 = vmatprep.subr.bf16.mxu1 %v6970_v15  ;;  %v4376_v26 = vpop.f32.mrf.mxu0 }
 0xe56   : > { %6219 = vmatpush3.bf16.msra.mxu0 %v6971_v17  ;;  %v4378_v32 = vpop.f32.mrf.mxu0 }
 0xe57   : > { %4742 = vmatpush2.bf16.msra.mxu1 %v6968_v18  ;;  %6220 = vmatprep.subr.bf16.mxu0 %v6972_v20 }
 0xe58   : > { %6240 = vmatprep.subr.bf16.mxu1 %v6974_v0  ;;  %v4380_v49 = vpop.f32.mrf.mxu0 }
 0xe5a   : > { %4744 = vmatmul.mubr.bf16.vlgmr.msra.gmra.mxu1 %v8167_v22  ;;  %6221 = vmatpush3.bf16.msra.mxu0 %v6973_v21  ;;  %v4427_v9 = vpop.f32.mrf.mxu1 }
 0xe5b   : > { %4753 = vmatprep.mubr.bf16.mxu1 %v8266_v33  ;;  %6241 = vmatpush3.bf16.msra.mxu1 %v6975_v24  ;;  %v4428_v36 = vadd.f32 %v4427_v9, %v4374_v2 }
 0xe5c   : > { %v4429_v31 = vpop.f32.mrf.mxu1  ;;  %6222 = vmatprep.subr.bf16.mxu0 %v6976_v57  ;;  %6242 = vmatprep.subr.bf16.mxu1 %v6978_v46 }
 0xe5d   : > { %v4430_v52 = vadd.f32 %v4429_v31, %v4376_v26 }
 0xe5e   : > { %6223 = vmatpush3.bf16.msra.mxu0 %v6977_v28  ;;  %v4431_v34 = vpop.f32.mrf.mxu1 }
 0xe5f   : > { %v4432_v42 = vadd.f32 %v4431_v34, %v4378_v32  ;;  %6243 = vmatpush3.bf16.msra.mxu1 %v6979_v29  ;;  %6224 = vmatprep.subr.bf16.mxu0 %v6980_v30 }
 0xe60   : > { %6244 = vmatprep.subr.bf16.mxu1 %v6982_v5  ;;  %v4433_v47 = vpop.f32.mrf.mxu1 }
 0xe61   : > { %v8782_v41 = vpack.c.bf16 %v4432_v42, %v4428_v36  ;;  %v4434_v51 = vadd.f32 %v4433_v47, %v4380_v49 }
 0xe62   : > { %4754 = vmatmul.mubr.bf16.gmra.mxu1 %v8271_v35  ;;  %6225 = vmatpush3.bf16.msra.mxu0 %v6981_v25 }
 0xe63   : > { %6245 = vmatpush3.bf16.msra.mxu1 %v6983_v37  ;;  %4845 = vmatprep.mubr.bf16.mxu1 %v8162_v38  ;;  %v6989_v38 = vld [vmem:[%s9290_s1 + $0xc14] ss:$36 sps:$4 sm:$0xff]   ;;  %v8816_v23 = vpack.c.bf16 %v4434_v51, %v4430_v52 }
 0xe64   : > { %4957 = vrot.lane.b32.xlu1 %v8782_v41, %s7066_s14  ;;  %4991 = vrot.lane.b32.xlu0 %v8782_v41, %s7067_s6 }
 0xe65   : > { %6226 = vmatprep.subr.bf16.mxu0 %v6984_v43  ;;  %6246 = vmatprep.subr.bf16.mxu1 %v6986_v44 }
 0xe66   : > { %6227 = vmatpush3.bf16.msra.mxu0 %v6985_v45 }
 0xe67   : > { %6247 = vmatpush3.bf16.msra.mxu1 %v6987_v48 }
 0xe68   : > { %4889 = vrot.lane.b32.xlu1 %v8782_v41, %s7059_s9  ;;  %4923 = vrot.lane.b32.xlu0 %v8782_v41, %s7058_s8 }
 0xe69   : > { %4797 = vmatmul.mubr.bf16.vlgmr.msra.gmra.mxu0 %v8097_v6  ;;  %6248 = vmatprep.subr.bf16.mxu1 %v6988_v50  ;;  %v6992_v6 = vld [vmem:[%s9290_s1 + $0xdc4] ss:$36 sps:$4 sm:$0xff]  }
 0xe6a   : > { %4804 = vmatprep.mubr.bf16.mxu0 %v8277_v54  ;;  %v6993_v54 = vld [vmem:[%s9290_s1 + $0xb84] ss:$36 sps:$4 sm:$0xff]  }
 0xe6b   : > { %6249 = vmatpush3.bf16.msra.mxu1 %v6989_v38 }
 0xe6c   : > { %4959 = vrot.lane.b32.xlu1 %v8816_v23, %s7066_s14  ;;  %4993 = vrot.lane.b32.xlu0 %v8816_v23, %s7067_s6 }
 0xe6d   : > { %6250 = vmatprep.subr.bf16.mxu1 %v6990_v40 }
 0xe6f   : > { %6251 = vmatpush3.bf16.msra.mxu1 %v6991_v53 }
 0xe70   : > { %4891 = vrot.lane.b32.xlu1 %v8816_v23, %s7059_s9  ;;  %4925 = vrot.lane.b32.xlu0 %v8816_v23, %s7058_s8 }
 0xe71   : > { %4805 = vmatmul.mubr.bf16.gmra.mxu0 %v8280_v39  ;;  %6252 = vmatprep.subr.bf16.mxu1 %v6992_v6 }
 0xe72   : > { %5210 = vmatprep.mubr.bf16.mxu0 %v7061_v16 }
 0xe73   : > { %6253 = vmatpush3.bf16.msra.mxu1 %v6993_v54 }
 0xe74   : > { %6254 = vmatprep.subr.bf16.mxu1 %v6994_v19 }
 0xe77   : > { %6255 = vmatpush3.bf16.msra.mxu1 %v6995_v27 }
 0xe7a   : > { %4846 = vmatmul.mubr.bf16.vlgmr.msra.gmra.mxu1 %v8167_v22 }
 0xe7b   : > { %4853 = vmatprep.mubr.bf16.mxu1 %v8266_v33 }
 0xe7e   : > { %v4437_v55 = vpop.f32.mrf.mxu1 }
 0xe80   : > { %v4439_v56 = vpop.f32.mrf.mxu1 }
 0xe81   : > { %v4384_v58 = vpop.f32.mrf.mxu0 }
 0xe82   : > { %4854 = vmatmul.mubr.bf16.gmra.mxu1 %v8271_v35  ;;  %v4441_v39 = vpop.f32.mrf.mxu1  ;;  %v4438_v61 = vadd.f32 %v4437_v55, %v4384_v58 }
 0xe83   : > { %v4386_v59 = vpop.f32.mrf.mxu0  ;;  %5251 = vmatprep.mubr.bf16.mxu1 %v7061_v16 }
 0xe84   : > { %v4443_v63 = vpop.f32.mrf.mxu1  ;;  %v4440_v22 = vadd.f32 %v4439_v56, %v4386_v59 }
 0xe85   : > { %v4388_v60 = vpop.f32.mrf.mxu0 }
 0xe86   : > { %v4442_v62 = vadd.f32 %v4441_v39, %v4388_v60 }
 0xe87   : > { %v4390_v1 = vpop.f32.mrf.mxu0 }
 0xe88   : > { %v8848_v3 = vpack.c.bf16 %v4442_v62, %v4438_v61  ;;  %v4444_v7 = vadd.f32 %v4443_v63, %v4390_v1 }
 0xe89   : > { %v4480_v35 = vpop.f32.mrf.mxu0 }
 0xe8a   : > { %5102 = vrot.lane.b32.xlu1 %v8848_v3, %s7066_s14  ;;  %5136 = vrot.lane.b32.xlu0 %v8848_v3, %s7067_s6  ;;  %v8854_v33 = vpack.c.bf16 %v4444_v7, %v4440_v22 }
 0xe8b   : > { %v4482_v4 = vpop.f32.mrf.mxu0 }
 0xe8d   : > { %v4484_v10 = vpop.f32.mrf.mxu0 }
 0xe8e   : > { %5068 = vrot.lane.b32.xlu0 %v8848_v3, %s7058_s8  ;;  %5104 = vrot.lane.b32.xlu1 %v8854_v33, %s7066_s14 }
 0xe8f   : > { %v4486_v15 = vpop.f32.mrf.mxu0 }
 0xe91   : > { %v4490_v0 = vpop.f32.mrf.mxu0 }
 0xe92   : > { %5036 = vrot.lane.b32.xlu1 %v8854_v33, %s7059_s9  ;;  %5138 = vrot.lane.b32.xlu0 %v8854_v33, %s7067_s6 }
 0xe93   : > { %v4492_v57 = vpop.f32.mrf.mxu0 }
 0xe95   : > { %v4494_v9 = vpop.f32.mrf.mxu0 }
 0xe96   : > { %5070 = vrot.lane.b32.xlu0 %v8854_v33, %s7058_s8 }
 0xe97   : > { %v4496_v31 = vpop.f32.mrf.mxu0 }
 0xe9a   : > { %v4533_v8 = vpop.f32.mrf.mxu1 }
 0xe9b   : > { %v4534_v13 = vadd.f32 %v4533_v8, %v4480_v35 }
 0xe9c   : > { %v4535_v11 = vpop.f32.mrf.mxu1 }
 0xe9d   : > { %v4536_v24 = vadd.f32 %v4535_v11, %v4482_v4 }
 0xe9e   : > { %v4537_v12 = vpop.f32.mrf.mxu1 }
 0xe9f   : > { %v4538_v14 = vadd.f32 %v4537_v12, %v4484_v10 }
 0xea0   : > { %v4539_v17 = vpop.f32.mrf.mxu1 }
 0xea1   : > { %v8866_v18 = vpack.c.bf16 %v4538_v14, %v4534_v13  ;;  %v4540_v2 = vadd.f32 %v4539_v17, %v4486_v15 }
 0xea2   : > { %v4543_v20 = vpop.f32.mrf.mxu1 }
 0xea3   : > { %4995 = vrot.lane.b32.xlu1 %v8866_v18, %s7067_s6  ;;  %4961 = vrot.lane.b32.xlu0 %v8866_v18, %s7066_s14  ;;  %v8876_v46 = vpack.c.bf16 %v4540_v2, %v4536_v24  ;;  %v4544_v30 = vadd.f32 %v4543_v20, %v4490_v0 }
 0xea4   : > { %v4545_v21 = vpop.f32.mrf.mxu1 }
 0xea5   : > { %v4546_v34 = vadd.f32 %v4545_v21, %v4492_v57 }
 0xea6   : > { %v4547_v26 = vpop.f32.mrf.mxu1 }
 0xea7   : > { %4927 = vrot.lane.b32.xlu1 %v8866_v18, %s7058_s8  ;;  %4893 = vrot.lane.b32.xlu0 %v8866_v18, %s7059_s9  ;;  %v4548_v28 = vadd.f32 %v4547_v26, %v4494_v9 }
 0xea8   : > { %v4549_v29 = vpop.f32.mrf.mxu1 }
 0xea9   : > { %v8886_v5 = vpack.c.bf16 %v4548_v28, %v4544_v30  ;;  %v4550_v32 = vadd.f32 %v4549_v29, %v4496_v31 }
 0xeab   : > { %4963 = vrot.lane.b32.xlu1 %v8876_v46, %s7066_s14  ;;  %4997 = vrot.lane.b32.xlu0 %v8876_v46, %s7067_s6  ;;  %v8892_v25 = vpack.c.bf16 %v4550_v32, %v4546_v34 }
 0xeaf   : > { %4895 = vrot.lane.b32.xlu1 %v8876_v46, %s7059_s9  ;;  %4929 = vrot.lane.b32.xlu0 %v8876_v46, %s7058_s8 }
 0xeb3   : > { %5140 = vrot.lane.b32.xlu1 %v8886_v5, %s7067_s6  ;;  %5106 = vrot.lane.b32.xlu0 %v8886_v5, %s7066_s14 }
 0xeb7   : > { %5072 = vrot.lane.b32.xlu1 %v8886_v5, %s7058_s8  ;;  %5142 = vrot.lane.b32.xlu0 %v8892_v25, %s7067_s6 }
 0xebb   : > { %5108 = vrot.lane.b32.xlu1 %v8892_v25, %s7066_s14  ;;  %5074 = vrot.lane.b32.xlu0 %v8892_v25, %s7058_s8 }
 0xec9   : > { %v4586_v36 = vpop.f32.mrf.mxu0 }
 0xecb   : > { %v4588_v42 = vpop.f32.mrf.mxu0 }
 0xecd   : > { %v4590_v37 = vpop.f32.mrf.mxu0 }
 0xecf   : > { %v4592_v43 = vpop.f32.mrf.mxu0 }
 0xed1   : > { %v4596_v47 = vpop.f32.mrf.mxu0 }
 0xed3   : > { %v4598_v38 = vpop.f32.mrf.mxu0 }
 0xed5   : > { %v4600_v6 = vpop.f32.mrf.mxu0 }
 0xed6   : > { %v4958_v54 = vpop.permute.xlu1 %4957  ;;  %v4992_v55 = vpop.permute.xlu0 %4991 }
 0xed7   : > { %v8943_v0 = vpop.f32.mrf.mxu0 }
 0xeda   : > { %v4639_v44 = vpop.f32.mrf.mxu1  ;;  %v4890_v62 = vpop.permute.xlu1 %4889 }
 0xedb   : > { %v4640_v49 = vadd.f32 %v4639_v44, %v4586_v36  ;;  %v4924_v63 = vpop.permute.xlu0 %4923 }
 0xedc   : > { %v4641_v45 = vpop.f32.mrf.mxu1 }
 0xedd   : > { %v4642_v58 = vadd.f32 %v4641_v45, %v4588_v42 }
 0xede   : > { %v4643_v48 = vpop.f32.mrf.mxu1  ;;  %v4960_v1 = vpop.permute.xlu1 %4959 }
 0xedf   : > { %v4644_v50 = vadd.f32 %v4643_v48, %v4590_v37  ;;  %v4994_v7 = vpop.permute.xlu0 %4993  ;;  %v4975_v34 = vsel %vm1260_vm7, %v4958_v54, %v4960_v1 }
 0xee0   : > { %v4645_v51 = vpop.f32.mrf.mxu1  ;;  %v5009_v26 = vsel %vm1281_vm10, %v4992_v55, %v4994_v7 }
 0xee1   : > { %v8902_v52 = vpack.c.bf16 %v4644_v50, %v4640_v49  ;;  %v4646_v19 = vadd.f32 %v4645_v51, %v4592_v43 }
 0xee2   : > { %v4649_v40 = vpop.f32.mrf.mxu1  ;;  %v4892_v22 = vpop.permute.xlu1 %4891 }
 0xee3   : > { %4999 = vrot.lane.b32.xlu1 %v8902_v52, %s7067_s6  ;;  %4965 = vrot.lane.b32.xlu0 %v8902_v52, %s7066_s14  ;;  %v4650_v39 = vadd.f32 %v4649_v40, %v4596_v47  ;;  %v8914_v60 = vpack.c.bf16 %v4646_v19, %v4642_v58  ;;  %v4926_v35 = vpop.permute.xlu0 %4925  ;;  %v4907_v55 = vsel %vm1218_vm9, %v4890_v62, %v4892_v22 }
 0xee4   : > { %v4651_v53 = vpop.f32.mrf.mxu1  ;;  %v4941_v47 = vsel %vm1239_vm8, %v4924_v63, %v4926_v35 }
 0xee5   : > { %v8908_v27 = vadd.f32 %v4651_v53, %v4598_v38 }
 0xee6   : > { %v4653_v56 = vpop.f32.mrf.mxu1 }
 0xee7   : > { %v4654_v59 = vadd.f32 %v4653_v56, %v4600_v6  ;;  %4931 = vrot.lane.b32.xlu1 %v8902_v52, %s7058_s8  ;;  %4897 = vrot.lane.b32.xlu0 %v8902_v52, %s7059_s9 }
 0xee8   : > { %v8952_v9 = vpop.f32.mrf.mxu1 }
 0xee9   : > { %v8916_v61 = vpack.c.bf16 %v4654_v59, %v4650_v39 }
 0xeeb   : > { %5144 = vrot.lane.b32.xlu1 %v8916_v61, %s7067_s6  ;;  %5001 = vrot.lane.b32.xlu0 %v8914_v60, %s7067_s6 }
 0xeef   : > { %5076 = vrot.lane.b32.xlu1 %v8916_v61, %s7058_s8  ;;  %4967 = vrot.lane.b32.xlu0 %v8914_v60, %s7066_s14 }
 0xef3   : > { %4933 = vrot.lane.b32.xlu0 %v8914_v60, %s7058_s8 }
 0xef7   : > { %4899 = vrot.lane.b32.xlu0 %v8914_v60, %s7059_s9 }
 0xefb   : > { %5110 = vrot.lane.b32.xlu0 %v8916_v61, %s7066_s14 }
 0xefc   : > { %v5103_v4 = vpop.permute.xlu1 %5102  ;;  %v5137_v8 = vpop.permute.xlu0 %5136 }
 0xf00   : > { %v5069_v10 = vpop.permute.xlu0 %5068  ;;  %v5105_v11 = vpop.permute.xlu1 %5104 }
 0xf01   : > { %v8933_v12 = vsel %vm1260_vm7, %v5103_v4, %v5105_v11 }
 0xf04   : > { %v5139_v13 = vpop.permute.xlu0 %5138  ;;  %v8941_v20 = vpop.permute.xlu1 %5036 }
 0xf05   : > { %v8936_v14 = vsel %vm1281_vm10, %v5137_v8, %v5139_v13 }
 0xf08   : > { %v5071_v15 = vpop.permute.xlu0 %5070 }
 0xf09   : > { %v8939_v17 = vsel %vm1239_vm8, %v5069_v10, %v5071_v15  ;;  %v4692_v2 = vpop.f32.mrf.mxu0 }
 0xf0b   : > { %v4694_v28 = vpop.f32.mrf.mxu0 }
 0xf0d   : > { %v4696_v36 = vpop.f32.mrf.mxu0 }
 0xf0f   : > { %v4698_v50 = vpop.f32.mrf.mxu0 }
 0xf11   : > { %v8981_v58 = vpop.f32.mrf.mxu0 }
 0xf15   : > { %v8945_v21 = vpop.permute.xlu1 %4995  ;;  %v8947_v24 = vpop.permute.xlu0 %4961 }
 0xf16   : > { %v5010_v57 = vsel %vm1281_vm10, %v4994_v7, %v8945_v21  ;;  %v4976_v29 = vsel %vm1260_vm7, %v4960_v1, %v8947_v24  ;;  %v4704_v1 = vpop.f32.mrf.mxu0  ;;  %v8998_v7 = vld [vmem:[%s9291_s2 + $0x80] sm:$0x1] }
 0xf17   : > { %5184 = vmatprep.subr.bf16.mxu0 %v5010_v57 }
 0xf18   : > { %5185 = vmatpush1.bf16.msra.mxu0 %v5009_v26 }
 0xf19   : > { %v8956_v30 = vpop.permute.xlu1 %4927  ;;  %5186 = vmatprep.subr.bf16.mxu0 %v4976_v29  ;;  %v8958_v31 = vpop.permute.xlu0 %4893 }
 0xf1a   : > { %v4745_v32 = vpop.f32.mrf.mxu1  ;;  %v4942_v37 = vsel %vm1239_vm8, %v4926_v35, %v8956_v30  ;;  %v4908_v38 = vsel %vm1218_vm9, %v4892_v22, %v8958_v31 }
 0xf1b   : > { %v4746_v48 = vadd.f32 %v4745_v32, %v4692_v2  ;;  %v4656_v32 = vadd.f32 %v8952_v9, %v8943_v0 }
 0xf1c   : > { %v4747_v42 = vpop.f32.mrf.mxu1  ;;  %5187 = vmatpush1.bf16.msra.mxu0 %v4975_v34 }
 0xf1d   : > { %v8963_v43 = vpop.permute.xlu1 %4963  ;;  %5188 = vmatprep.subr.bf16.mxu0 %v4942_v37  ;;  %v8965_v44 = vpop.permute.xlu0 %4997  ;;  %v4748_v40 = vadd.f32 %v4747_v42, %v4694_v28  ;;  %v9043_v37 = vpack.c.bf16 %v4656_v32, %v8908_v27 }
 0xf1e   : > { %v4749_v45 = vpop.f32.mrf.mxu1 }
 0xf1f   : > { %v4750_v49 = vadd.f32 %v4749_v45, %v4696_v36 }
 0xf20   : > { %v4751_v51 = vpop.f32.mrf.mxu1  ;;  %5189 = vmatpush1.bf16.msra.mxu0 %v4941_v47 }
 0xf21   : > { %v8970_v53 = vpack.c.bf16 %v4750_v49, %v4746_v48  ;;  %v4752_v6 = vadd.f32 %v4751_v51, %v4698_v50  ;;  %v8972_v54 = vpop.permute.xlu1 %4895  ;;  %5190 = vmatprep.subr.bf16.mxu0 %v4908_v38  ;;  %v8974_v19 = vpop.permute.xlu0 %4929 }
 0xf22   : > { %v9015_v8 = vpop.f32.mrf.mxu1 }
 0xf23   : > { %v8977_v56 = vpack.c.bf16 %v4752_v6, %v4748_v40  ;;  %5003 = vrot.lane.b32.xlu1 %v8970_v53, %s7067_s6 }
 0xf24   : > { %5191 = vmatpush1.bf16.msra.mxu0 %v4907_v55  ;;  %v4757_v57 = vpop.f32.mrf.mxu1 }
 0xf25   : > { %v5141_v39 = vpop.permute.xlu1 %5140  ;;  %5005 = vrot.lane.b32.xlu0 %v8977_v56, %s7067_s6  ;;  %5192 = vmatprep.subr.bf16.mxu0 %v8816_v23  ;;  %v5107_v59 = vpop.permute.xlu0 %5106  ;;  %v4758_v48 = vadd.f32 %v4757_v57, %v4704_v1  ;;  %v5011_v57 = vsel %vm1281_vm10, %v8945_v21, %v8965_v44  ;;  %v2867_v21 = vld [vmem:[%s9292_s3 + $0x80] sm:$0x1] }
 0xf26   : > { %v8987_v63 = vsel %vm1281_vm10, %v5139_v13, %v5141_v39  ;;  %v8992_v62 = vsel %vm1260_vm7, %v5105_v11, %v5107_v59  ;;  %v4759_v28 = vpop.f32.mrf.mxu1 }
 0xf27   : > { %4969 = vrot.lane.b32.xlu1 %v8970_v53, %s7066_s14 }
 0xf28   : > { %5193 = vmatpush1.bf16.msra.mxu0 %v8782_v41  ;;  %v4706_v41 = vpop.f32.mrf.mxu0  ;;  %v4761_v34 = vpop.f32.mrf.mxu1 }
 0xf29   : > { %v5073_v22 = vpop.permute.xlu1 %5072  ;;  %4971 = vrot.lane.b32.xlu0 %v8977_v56, %s7066_s14  ;;  %v9002_v23 = vpop.permute.xlu0 %5142  ;;  %v4760_v32 = vadd.f32 %v4759_v28, %v4706_v41 }
 0xf2a   : > { %v9005_v35 = vsel %vm1239_vm8, %v5071_v15, %v5073_v22  ;;  %v9009_v4 = vsel %vm1281_vm10, %v5141_v39, %v9002_v23  ;;  %v4708_v2 = vpop.f32.mrf.mxu0 }
 0xf2b   : > { %4935 = vrot.lane.b32.xlu1 %v8970_v53, %s7058_s8  ;;  %6124 = vmatmul.mubr.msk.bf16.vlgmr.msra.gmra.mxu0 %vm2346_vm11, %v8998_v7  ;;  %v4762_v45 = vadd.f32 %v4761_v34, %v4708_v2 }
 0xf2c   : > { %5292 = vmatprep.mubr.bf16.mxu0 %v7061_v16  ;;  %v6228_v26 = vpop.f32.mrf.mxu0 }
 0xf2d   : > { %v9018_v10 = vpop.permute.xlu1 %5108  ;;  %4937 = vrot.lane.b32.xlu0 %v8977_v56, %s7058_s8  ;;  %v9026_v13 = vpop.permute.xlu0 %5074  ;;  %v9047_v51 = vpack.c.bf16 %v4762_v45, %v4758_v48 }
 0xf2e   : > { %v9024_v11 = vsel %vm1260_vm7, %v5107_v59, %v9018_v10  ;;  %v9030_v15 = vsel %vm1239_vm8, %v5073_v22, %v9026_v13  ;;  %v6229_v29 = vpop.f32.mrf.mxu0 }
 0xf2f   : > { %4901 = vrot.lane.b32.xlu1 %v8970_v53, %s7059_s9  ;;  %v6230_v38 = vadd.f32 %v6229_v29, %v6228_v26 }
 0xf30   : > { %v6231_v36 = vpop.f32.mrf.mxu0 }
 0xf31   : > { %4903 = vrot.lane.b32.xlu0 %v8977_v56, %s7059_s9 }
 0xf32   : > { %v6232_v49 = vpop.f32.mrf.mxu0 }
 0xf33   : > { %v6233_v40 = vadd.f32 %v6232_v49, %v6231_v36  ;;  %v4909_v49 = vsel %vm1218_vm9, %v8958_v31, %v8972_v54 }
 0xf34   : > { %v6234_v26 = vpop.f32.mrf.mxu0 }
 0xf35   : > { %5038 = vrot.lane.b32.xlu0 %v8886_v5, %s7059_s9 }
 0xf36   : > { %v6235_v41 = vpop.f32.mrf.mxu0 }
 0xf39   : > { %5042 = vrot.lane.b32.xlu0 %v8916_v61, %s7059_s9 }
 0xf3a   : > { %v6256_v42 = vpop.f32.mrf.mxu1 }
 0xf3c   : > { %v6257_v47 = vpop.f32.mrf.mxu1 }
 0xf3d   : > { %5146 = vrot.lane.b32.xlu0 %v9043_v37, %s7067_s6  ;;  %v6258_v0 = vadd.f32 %v6257_v47, %v6256_v42  ;;  %v4756_v42 = vadd.f32 %v9015_v8, %v8981_v58 }
 0xf3e   : > { %v6259_v50 = vpop.f32.mrf.mxu1 }
 0xf3f   : > { %v4848_v27 = vadd.f32 %v6258_v0, %v6230_v38  ;;  %v9097_v45 = vpack.c.bf16 %v4760_v32, %v4756_v42 }
 0xf40   : > { %v6260_v9 = vpop.f32.mrf.mxu1 }
 0xf41   : > { %v6261_v6 = vadd.f32 %v6260_v9, %v6259_v50  ;;  %5150 = vrot.lane.b32.xlu0 %v9047_v51, %s7067_s6  ;;  %v6236_v9 = vadd.f32 %v6235_v41, %v6234_v26 }
 0xf42   : > { %v6262_v22 = vpop.f32.mrf.mxu1 }
 0xf43   : > { %v4851_v55 = vadd.f32 %v6261_v6, %v6233_v40 }
 0xf44   : > { %v6263_v36 = vpop.f32.mrf.mxu1 }
 0xf45   : > { %v4870_v39 = vpack.c.bf16 %v4851_v55, %v4848_v27  ;;  %5112 = vrot.lane.b32.xlu0 %v9043_v37, %s7066_s14  ;;  %v6264_v0 = vadd.f32 %v6263_v36, %v6262_v22 }
 0xf46   : > { %v6265_v48 = vpop.f32.mrf.mxu1 }
 0xf47   : > { %5007 = vrot.lane.b32.xlu1 %v4870_v39, %s7067_s6  ;;  %v4856_v40 = vadd.f32 %v6264_v0, %v6236_v9 }
 0xf48   : > { %v6266_v8 = vpop.f32.mrf.mxu1 }
 0xf49   : > { %5116 = vrot.lane.b32.xlu0 %v9047_v51, %s7066_s14 }
 0xf4b   : > { %4973 = vrot.lane.b32.xlu1 %v4870_v39, %s7066_s14 }
 0xf4d   : > { %5078 = vrot.lane.b32.xlu0 %v9043_v37, %s7058_s8 }
 0xf4f   : > { %4939 = vrot.lane.b32.xlu1 %v4870_v39, %s7058_s8 }
 0xf51   : > { %5082 = vrot.lane.b32.xlu0 %v9047_v51, %s7058_s8 }
 0xf53   : > { %4905 = vrot.lane.b32.xlu1 %v4870_v39, %s7059_s9 }
 0xf55   : > { %v9063_v59 = vpop.permute.xlu1 %4999  ;;  %5044 = vrot.lane.b32.xlu0 %v9043_v37, %s7059_s9  ;;  %v9067_v1 = vpop.permute.xlu0 %4965 }
 0xf56   : > { %v5012_v2 = vsel %vm1281_vm10, %v8965_v44, %v9063_v59  ;;  %v4978_v29 = vsel %vm1260_vm7, %v8963_v43, %v9067_v1  ;;  %v4977_v44 = vsel %vm1260_vm7, %v8947_v24, %v8963_v43  ;;  %v4943_v24 = vsel %vm1239_vm8, %v8956_v30, %v8974_v19  ;;  %v6237_v43 = vpop.f32.mrf.mxu0 }
 0xf57   : > { %5040 = vrot.lane.b32.xlu1 %v8892_v25, %s7059_s9  ;;  %5225 = vmatprep.subr.bf16.mxu1 %v5012_v2  ;;  %v6267_v30 = vadd.f32 %v6266_v8, %v6265_v48 }
 0xf58   : > { %5226 = vmatpush1.bf16.msra.mxu1 %v5011_v57  ;;  %v6238_v50 = vpop.f32.mrf.mxu0 }
 0xf59   : > { %v9080_v34 = vpop.permute.xlu1 %4931  ;;  %5048 = vrot.lane.b32.xlu0 %v9047_v51, %s7059_s9  ;;  %5227 = vmatprep.subr.bf16.mxu1 %v4978_v29  ;;  %v4898_v47 = vpop.permute.xlu0 %4897 }
 0xf5a   : > { %v4944_v28 = vsel %vm1239_vm8, %v8974_v19, %v9080_v34  ;;  %v4910_v58 = vsel %vm1218_vm9, %v8972_v54, %v4898_v47  ;;  %v6239_v19 = vadd.f32 %v6238_v50, %v6237_v43 }
 0xf5b   : > { %5034 = vrot.lane.b32.xlu1 %v8848_v3, %s7059_s9 }
 0xf5c   : > { %5228 = vmatpush1.bf16.msra.mxu1 %v4977_v44  ;;  %v4859_v38 = vadd.f32 %v6267_v30, %v6239_v19 }
 0xf5d   : > { %5172 = vperm.xlu0 %6408, %v2867_v21   ;;  %5229 = vmatprep.subr.bf16.mxu1 %v4944_v28  ;;  %v9124_v6 = vpop.permute.xlu1 %5144 }
 0xf5e   : > { %v4879_v31 = vpack.c.bf16 %v4859_v38, %v4856_v40  ;;  %v5157_v40 = vsel %vm1281_vm10, %v9002_v23, %v9124_v6 }
 0xf5f   : > { %5148 = vrot.lane.b32.xlu1 %v9097_v45, %s7067_s6 }
 0xf60   : > { %5230 = vmatpush1.bf16.msra.mxu1 %v4943_v24 }
 0xf61   : > { %5231 = vmatprep.subr.bf16.mxu1 %v4910_v58  ;;  %v9126_v55 = vpop.permute.xlu1 %5076 }
 0xf63   : > { %5114 = vrot.lane.b32.xlu1 %v9097_v45, %s7066_s14 }
 0xf64   : > { %5232 = vmatpush1.bf16.msra.mxu1 %v4909_v49 }
 0xf65   : > { %5233 = vmatprep.subr.bf16.mxu1 %v8876_v46  ;;  %v5002_v46 = vpop.permute.xlu0 %5001 }
 0xf66   : > { %v5013_v57 = vsel %vm1281_vm10, %v9063_v59, %v5002_v46 }
 0xf67   : > { %5080 = vrot.lane.b32.xlu1 %v9097_v45, %s7058_s8 }
 0xf68   : > { %5234 = vmatpush1.bf16.msra.mxu1 %v8866_v18 }
 0xf69   : > { %v4968_v18 = vpop.permute.xlu0 %4967 }
 0xf6a   : > { %v4979_v36 = vsel %vm1260_vm7, %v9067_v1, %v4968_v18 }
 0xf6b   : > { %5046 = vrot.lane.b32.xlu1 %v9097_v45, %s7059_s9  ;;  %6125 = vmatmul.mubr.msk.bf16.vlgmr.msra.gmra.mxu1 %vm2346_vm11, %v8998_v7 }
 0xf6c   : > { %5333 = vmatprep.mubr.bf16.mxu1 %v7061_v16 }
 0xf6d   : > { %v4934_v54 = vpop.permute.xlu0 %4933 }
 0xf6e   : > { %v4945_v41 = vsel %vm1239_vm8, %v9080_v34, %v4934_v54 }
 0xf6f   : > { %5152 = vrot.lane.b32.xlu1 %v4879_v31, %s7067_s6 }
 0xf71   : > { %v4900_v27 = vpop.permute.xlu0 %4899 }
 0xf72   : > { %v4911_v24 = vsel %vm1218_vm9, %v4898_v47, %v4900_v27 }
 0xf73   : > { %5118 = vrot.lane.b32.xlu1 %v4879_v31, %s7066_s14  ;;  %s6140_s14 = sshll.u32 %s7118_s19, 8 }
 0xf74   : > { %s9245_s12 = scalar_lea.hbm %s9293_s4, %s6140_s14 }
 0xf75   : > { %v9128_v39 = vpop.permute.xlu0 %5110 }
 0xf77   : > { %5084 = vrot.lane.b32.xlu1 %v4879_v31, %s7058_s8  ;;  %s191_s8 = sand.u32 1, %s7048_s16  }
 0xf78   : > { %s9249_s19 = scalar_lea.sflag [#allocation3], %s191_s8 }
 0xf7b   : > { %5050 = vrot.lane.b32.xlu1 %v4879_v31, %s7059_s9  ;;  %s5698_s9 = sshll.u32 %s191_s8, 4 }
 0xf7c   : > { %s193_s6 = scalar_lea.vmem [#allocation2], %s5698_s9 }
 0xf7d   : > { %s5632_s7 = sshll.u32 %s193_s6, 4  ;;  %s9247_s7 = int_to_ptr.vmem [resolvable:$true] %s5632_s7 }
 0xf7e   : > { %s6996_s13 = scalar_lea.vmem %s9247_s7, 256  ;;  %p7003_p0 = scmp.lt.s32.totalorder %s9247_s7, %s7001_s22 }
 0xf7f   : > { %p6997_p11 = scmp.ne.s32.totalorder %s9247_s7, %s6996_s13  ;;  %p7004_p1 = scmp.lt.s32.totalorder %s7002_s23, %s6996_s13 }
 0xf81   : > { %p6998_p12 = pnand %p6997_p11, %p7135_p5  ;;  %p7005_p2 = por %p7004_p1, %p7003_p0 }
 0xf83   : > { %p6999_p13 = pneg %p6998_p12 }
 0xf85   : > { %p7006_p3 = pnand %p7005_p2, %p6999_p13 }
 0xf95   : > { %v5004_v22 = vpop.permute.xlu1 %5003 }
 0xf96   : > { %v5014_v2 = vsel %vm1281_vm10, %v5002_v46, %v5004_v22 }
 0xf97   : > { %5266 = vmatprep.subr.bf16.mxu0 %v5014_v2  ;;  %v5006_v26 = vpop.permute.xlu0 %5005 }
 0xf98   : > { %5267 = vmatpush1.bf16.msra.mxu0 %v5013_v57  ;;  %v5015_v43 = vsel %vm1281_vm10, %v5004_v22, %v5006_v26 }
 0xf99   : > { %v4970_v29 = vpop.permute.xlu1 %4969 }
 0xf9a   : > { %v4980_v32 = vsel %vm1260_vm7, %v4968_v18, %v4970_v29 }
 0xf9b   : > { %5268 = vmatprep.subr.bf16.mxu0 %v4980_v32  ;;  %v4972_v21 = vpop.permute.xlu0 %4971 }
 0xf9c   : > { %5269 = vmatpush1.bf16.msra.mxu0 %v4979_v36 }
 0xf9d   : > { %v4936_v44 = vpop.permute.xlu1 %4935 }
 0xf9e   : > { %v4946_v42 = vsel %vm1239_vm8, %v4934_v54, %v4936_v44 }
 0xf9f   : > { %5270 = vmatprep.subr.bf16.mxu0 %v4946_v42  ;;  %v4938_v59 = vpop.permute.xlu0 %4937 }
 0xfa0   : > { %5271 = vmatpush1.bf16.msra.mxu0 %v4945_v41  ;;  %v4947_v49 = vsel %vm1239_vm8, %v4936_v44, %v4938_v59 }
 0xfa1   : > { %v4902_v28 = vpop.permute.xlu1 %4901 }
 0xfa2   : > { %v4912_v48 = vsel %vm1218_vm9, %v4900_v27, %v4902_v28 }
 0xfa3   : > { %5272 = vmatprep.subr.bf16.mxu0 %v4912_v48  ;;  %v4904_v1 = vpop.permute.xlu0 %4903 }
 0xfa4   : > { %5273 = vmatpush1.bf16.msra.mxu0 %v4911_v24  ;;  %v4913_v0 = vsel %vm1218_vm9, %v4902_v28, %v4904_v1 }
 0xfa5   : > { %5274 = vmatprep.subr.bf16.mxu0 %v8914_v60 }
 0xfa7   : > { %v9148_v34 = vpop.permute.xlu0 %5038 }
 0xfa8   : > { %5275 = vmatpush1.bf16.msra.mxu0 %v8902_v52  ;;  %v5053_v52 = vsel %vm1218_vm9, %v8941_v20, %v9148_v34 }
 0xfa9   : > { %5348 = vmatprep.subr.bf16.mxu0 %v8987_v63 }
 0xfab   : > { %6126 = vmatmul.mubr.msk.bf16.vlgmr.msra.gmra.mxu0 %vm2346_vm11, %v8998_v7  ;;  %v9153_v60 = vpop.permute.xlu0 %5042 }
 0xfac   : > { %5349 = vmatpush1.bf16.msra.mxu0 %v8936_v14  ;;  %5374 = vmatprep.mubr.bf16.mxu0 %v7061_v16 }
 0xfad   : > { %5350 = vmatprep.subr.bf16.mxu0 %v8992_v62 }
 0xfaf   : > { %v5147_v14 = vpop.permute.xlu0 %5146 }
 0xfb0   : > { %5351 = vmatpush1.bf16.msra.mxu0 %v8933_v12 }
 0xfb1   : > { %5352 = vmatprep.subr.bf16.mxu0 %v9005_v35  ;;  %v4981_v35 = vsel %vm1260_vm7, %v4970_v29, %v4972_v21 }
 0xfb3   : > { %v9163_v58 = vpop.permute.xlu0 %5150 }
 0xfb4   : > { %5353 = vmatpush1.bf16.msra.mxu0 %v8939_v17 }
 0xfb5   : > { %5354 = vmatprep.subr.bf16.mxu0 %v5053_v52 }
 0xfb7   : > { %v5113_v50 = vpop.permute.xlu0 %5112 }
 0xfb9   : > { %v5008_v63 = vpop.permute.xlu1 %5007 }
 0xfba   : > { %v5016_v47 = vsel %vm1281_vm10, %v5006_v26, %v5008_v63 }
 0xfbb   : > { %5307 = vmatprep.subr.bf16.mxu1 %v5016_v47  ;;  %v5117_v38 = vpop.permute.xlu0 %5116 }
 0xfbc   : > { %5308 = vmatpush1.bf16.msra.mxu1 %v5015_v43 }
 0xfbd   : > { %v4974_v12 = vpop.permute.xlu1 %4973 }
 0xfbe   : > { %v4982_v62 = vsel %vm1260_vm7, %v4972_v21, %v4974_v12 }
 0xfbf   : > { %5309 = vmatprep.subr.bf16.mxu1 %v4982_v62 }
 0xfc0   : > { %5310 = vmatpush1.bf16.msra.mxu1 %v4981_v35 }
 0xfc1   : > { %v4940_v17 = vpop.permute.xlu1 %4939 }
 0xfc2   : > { %v4948_v8 = vsel %vm1239_vm8, %v4938_v59, %v4940_v17 }
 0xfc3   : > { %5311 = vmatprep.subr.bf16.mxu1 %v4948_v8 }
 0xfc4   : > { %5312 = vmatpush1.bf16.msra.mxu1 %v4947_v49 }
 0xfc5   : > { %v4906_v30 = vpop.permute.xlu1 %4905 }
 0xfc6   : > { %v4914_v19 = vsel %vm1218_vm9, %v4904_v1, %v4906_v30 }
 0xfc7   : > { %5313 = vmatprep.subr.bf16.mxu1 %v4914_v19 }
 0xfc8   : > { %5314 = vmatpush1.bf16.msra.mxu1 %v4913_v0 }
 0xfc9   : > { %v5041_v9 = vpop.permute.xlu1 %5040  ;;  %5315 = vmatprep.subr.bf16.mxu1 %v8977_v56  ;;  %v5079_v56 = vpop.permute.xlu0 %5078 }
 0xfca   : > { %v5054_v27 = vsel %vm1218_vm9, %v9148_v34, %v5041_v9 }
 0xfcc   : > { %5316 = vmatpush1.bf16.msra.mxu1 %v8970_v53  ;;  %v5123_v53 = vsel %vm1260_vm7, %v9018_v10, %v9128_v39 }
 0xfcd   : > { %v5035_v31 = vpop.permute.xlu1 %5034  ;;  %5389 = vmatprep.subr.bf16.mxu1 %v5157_v40  ;;  %v5083_v54 = vpop.permute.xlu0 %5082 }
 0xfce   : > { %v5052_v46 = vsel %vm1218_vm9, %v5035_v31, %v8941_v20  ;;  %v7068_v31 = vmov 1966171168  }
 0xfcf   : > { %6127 = vmatmul.mubr.msk.bf16.vlgmr.msra.gmra.mxu1 %vm2346_vm11, %v8998_v7  ;;  %5355 = vmatpush1.bf16.msra.mxu0 %v5052_v46  ;;  %v5552_v46 = vunpack.c.l.s4 %v7068_v31 }
 0xfd0   : > { %5356 = vmatprep.subr.bf16.mxu0 %v8854_v33  ;;  %5390 = vmatpush1.bf16.msra.mxu1 %v9009_v4  ;;  %v5089_v33 = vsel %vm1239_vm8, %v9026_v13, %v9126_v55  ;;  %v5158_v4 = vsel %vm1281_vm10, %v9124_v6, %v5147_v14  ;;  %v5124_v13 = vsel %vm1260_vm7, %v9128_v39, %v5113_v50 }
 0xfd1   : > { %v5149_v18 = vpop.permute.xlu1 %5148  ;;  %5391 = vmatprep.subr.bf16.mxu1 %v5123_v53  ;;  %5415 = vmatprep.mubr.bf16.mxu1 %v7061_v16  ;;  %v5045_v22 = vpop.permute.xlu0 %5044  ;;  %v5554_v53 = vlaneseq }
 0xfd2   : > { %v5159_v23 = vsel %vm1281_vm10, %v5147_v14, %v5149_v18  ;;  %v5056_v26 = vsel %vm1218_vm9, %v9153_v60, %v5045_v22 }
 0xfd3   : > { %5357 = vmatpush1.bf16.msra.mxu0 %v8848_v3  ;;  %v5055_v3 = vsel %vm1218_vm9, %v5041_v9, %v9153_v60 }
 0xfd4   : > { %5392 = vmatpush1.bf16.msra.mxu1 %v9024_v11  ;;  %5430 = vmatprep.subr.bf16.mxu0 %v5159_v23  ;;  %v5553_v23 = vunpack.c.0.s8 %v5552_v46 }
 0xfd5   : > { %v5115_v20 = vpop.permute.xlu1 %5114  ;;  %5393 = vmatprep.subr.bf16.mxu1 %v5089_v33  ;;  %v5555_v33 = vshrl.u32 %v5554_v53, 7 }
 0xfd6   : > { %6128 = vmatmul.mubr.msk.bf16.vlgmr.msra.gmra.mxu0 %vm2346_vm11, %v8998_v7  ;;  %v5125_v10 = vsel %vm1260_vm7, %v5113_v50, %v5115_v20  ;;  %v5126_v32 = vsel %vm1260_vm7, %v5115_v20, %v5117_v38 }
 0xfd7   : > { %5431 = vmatpush1.bf16.msra.mxu0 %v5158_v4  ;;  %5456 = vmatprep.mubr.bf16.mxu0 %v7061_v16 }
 0xfd8   : > { %5394 = vmatpush1.bf16.msra.mxu1 %v9030_v15  ;;  %5432 = vmatprep.subr.bf16.mxu0 %v5125_v10  ;;  %v5090_v15 = vsel %vm1239_vm8, %v9126_v55, %v5079_v56 }
 0xfd9   : > { %v5081_v11 = vpop.permute.xlu1 %5080  ;;  %5395 = vmatprep.subr.bf16.mxu1 %v5055_v3 }
 0xfda   : > { %v5091_v6 = vsel %vm1239_vm8, %v5079_v56, %v5081_v11  ;;  %v5092_v42 = vsel %vm1239_vm8, %v5081_v11, %v5083_v54 }
 0xfdb   : > { %5433 = vmatpush1.bf16.msra.mxu0 %v5124_v13 }
 0xfdc   : > { %5396 = vmatpush1.bf16.msra.mxu1 %v5054_v27  ;;  %5434 = vmatprep.subr.bf16.mxu0 %v5091_v6  ;;  %v5556_v6 = vsub.s32 %v5553_v23, %v5555_v33 }
 0xfdd   : > { %v5047_v2 = vpop.permute.xlu1 %5046  ;;  %5397 = vmatprep.subr.bf16.mxu1 %v8892_v25  ;;  %v5160_v25 = vsel %vm1281_vm10, %v5149_v18, %v9163_v58 }
 0xfde   : > { %v5057_v57 = vsel %vm1218_vm9, %v5045_v22, %v5047_v2 }
 0xfdf   : > { %5435 = vmatpush1.bf16.msra.mxu0 %v5090_v15 }
 0xfe0   : > { %5398 = vmatpush1.bf16.msra.mxu1 %v8886_v5  ;;  %5436 = vmatprep.subr.bf16.mxu0 %v5057_v57 }
 0xfe1   : > { %v5153_v39 = vpop.permute.xlu1 %5152 }
 0xfe2   : > { %v5161_v29 = vsel %vm1281_vm10, %v9163_v58, %v5153_v39 }
 0xfe3   : > { %6129 = vmatmul.mubr.msk.bf16.vlgmr.msra.gmra.mxu1 %vm2346_vm11, %v8998_v7  ;;  %5437 = vmatpush1.bf16.msra.mxu0 %v5056_v26 }
 0xfe4   : > { %5471 = vmatprep.subr.bf16.mxu1 %v5161_v29  ;;  %5438 = vmatprep.subr.bf16.mxu0 %v9043_v37  ;;  %v5049_v37 = vpop.permute.xlu0 %5048 }
 0xfe5   : > { %5472 = vmatpush1.bf16.msra.mxu1 %v5160_v25  ;;  %v5119_v5 = vpop.permute.xlu1 %5118  ;;  %5497 = vmatprep.mubr.bf16.mxu1 %v7061_v16  ;;  %v5058_v28 = vsel %vm1218_vm9, %v5047_v2, %v5049_v37 }
 0xfe6   : > { %v5127_v55 = vsel %vm1260_vm7, %v5117_v38, %v5119_v5 }
 0xfe7   : > { %5439 = vmatpush1.bf16.msra.mxu0 %v8916_v61  ;;  %5473 = vmatprep.subr.bf16.mxu1 %v5127_v55 }
 0xfe8   : > { %v5173_v58 = vpop.permute.xlu0 %5172 }
 0xfe9   : > { %5474 = vmatpush1.bf16.msra.mxu1 %v5126_v32  ;;  %v5085_v36 = vpop.permute.xlu1 %5084 }
 0xfea   : > { %6130 = vmatmul.mubr.msk.bf16.vlgmr.msra.gmra.mxu0 %vm2346_vm11, %v8998_v7  ;;  %v5093_v21 = vsel %vm1239_vm8, %v5083_v54, %v5085_v36 }
 0xfeb   : > { %v5212_v44 = vpop.f32.mrf.mxu0  ;;  %5475 = vmatprep.subr.bf16.mxu1 %v5093_v21 }
 0xfec   : > { %v5213_v50 = vadd.f32 %v5212_v44, %v5173_v58 }
 0xfed   : > { %5476 = vmatpush1.bf16.msra.mxu1 %v5092_v42  ;;  %v5051_v16 = vpop.permute.xlu1 %5050  ;;  %v5214_v41 = vpop.f32.mrf.mxu0 }
 0xfee   : > { %v5059_v61 = vsel %vm1218_vm9, %v5049_v37, %v5051_v16  ;;  %v5215_v30 = vadd.f32 %v5214_v41, %v5173_v58 }
 0xfef   : > { %5477 = vmatprep.subr.bf16.mxu1 %v5059_v61  ;;  %v5216_v59 = vpop.f32.mrf.mxu0 }
 0xff1   : > { %5478 = vmatpush1.bf16.msra.mxu1 %v5058_v28  ;;  %v5217_v48 = vpop.f32.mrf.mxu0 }
 0xff2   : > { %5479 = vmatprep.subr.bf16.mxu1 %v9047_v51 }
 0xff5   : > { %5480 = vmatpush1.bf16.msra.mxu1 %v9097_v45 }
 0xff8   : > { %6131 = vmatmul.mubr.msk.bf16.vlgmr.msra.gmra.mxu1 %vm2346_vm11, %v8998_v7 }
0x102b   : > { %v5253_v24 = vpop.f32.mrf.mxu1 }
0x102c   : > { %v5254_v3 = vadd.f32 %v5253_v24, %v5173_v58 }
0x102d   : > { %v5255_v1 = vpop.f32.mrf.mxu1 }
0x102e   : > { %v5256_v11 = vadd.f32 %v5255_v1, %v5173_v58 }
0x102f   : > { %v5257_v34 = vpop.f32.mrf.mxu1 }
0x1031   : > { %v5258_v60 = vpop.f32.mrf.mxu1 }
0x106b   : > { %v5294_v52 = vpop.f32.mrf.mxu0 }
0x106c   : > { %v5295_v32 = vadd.f32 %v5294_v52, %v5173_v58 }
0x106d   : > { %v5296_v14 = vpop.f32.mrf.mxu0 }
0x106e   : > { %v5297_v21 = vadd.f32 %v5296_v14, %v5173_v58 }
0x106f   : > { %v5298_v63 = vpop.f32.mrf.mxu0 }
0x1071   : > { %v5299_v47 = vpop.f32.mrf.mxu0 }
0x108f   : > { %v5335_v43 = vpop.f32.mrf.mxu1 }
0x1090   : > { %v5336_v52 = vadd.f32 %v5335_v43, %v5173_v58 }
0x1091   : > { %v5337_v12 = vpop.f32.mrf.mxu1 }
0x1092   : > { %v5338_v63 = vadd.f32 %v5337_v12, %v5173_v58 }
0x1093   : > { %v5339_v62 = vpop.f32.mrf.mxu1 }
0x1095   : > { %v5340_v35 = vpop.f32.mrf.mxu1 }
0x1096   : > { %v5376_v17 = vpop.f32.mrf.mxu0 }
0x1097   : > { %v5377_v51 = vadd.f32 %v5376_v17, %v5173_v58 }
0x1098   : > { %v5378_v8 = vpop.f32.mrf.mxu0 }
0x1099   : > { %v5514_v45 = vrot.slane %v5377_v51, 7  ;;  %v5379_v49 = vadd.f32 %v5378_v8, %v5173_v58 }
0x109a   : > { %v5380_v7 = vpop.f32.mrf.mxu0 }
0x109b   : > { %v5515_v19 = vrot.slane %v5379_v49, 7  ;;  %v5531_v9 = vsel %vm5530_vm12, %v5213_v50, %v5514_v45 }
0x109c   : > { %v5381_v0 = vpop.f32.mrf.mxu0 }
0x109d   : > { %v5532_v38 = vsel %vm5530_vm12, %v5215_v30, %v5515_v19 }
0x109e   : > { %v5547_v40 = vcombine.low %v5531_v9, %v5532_v38 }
0x10a0   : > { %v5557_v29 = vrot.slane %v5547_v40, %v5556_v6 }
0x10a3   : > { %v5417_v56 = vpop.f32.mrf.mxu1 }
0x10a4   : > { %v5418_v18 = vadd.f32 %v5417_v56, %v5173_v58 }
0x10a5   : > { %v5419_v20 = vpop.f32.mrf.mxu1 }
0x10a6   : > { %v5516_v4 = vrot.slane %v5418_v18, 7  ;;  %v5420_v10 = vadd.f32 %v5419_v20, %v5173_v58 }
0x10a7   : > { %v5421_v54 = vpop.f32.mrf.mxu1 }
0x10a8   : > { %v5517_v13 = vrot.slane %v5420_v10, 7  ;;  %v5533_v22 = vsel %vm5530_vm12, %v5254_v3, %v5516_v4 }
0x10a9   : > { %v5422_v27 = vpop.f32.mrf.mxu1 }
0x10aa   : > { %v5534_v2 = vsel %vm5530_vm12, %v5256_v11, %v5517_v13  ;;  %v5458_v15 = vpop.f32.mrf.mxu0 }
0x10ab   : > { %v5548_v57 = vcombine.low %v5533_v22, %v5534_v2  ;;  %v5459_v39 = vadd.f32 %v5458_v15, %v5173_v58 }
0x10ac   : > { %v5460_v26 = vpop.f32.mrf.mxu0 }
0x10ad   : > { %v5564_v25 = vrot.slane %v5548_v57, %v5556_v6  ;;  %v5518_v5 = vrot.slane %v5459_v39, 7  ;;  %v5461_v55 = vadd.f32 %v5460_v26, %v5173_v58 }
0x10ae   : > { %v5462_v36 = vpop.f32.mrf.mxu0 }
0x10af   : > { %v5579_v44 = vcombine.low %v5557_v29, %v5564_v25  ;;  %v5580_v37 = vcombine.high %v5557_v29, %v5564_v25  ;;  %v5519_v42 = vrot.slane %v5461_v55, 7  ;;  %v5535_v41 = vsel %vm5530_vm12, %v5295_v32, %v5518_v5 }
0x10b0   : > { %v5463_v16 = vpop.f32.mrf.mxu0 }
0x10b1   : > { %v5536_v61 = vsel %vm5530_vm12, %v5297_v21, %v5519_v42  ;;  %v5589_v7 = vrot.slane %v5579_v44, %v5556_v6  ;;  %v5596_v50 = vrot.slane %v5580_v37, %v5556_v6 }
0x10b2   : > { %v5549_v59 = vcombine.low %v5535_v41, %v5536_v61 }
0x10b4   : > { %v5571_v51 = vrot.slane %v5549_v59, %v5556_v6 }
0x10b8   : > { %v5499_v28 = vpop.f32.mrf.mxu1 }
0x10b9   : > { %v5500_v48 = vadd.f32 %v5499_v28, %v5173_v58 }
0x10ba   : > { %v5501_v24 = vpop.f32.mrf.mxu1 }
0x10bb   : > { %v5520_v1 = vrot.slane %v5500_v48, 7  ;;  %v5502_v34 = vadd.f32 %v5501_v24, %v5173_v58 }
0x10bc   : > { %v5503_v60 = vpop.f32.mrf.mxu1 }
0x10bd   : > { %v5521_v14 = vrot.slane %v5502_v34, 7  ;;  %v5537_v62 = vsel %vm5530_vm12, %v5336_v52, %v5520_v1 }
0x10be   : > { %v5504_v47 = vpop.f32.mrf.mxu1 }
0x10bf   : > { %v5538_v35 = vsel %vm5530_vm12, %v5338_v63, %v5521_v14 }
0x10c0   : > { %v5550_v17 = vcombine.low %v5537_v62, %v5538_v35 }
0x10c2   : > { %v5578_v8 = vrot.slane %v5550_v17, %v5556_v6 }
0x10c4   : > { %v5581_v45 = vcombine.low %v5571_v51, %v5578_v8  ;;  %v5582_v49 = vcombine.high %v5571_v51, %v5578_v8 }
0x10c6   : > { %v5603_v43 = vrot.slane %v5581_v45, %v5556_v6  ;;  %v5610_v12 = vrot.slane %v5582_v49, %v5556_v6 }
0x10c8   : > { %v5611_v58 = vcombine.low %v5589_v7, %v5603_v43  ;;  %v5612_v30 = vcombine.low %v5596_v50, %v5610_v12 }
0x10ca   : > { %5615 = vst [vmem:[%s193_s6] sm:$0xff] %v5611_v58  ;;  %5616 = vst [vmem:[%s193_s6 + $0x8] sm:$0xff] %v5612_v30 }
0x10cb   : > { %7009 = shalt.err (!%p7006_p3)
}
0x10cc   : > { %s7010_s27 = scalar_lea.hbm %s9245_s12, 256  ;;  %s7014_s30 = scalar_lea.hbm %s9293_s4, 512 }
0x10cd   : > { %p7011_p4 = scmp.ne.s32.totalorder %s9245_s12, %s7010_s27  ;;  %p7015_p9 = scmp.lt.s32.totalorder %s9245_s12, %s9293_s4 }
0x10ce   : > { %p7016_p10 = scmp.lt.s32.totalorder %s7014_s30, %s7010_s27 }
0x10cf   : > { %p7012_p7 = pnand %p7011_p4, %p7135_p5 }
0x10d0   : > { %p7017_p11 = por %p7016_p10, %p7015_p9 }
0x10d1   : > { %p7013_p8 = pneg %p7012_p7 }
0x10d3   : > { %p7018_p12 = pnand %p7017_p11, %p7013_p8 }
0x10d5   : > { %7021 = shalt.err (!%p7018_p12)
}
0x10d6   : > { %s7070_s9 = smov 128   ;;  %s7071_s14 = smov 8  }
0x10d7   : > { %6355 = dma.vmem_to_hbm [thread:$0]  (%p7135_p5), %s9247_s7, 256, %s9245_s12, %s9249_s19, %s7070_s9, %s7070_s9, %s7071_s14  }
0x10d8 PF: > { %p6361_p13 = scmp.ge.s32.totalorder %s7056_s18, 2  ;;  %s5647_s6 = sand.u32 1, %s7044_s15  }
0x10d9   : > { %s5648_s10 = scalar_lea.sflag [#allocation3], %s5647_s6 }
0x10da   : > { %p6358_p0 = pnand %p6361_p13, %p7139_p6 }
0x10dc   : > { %p6359_p1 = pneg %p6358_p0 }
0x10de   : > { %7039 = dma.done.wait (%p6359_p1), %s5648_s10, 256  }
0x10df   : > { %7041 = vsyncadd (%p6359_p1), %s5648_s10, 4294967040  ;;  %p14_p2 = scmp.ge.s32.totalorder %s7122_s21, 4   ;;  %s9296_s15 = smov %s7048_s16 }
0x10e0   : > { %s9297_s16 = smov %s7052_s17  ;;  %s9298_s17 = smov %s7133_s24 }
0x10e1   : > { %s9299_s18 = smov %s7122_s21  ;;  %16 = sbr.rel (!%p14_p2) target bundleno = 3 (0x3), region = 71 }
0x10e6   :  { %5653 = vsyncpa [#allocation3], 1 }
0x10e7   :  { %5655 = vsyncpa [#allocation3 + $0x1], 1 }

</bundles_post_ra>
